<compile_context>
chip_gen: v5e
topology: v5e:2x2
jax: 0.10.0
libtpu: 0.0.40
codegen_flags: <defaults>
</compile_context>

<pallas_src>
from functools import partial

import numpy as np
import jax
import jax.numpy as jnp
from jax.experimental import pallas as pl
from jax.experimental.pallas import tpu as pltpu


def promneural_kernel(x_ref, w1_ref, b1_ref, w2_ref, b2_ref, w3_ref, b3_ref,
                      wf1_ref, bf1_ref, wf2_ref, bf2_ref, wor_ref,
                      bl_ref, br_ref, out_ref):
    f32 = jnp.float32
    bf16 = jnp.bfloat16
    x = x_ref[...]                                               # (BT, 68) f32

    # conv_ch_1 (1x1 conv, 4->4) as a block-diagonal matmul + ReLU.
    h = jnp.maximum(
        jnp.dot(x.astype(bf16), w1_ref[...], preferred_element_type=f32)
        + b1_ref[...], 0.0)                                      # (BT, 68)

    # conv1 (kernel (4,1), 4->16, out len 14) as a banded matmul + ReLU.
    h = jnp.maximum(
        jnp.dot(h.astype(bf16), w2_ref[...], preferred_element_type=f32)
        + b2_ref[...], 0.0)                                      # (BT, 224)

    # conv2 (kernel (2,1), 16->32, out len 13) as a banded matmul + ReLU.
    h = jnp.maximum(
        jnp.dot(h.astype(bf16), w3_ref[...], preferred_element_type=f32)
        + b3_ref[...], 0.0)                                      # (BT, 416) == view(-1, 13*32)

    # TODO(synk): nn.Dropout(0.3) is identity at inference time (no RNG mask).

    # fc1 (single K=416 contraction) + ReLU.
    f1 = jnp.maximum(
        jnp.dot(h.astype(bf16), wf1_ref[...], preferred_element_type=f32)
        + bf1_ref[...], 0.0)                                     # (BT, 128)

    # fc2 + ReLU.
    f2 = jnp.maximum(
        jnp.dot(f1.astype(bf16), wf2_ref[...], preferred_element_type=f32)
        + bf2_ref[...], 0.0)                                     # (BT, 64)

    # ORNet tail — kept off the MXU (a (BT,64)@(64,1) dot would waste a full
    # MXU tile on the serial critical path): broadcast-mul + cross-lane sum.
    s = jnp.sum(f2 * wor_ref[...], axis=-1, keepdims=True)       # (BT, 1) f32

    # cat([1, y, 0]) adjacent difference without concat / shift / matmul:
    #   d[:, j] = sigmoid(s + bL_j) - sigmoid(s + bR_j)
    # with bL = [+BIG, b_0..b_{K-1}] and bR = [b_0..b_{K-1}, -BIG]
    # (sigmoid(+BIG)=1, sigmoid(-BIG)=0).  Kept in f32: the final log-odds
    # amplifies rounding when d is small.
    def sig(z):
        return 1.0 / (1.0 + jnp.exp(-z))

    d = sig(s + bl_ref[...]) - sig(s + br_ref[...])              # (BT, nclass)

    # log(d / (1 - d)) == log(d) - log(1 - d): two EUP logs, no VPU divide.
    out_ref[...] = jnp.log(d) - jnp.log(1.0 - d)


def prepare_weights(p, nclass):
    """Fold the tiny convs into dense matmul weights. Call ONCE (hoisted)."""
    f32, bf16 = jnp.float32, jnp.bfloat16
    L0, L1, L2 = 17, 14, 13          # lengths after each conv
    C0, C1, C2 = 4, 16, 32           # channel counts
    K1, K2 = 4, 2                    # conv kernel lengths

    # conv_ch_1 (1x1): W1[c*17+h, o*17+h'] = w[o,c] * (h==h')
    w1 = p['conv_ch1_w'][:, :, 0, 0]                              # (o=4, c=4)
    W1 = jnp.einsum('oc,hk->chok', w1,
                    jnp.eye(L0, dtype=f32)).reshape(C0 * L0, C0 * L0)
    b1 = jnp.repeat(p['conv_ch1_b'], L0)[None, :]                 # (1, 68)

    # conv1: W2[c*17+i, o*14+l] = sum_k w[o,c,k] * (i == l+k)
    wc1 = p['conv1_w'][:, :, :, 0]                                # (16, 4, 4)
    S1 = (np.arange(L0)[None, :, None]
          == (np.arange(L1)[None, None, :]
              + np.arange(K1)[:, None, None])).astype(np.float32)  # (K1, L0, L1)
    W2 = jnp.einsum('ock,kil->ciol', wc1,
                    jnp.asarray(S1)).reshape(C0 * L0, C1 * L1)
    b2 = jnp.repeat(p['conv1_b'], L1)[None, :]                    # (1, 224)

    # conv2: W3[c*14+i, o*13+l] = sum_k w[o,c,k] * (i == l+k)
    wc2 = p['conv2_w'][:, :, :, 0]                                # (32, 16, 2)
    S2 = (np.arange(L1)[None, :, None]
          == (np.arange(L2)[None, None, :]
              + np.arange(K2)[:, None, None])).astype(np.float32)  # (K2, L1, L2)
    W3 = jnp.einsum('ock,kil->ciol', wc2,
                    jnp.asarray(S2)).reshape(C1 * L1, C2 * L2)
    b3 = jnp.repeat(p['conv2_b'], L2)[None, :]                    # (1, 416)

    # fc layers: our flatten order (c*13 + l) equals PyTorch's NCHW view.
    wf1 = p['fc1_w'].T                                            # (416, 128)
    bf1 = p['fc1_b'][None, :]                                     # (1, 128)
    wf2 = p['fc2_w'].T                                            # (128, 64)
    bf2 = p['fc2_b'][None, :]                                     # (1, 64)
    wor = p['or_w']                                               # (1, 64) — VPU row

    # ORNet shifted-bias rows implementing cat([1, y, 0]) differences.
    ob = np.asarray(p['or_bias'], np.float32)                     # (nclass-1,)
    BIG = np.float32(1e30)
    bl = np.concatenate([[BIG], ob])[None, :].astype(np.float32)  # (1, nclass)
    br = np.concatenate([ob, [-BIG]])[None, :].astype(np.float32)

    return (W1.astype(bf16), b1.astype(f32),
            W2.astype(bf16), b2.astype(f32),
            W3.astype(bf16), b3.astype(f32),
            wf1.astype(bf16), bf1.astype(f32),
            wf2.astype(bf16), bf2.astype(f32),
            wor.astype(f32), jnp.asarray(bl), jnp.asarray(br))


def _ceil_to(x, m):
    return -(-x // m) * m


@partial(jax.jit, static_argnames=("nclass", "block_batch"))
def promneural_forward(x_nchw, weights, *, nclass, block_batch=1024):
    """x_nchw: (B, 4, 17, 1) float32 (PyTorch NCHW); weights from prepare_weights."""
    B, Cin, L, W = x_nchw.shape
    F = Cin * L * W                                               # 68

    # (B,4,17,1) -> (B,68): collapse of contiguous trailing dims (free reshape,
    # feature index = c*17 + h, i.e. NCHW memory order).
    x2 = x_nchw.reshape(B, F)

    # Batch tile: multiple of 8 (sublane), capped at block_batch.  At BT<=2048
    # f32 the live VMEM (~15 MiB) fits the default 32 MiB scoped limit on
    # v5e/v6e/v7x; set pltpu.CompilerParams(vmem_limit_bytes=...) before
    # pushing BT to 4096 on v7x (64 MiB physical VMEM).
    BT = int(min(block_batch, _ceil_to(B, 8)))
    # Keep >=2 grid steps when the batch allows it so the "parallel" axis can
    # feed both v7x TensorCores (harmless on single-TC v5e/v6e).
    if B > 2 * 128 and -(-B // BT) < 2:
        BT = max(128, _ceil_to(-(-B // 2), 8))
    grid = (-(-B // BT),)   # no host-side pad: ragged tail is OOB-masked

    def _const_spec(a):
        nd = a.ndim
        return pl.BlockSpec(a.shape, lambda b, _nd=nd: (0,) * _nd)

    in_specs = ([pl.BlockSpec((BT, F), lambda b: (b, 0))]
                + [_const_spec(w) for w in weights])
    out_spec = pl.BlockSpec((BT, nclass), lambda b: (b, 0))

    return pl.pallas_call(
        promneural_kernel,
        out_shape=jax.ShapeDtypeStruct((B, nclass), jnp.float32),
        grid=grid,
        in_specs=in_specs,
        out_specs=out_spec,
        compiler_params=pltpu.CompilerParams(
            dimension_semantics=("parallel",)),
    )(x2, *weights)


def init_params(key, nclass):
    ks = jax.random.split(key, 12)
    p = {}
    p['conv_ch1_w'] = 0.30 * jax.random.normal(ks[0], (4, 4, 1, 1), jnp.float32)
    p['conv_ch1_b'] = 0.10 * jax.random.normal(ks[1], (4,), jnp.float32)
    p['conv1_w'] = 0.20 * jax.random.normal(ks[2], (16, 4, 4, 1), jnp.float32)
    p['conv1_b'] = 0.10 * jax.random.normal(ks[3], (16,), jnp.float32)
    p['conv2_w'] = 0.15 * jax.random.normal(ks[4], (32, 16, 2, 1), jnp.float32)
    p['conv2_b'] = 0.10 * jax.random.normal(ks[5], (32,), jnp.float32)
    p['fc1_w'] = 0.05 * jax.random.normal(ks[6], (128, 13 * 32), jnp.float32)
    p['fc1_b'] = 0.05 * jax.random.normal(ks[7], (128,), jnp.float32)
    p['fc2_w'] = 0.10 * jax.random.normal(ks[8], (64, 128), jnp.float32)
    p['fc2_b'] = 0.05 * jax.random.normal(ks[9], (64,), jnp.float32)
    p['or_w'] = 0.10 * jax.random.normal(ks[10], (1, 64), jnp.float32)
    # PyTorch: or_bias = randn(nclass-1) sorted descending.
    p['or_bias'] = jnp.sort(
        jax.random.normal(ks[11], (nclass - 1,), jnp.float32))[::-1]
    return p


def reference_forward(x, p):
    """Pure-JAX reference mirroring the PyTorch forward (NCHW convs)."""
    dn = ('NCHW', 'OIHW', 'NCHW')

    def conv(h, w):
        return jax.lax.conv_general_dilated(h, w, (1, 1), 'VALID',
                                            dimension_numbers=dn)

    h = jax.nn.relu(conv(x, p['conv_ch1_w'])
                    + p['conv_ch1_b'][None, :, None, None])
    h = jax.nn.relu(conv(h, p['conv1_w'])
                    + p['conv1_b'][None, :, None, None])
    h = jax.nn.relu(conv(h, p['conv2_w'])
                    + p['conv2_b'][None, :, None, None])        # (B, 32, 13, 1)
    hf = h.reshape(h.shape[0], -1)                              # channel-major flatten
    f1 = jax.nn.relu(hf @ p['fc1_w'].T + p['fc1_b'])
    f2 = jax.nn.relu(f1 @ p['fc2_w'].T + p['fc2_b'])
    s = f2 @ p['or_w'].T                                        # (B, 1)
    y = jax.nn.sigmoid(s + p['or_bias'][None, :])               # (B, nclass-1)
    B = y.shape[0]
    cat = jnp.concatenate(
        [jnp.ones((B, 1), jnp.float32), y, jnp.zeros((B, 1), jnp.float32)],
        axis=1)
    d = cat[:, :-1] - cat[:, 1:]
    return jnp.log(d / (1.0 - d))


if __name__ == "__main__":
    key = jax.random.PRNGKey(0)
    kp, kx = jax.random.split(key)

    NCLASS = 5
    BATCH = 384          # with block_batch=256: 2 grid steps incl. ragged tail
    params = init_params(kp, NCLASS)
    # Input implied by the module: (B, 4, 17, 1) so the conv stack yields 13*32.
    x = jax.random.normal(kx, (BATCH, 4, 17, 1), jnp.float32)

    # Weight prep is hoisted out of the per-call path: built once here.
    weights = prepare_weights(params, NCLASS)

    out = promneural_forward(x, weights, nclass=NCLASS, block_batch=256)
    out = jax.block_until_ready(out)

    ref = reference_forward(x, params)
    # bf16 MXU operands vs. the f32 XLA reference; the final log-odds error is
    # O(delta_s) ~ 1e-3 here, well inside the 1e-2 band (structural/indexing
    # bugs would be O(1)).
    np.testing.assert_allclose(np.asarray(out), np.asarray(ref),
                               rtol=1e-2, atol=1e-2)
    print("KERNEL_OK")
</pallas_src>

<mosaic_0001>
module attributes {stable_mosaic.version = 11 : i64} {
  func.func @promneural_kernel(%arg0: i32, %arg1: memref<256x68xf32, #tpu.memory_space<vmem>>, %arg2: memref<68x68xbf16, #tpu.memory_space<vmem>>, %arg3: memref<1x68xf32, #tpu.memory_space<vmem>>, %arg4: memref<68x224xbf16, #tpu.memory_space<vmem>>, %arg5: memref<1x224xf32, #tpu.memory_space<vmem>>, %arg6: memref<224x416xbf16, #tpu.memory_space<vmem>>, %arg7: memref<1x416xf32, #tpu.memory_space<vmem>>, %arg8: memref<416x128xbf16, #tpu.memory_space<vmem>>, %arg9: memref<1x128xf32, #tpu.memory_space<vmem>>, %arg10: memref<128x64xbf16, #tpu.memory_space<vmem>>, %arg11: memref<1x64xf32, #tpu.memory_space<vmem>>, %arg12: memref<1x64xf32, #tpu.memory_space<vmem>>, %arg13: memref<1x5xf32, #tpu.memory_space<vmem>>, %arg14: memref<1x5xf32, #tpu.memory_space<vmem>>, %arg15: memref<256x5xf32, #tpu.memory_space<vmem>>) attributes {dimension_semantics = [#tpu.dimension_semantics<parallel>], iteration_bounds = array<i64: 2>, scalar_prefetch = 0 : i64, scratch_operands = 0 : i64, tpu.core_type = #tpu.core_type<tc>, window_params = [{transform_indices = @transform_0, window_bounds = array<i64: 256, 68>}, {pipeline_mode = #tpu.pipeline_mode<synchronous>, transform_indices = @transform_1, window_bounds = array<i64: 68, 68>}, {pipeline_mode = #tpu.pipeline_mode<synchronous>, transform_indices = @transform_2, window_bounds = array<i64: 1, 68>}, {pipeline_mode = #tpu.pipeline_mode<synchronous>, transform_indices = @transform_3, window_bounds = array<i64: 68, 224>}, {pipeline_mode = #tpu.pipeline_mode<synchronous>, transform_indices = @transform_4, window_bounds = array<i64: 1, 224>}, {pipeline_mode = #tpu.pipeline_mode<synchronous>, transform_indices = @transform_5, window_bounds = array<i64: 224, 416>}, {pipeline_mode = #tpu.pipeline_mode<synchronous>, transform_indices = @transform_6, window_bounds = array<i64: 1, 416>}, {pipeline_mode = #tpu.pipeline_mode<synchronous>, transform_indices = @transform_7, window_bounds = array<i64: 416, 128>}, {pipeline_mode = #tpu.pipeline_mode<synchronous>, transform_indices = @transform_8, window_bounds = array<i64: 1, 128>}, {pipeline_mode = #tpu.pipeline_mode<synchronous>, transform_indices = @transform_9, window_bounds = array<i64: 128, 64>}, {pipeline_mode = #tpu.pipeline_mode<synchronous>, transform_indices = @transform_10, window_bounds = array<i64: 1, 64>}, {pipeline_mode = #tpu.pipeline_mode<synchronous>, transform_indices = @transform_11, window_bounds = array<i64: 1, 64>}, {pipeline_mode = #tpu.pipeline_mode<synchronous>, transform_indices = @transform_12, window_bounds = array<i64: 1, 5>}, {pipeline_mode = #tpu.pipeline_mode<synchronous>, transform_indices = @transform_13, window_bounds = array<i64: 1, 5>}, {transform_indices = @transform_14, window_bounds = array<i64: 256, 5>}]} {
    %c0 = arith.constant 0 : index
    %c0_0 = arith.constant 0 : index
    %0 = vector.load %arg1[%c0, %c0_0] : memref<256x68xf32, #tpu.memory_space<vmem>>, vector<256x68xf32>
    %1 = arith.truncf %0 : vector<256x68xf32> to vector<256x68xbf16>
    %c0_1 = arith.constant 0 : index
    %c0_2 = arith.constant 0 : index
    %2 = vector.load %arg2[%c0_1, %c0_2] : memref<68x68xbf16, #tpu.memory_space<vmem>>, vector<68x68xbf16>
    %cst = arith.constant dense<0.000000e+00> : vector<256x68xf32>
    %3 = tpu.matmul %1, %2, %cst {dimension_numbers = #tpu.dot_dimension_numbers<[1], [0], [0], [1], [0, 0, 1, 1], [], []>} : vector<256x68xbf16>, vector<68x68xbf16>, vector<256x68xf32> -> vector<256x68xf32>
    %c0_3 = arith.constant 0 : index
    %c0_4 = arith.constant 0 : index
    %4 = vector.load %arg3[%c0_3, %c0_4] : memref<1x68xf32, #tpu.memory_space<vmem>>, vector<1x68xf32>
    %5 = vector.broadcast %4 : vector<1x68xf32> to vector<256x68xf32>
    %6 = arith.addf %3, %5 : vector<256x68xf32>
    %cst_5 = arith.constant 0.000000e+00 : f32
    %7 = vector.broadcast %cst_5 : f32 to vector<256x68xf32>
    %8 = arith.maximumf %6, %7 : vector<256x68xf32>
    %9 = arith.truncf %8 : vector<256x68xf32> to vector<256x68xbf16>
    %c0_6 = arith.constant 0 : index
    %c0_7 = arith.constant 0 : index
    %10 = vector.load %arg4[%c0_6, %c0_7] : memref<68x224xbf16, #tpu.memory_space<vmem>>, vector<68x224xbf16>
    %cst_8 = arith.constant dense<0.000000e+00> : vector<256x224xf32>
    %11 = tpu.matmul %9, %10, %cst_8 {dimension_numbers = #tpu.dot_dimension_numbers<[1], [0], [0], [1], [0, 0, 1, 1], [], []>} : vector<256x68xbf16>, vector<68x224xbf16>, vector<256x224xf32> -> vector<256x224xf32>
    %c0_9 = arith.constant 0 : index
    %c0_10 = arith.constant 0 : index
    %12 = vector.load %arg5[%c0_9, %c0_10] : memref<1x224xf32, #tpu.memory_space<vmem>>, vector<1x224xf32>
    %13 = vector.broadcast %12 : vector<1x224xf32> to vector<256x224xf32>
    %14 = arith.addf %11, %13 : vector<256x224xf32>
    %cst_11 = arith.constant 0.000000e+00 : f32
    %15 = vector.broadcast %cst_11 : f32 to vector<256x224xf32>
    %16 = arith.maximumf %14, %15 : vector<256x224xf32>
    %17 = arith.truncf %16 : vector<256x224xf32> to vector<256x224xbf16>
    %c0_12 = arith.constant 0 : index
    %c0_13 = arith.constant 0 : index
    %18 = vector.load %arg6[%c0_12, %c0_13] : memref<224x416xbf16, #tpu.memory_space<vmem>>, vector<224x416xbf16>
    %cst_14 = arith.constant dense<0.000000e+00> : vector<256x416xf32>
    %19 = tpu.matmul %17, %18, %cst_14 {dimension_numbers = #tpu.dot_dimension_numbers<[1], [0], [0], [1], [0, 0, 1, 1], [], []>} : vector<256x224xbf16>, vector<224x416xbf16>, vector<256x416xf32> -> vector<256x416xf32>
    %c0_15 = arith.constant 0 : index
    %c0_16 = arith.constant 0 : index
    %20 = vector.load %arg7[%c0_15, %c0_16] : memref<1x416xf32, #tpu.memory_space<vmem>>, vector<1x416xf32>
    %21 = vector.broadcast %20 : vector<1x416xf32> to vector<256x416xf32>
    %22 = arith.addf %19, %21 : vector<256x416xf32>
    %cst_17 = arith.constant 0.000000e+00 : f32
    %23 = vector.broadcast %cst_17 : f32 to vector<256x416xf32>
    %24 = arith.maximumf %22, %23 : vector<256x416xf32>
    %25 = arith.truncf %24 : vector<256x416xf32> to vector<256x416xbf16>
    %c0_18 = arith.constant 0 : index
    %c0_19 = arith.constant 0 : index
    %26 = vector.load %arg8[%c0_18, %c0_19] : memref<416x128xbf16, #tpu.memory_space<vmem>>, vector<416x128xbf16>
    %cst_20 = arith.constant dense<0.000000e+00> : vector<256x128xf32>
    %27 = tpu.matmul %25, %26, %cst_20 {dimension_numbers = #tpu.dot_dimension_numbers<[1], [0], [0], [1], [0, 0, 1, 1], [], []>} : vector<256x416xbf16>, vector<416x128xbf16>, vector<256x128xf32> -> vector<256x128xf32>
    %c0_21 = arith.constant 0 : index
    %c0_22 = arith.constant 0 : index
    %28 = vector.load %arg9[%c0_21, %c0_22] : memref<1x128xf32, #tpu.memory_space<vmem>>, vector<1x128xf32>
    %29 = vector.broadcast %28 : vector<1x128xf32> to vector<256x128xf32>
    %30 = arith.addf %27, %29 : vector<256x128xf32>
    %cst_23 = arith.constant 0.000000e+00 : f32
    %31 = vector.broadcast %cst_23 : f32 to vector<256x128xf32>
    %32 = arith.maximumf %30, %31 : vector<256x128xf32>
    %33 = arith.truncf %32 : vector<256x128xf32> to vector<256x128xbf16>
    %c0_24 = arith.constant 0 : index
    %c0_25 = arith.constant 0 : index
    %34 = vector.load %arg10[%c0_24, %c0_25] : memref<128x64xbf16, #tpu.memory_space<vmem>>, vector<128x64xbf16>
    %cst_26 = arith.constant dense<0.000000e+00> : vector<256x64xf32>
    %35 = tpu.matmul %33, %34, %cst_26 {dimension_numbers = #tpu.dot_dimension_numbers<[1], [0], [0], [1], [0, 0, 1, 1], [], []>} : vector<256x128xbf16>, vector<128x64xbf16>, vector<256x64xf32> -> vector<256x64xf32>
    %c0_27 = arith.constant 0 : index
    %c0_28 = arith.constant 0 : index
    %36 = vector.load %arg11[%c0_27, %c0_28] : memref<1x64xf32, #tpu.memory_space<vmem>>, vector<1x64xf32>
    %37 = vector.broadcast %36 : vector<1x64xf32> to vector<256x64xf32>
    %38 = arith.addf %35, %37 : vector<256x64xf32>
    %cst_29 = arith.constant 0.000000e+00 : f32
    %39 = vector.broadcast %cst_29 : f32 to vector<256x64xf32>
    %40 = arith.maximumf %38, %39 : vector<256x64xf32>
    %c0_30 = arith.constant 0 : index
    %c0_31 = arith.constant 0 : index
    %41 = vector.load %arg12[%c0_30, %c0_31] : memref<1x64xf32, #tpu.memory_space<vmem>>, vector<1x64xf32>
    %42 = vector.broadcast %41 : vector<1x64xf32> to vector<256x64xf32>
    %43 = arith.mulf %40, %42 : vector<256x64xf32>
    %cst_32 = arith.constant dense<0.000000e+00> : vector<256xf32>
    %44 = vector.multi_reduction <add>, %43, %cst_32 [1] : vector<256x64xf32> to vector<256xf32>
    %45 = vector.shape_cast %44 : vector<256xf32> to vector<256x1xf32>
    %c0_33 = arith.constant 0 : index
    %c0_34 = arith.constant 0 : index
    %46 = vector.load %arg13[%c0_33, %c0_34] : memref<1x5xf32, #tpu.memory_space<vmem>>, vector<1x5xf32>
    %47 = vector.broadcast %45 : vector<256x1xf32> to vector<256x5xf32>
    %48 = vector.broadcast %46 : vector<1x5xf32> to vector<256x5xf32>
    %49 = arith.addf %47, %48 : vector<256x5xf32>
    %cst_35 = arith.constant 0.000000e+00 : f32
    %50 = vector.broadcast %cst_35 : f32 to vector<256x5xf32>
    %51 = arith.subf %50, %49 : vector<256x5xf32>
    %52 = math.exp %51 : vector<256x5xf32>
    %cst_36 = arith.constant 1.000000e+00 : f32
    %53 = vector.broadcast %cst_36 : f32 to vector<256x5xf32>
    %54 = arith.addf %53, %52 : vector<256x5xf32>
    %cst_37 = arith.constant 1.000000e+00 : f32
    %55 = vector.broadcast %cst_37 : f32 to vector<256x5xf32>
    %56 = arith.divf %55, %54 : vector<256x5xf32>
    %c0_38 = arith.constant 0 : index
    %c0_39 = arith.constant 0 : index
    %57 = vector.load %arg14[%c0_38, %c0_39] : memref<1x5xf32, #tpu.memory_space<vmem>>, vector<1x5xf32>
    %58 = vector.broadcast %45 : vector<256x1xf32> to vector<256x5xf32>
    %59 = vector.broadcast %57 : vector<1x5xf32> to vector<256x5xf32>
    %60 = arith.addf %58, %59 : vector<256x5xf32>
    %cst_40 = arith.constant 0.000000e+00 : f32
    %61 = vector.broadcast %cst_40 : f32 to vector<256x5xf32>
    %62 = arith.subf %61, %60 : vector<256x5xf32>
    %63 = math.exp %62 : vector<256x5xf32>
    %cst_41 = arith.constant 1.000000e+00 : f32
    %64 = vector.broadcast %cst_41 : f32 to vector<256x5xf32>
    %65 = arith.addf %64, %63 : vector<256x5xf32>
    %cst_42 = arith.constant 1.000000e+00 : f32
    %66 = vector.broadcast %cst_42 : f32 to vector<256x5xf32>
    %67 = arith.divf %66, %65 : vector<256x5xf32>
    %68 = arith.subf %56, %67 : vector<256x5xf32>
    %69 = math.log %68 : vector<256x5xf32>
    %cst_43 = arith.constant 1.000000e+00 : f32
    %70 = vector.broadcast %cst_43 : f32 to vector<256x5xf32>
    %71 = arith.subf %70, %68 : vector<256x5xf32>
    %72 = math.log %71 : vector<256x5xf32>
    %73 = arith.subf %69, %72 : vector<256x5xf32>
    %c0_44 = arith.constant 0 : index
    %c0_45 = arith.constant 0 : index
    %74 = vector.load %arg15[%c0_44, %c0_45] : memref<256x5xf32, #tpu.memory_space<vmem>>, vector<256x5xf32>
    tpu.vector_store %arg15[%c0_44, %c0_45], %73 {strides = array<i32>} : memref<256x5xf32, #tpu.memory_space<vmem>>, vector<256x5xf32>,
    return
  }
  func.func @transform_0(%arg0: i32) -> (i32, i32) {
    %c0_i32 = arith.constant 0 : i32
    %c0_i32_0 = arith.constant 0 : i32
    return %arg0, %c0_i32 : i32, i32
  }
  func.func @transform_1(%arg0: i32) -> (i32, i32) {
    %c0_i32 = arith.constant 0 : i32
    %c0_i32_0 = arith.constant 0 : i32
    %c0_i32_1 = arith.constant 0 : i32
    return %c0_i32, %c0_i32_0 : i32, i32
  }
  func.func @transform_2(%arg0: i32) -> (i32, i32) {
    %c0_i32 = arith.constant 0 : i32
    %c0_i32_0 = arith.constant 0 : i32
    %c0_i32_1 = arith.constant 0 : i32
    return %c0_i32, %c0_i32_0 : i32, i32
  }
  func.func @transform_3(%arg0: i32) -> (i32, i32) {
    %c0_i32 = arith.constant 0 : i32
    %c0_i32_0 = arith.constant 0 : i32
    %c0_i32_1 = arith.constant 0 : i32
    return %c0_i32, %c0_i32_0 : i32, i32
  }
  func.func @transform_4(%arg0: i32) -> (i32, i32) {
    %c0_i32 = arith.constant 0 : i32
    %c0_i32_0 = arith.constant 0 : i32
    %c0_i32_1 = arith.constant 0 : i32
    return %c0_i32, %c0_i32_0 : i32, i32
  }
  func.func @transform_5(%arg0: i32) -> (i32, i32) {
    %c0_i32 = arith.constant 0 : i32
    %c0_i32_0 = arith.constant 0 : i32
    %c0_i32_1 = arith.constant 0 : i32
    return %c0_i32, %c0_i32_0 : i32, i32
  }
  func.func @transform_6(%arg0: i32) -> (i32, i32) {
    %c0_i32 = arith.constant 0 : i32
    %c0_i32_0 = arith.constant 0 : i32
    %c0_i32_1 = arith.constant 0 : i32
    return %c0_i32, %c0_i32_0 : i32, i32
  }
  func.func @transform_7(%arg0: i32) -> (i32, i32) {
    %c0_i32 = arith.constant 0 : i32
    %c0_i32_0 = arith.constant 0 : i32
    %c0_i32_1 = arith.constant 0 : i32
    return %c0_i32, %c0_i32_0 : i32, i32
  }
  func.func @transform_8(%arg0: i32) -> (i32, i32) {
    %c0_i32 = arith.constant 0 : i32
    %c0_i32_0 = arith.constant 0 : i32
    %c0_i32_1 = arith.constant 0 : i32
    return %c0_i32, %c0_i32_0 : i32, i32
  }
  func.func @transform_9(%arg0: i32) -> (i32, i32) {
    %c0_i32 = arith.constant 0 : i32
    %c0_i32_0 = arith.constant 0 : i32
    %c0_i32_1 = arith.constant 0 : i32
    return %c0_i32, %c0_i32_0 : i32, i32
  }
  func.func @transform_10(%arg0: i32) -> (i32, i32) {
    %c0_i32 = arith.constant 0 : i32
    %c0_i32_0 = arith.constant 0 : i32
    %c0_i32_1 = arith.constant 0 : i32
    return %c0_i32, %c0_i32_0 : i32, i32
  }
  func.func @transform_11(%arg0: i32) -> (i32, i32) {
    %c0_i32 = arith.constant 0 : i32
    %c0_i32_0 = arith.constant 0 : i32
    %c0_i32_1 = arith.constant 0 : i32
    return %c0_i32, %c0_i32_0 : i32, i32
  }
  func.func @transform_12(%arg0: i32) -> (i32, i32) {
    %c0_i32 = arith.constant 0 : i32
    %c0_i32_0 = arith.constant 0 : i32
    %c0_i32_1 = arith.constant 0 : i32
    return %c0_i32, %c0_i32_0 : i32, i32
  }
  func.func @transform_13(%arg0: i32) -> (i32, i32) {
    %c0_i32 = arith.constant 0 : i32
    %c0_i32_0 = arith.constant 0 : i32
    %c0_i32_1 = arith.constant 0 : i32
    return %c0_i32, %c0_i32_0 : i32, i32
  }
  func.func @transform_14(%arg0: i32) -> (i32, i32) {
    %c0_i32 = arith.constant 0 : i32
    %c0_i32_0 = arith.constant 0 : i32
    return %arg0, %c0_i32 : i32, i32
  }
}

</mosaic_0001>

<bundles_post_ra>
// kernel: promneural_forward.1
= control target key start
LH: loop header
LB: loop body
LE: loop exit
PB: predicated region body
PF: predicated region fallthrough
CT: control target
= control target key end

     0   :  { %s9719_s0 = inlined_call_operand.vmem [shape: f32[384,68], index: 0, kind: input, shape index: {}]   ;;  %s9720_s1 = inlined_call_operand.vmem [shape: bf16[68,68], index: 1, kind: input, shape index: {}]   ;;  %s9721_s2 = inlined_call_operand.vmem [shape: f32[1,68], index: 2, kind: input, shape index: {}]   ;;  %s9722_s3 = inlined_call_operand.vmem [shape: bf16[68,224], index: 3, kind: input, shape index: {}]   ;;  %s9723_s4 = inlined_call_operand.vmem [shape: f32[1,224], index: 4, kind: input, shape index: {}]   ;;  %s9724_s5 = inlined_call_operand.vmem [shape: bf16[224,416], index: 5, kind: input, shape index: {}]   ;;  %s9725_s6 = inlined_call_operand.vmem [shape: f32[1,416], index: 6, kind: input, shape index: {}]   ;;  %s9726_s7 = inlined_call_operand.vmem [shape: bf16[416,128], index: 7, kind: input, shape index: {}]   ;;  %s9727_s8 = inlined_call_operand.vmem [shape: f32[1,128], index: 8, kind: input, shape index: {}]   ;;  %s9728_s9 = inlined_call_operand.vmem [shape: bf16[128,64], index: 9, kind: input, shape index: {}]   ;;  %s9729_s10 = inlined_call_operand.vmem [shape: f32[1,64], index: 10, kind: input, shape index: {}]   ;;  %s9730_s11 = inlined_call_operand.vmem [shape: f32[1,64], index: 11, kind: input, shape index: {}]   ;;  %s9731_s12 = inlined_call_operand.vmem [shape: f32[1,5], index: 12, kind: input, shape index: {}]   ;;  %s9732_s13 = inlined_call_operand.vmem [shape: f32[1,5], index: 13, kind: input, shape index: {}]   ;;  %s9733_s14 = inlined_call_operand.vmem [shape: f32[384,5], index: 14, kind: output, shape index: {}]  }
   0x1   :  { %9735 = sst [smem:[#allocation17_spill]] %s9719_s0 }
   0x2   :  { %s6644_s29 = smov 0   ;;  %s6646_s30 = smov 0  }
   0x3   :  { %s6648_s15 = smov 0  }
   0x4 LB: > { %9736 = sst [smem:[#allocation3_spill]] %s6531_s30  ;;  %s6657_s16 = sadd.s32 4294967295, %s6535_s15   ;;  %s6535_s15 = sphi %s6648_s15, %s9913_s15   ;;  %s6531_s30 = sphi %s6646_s30, %s9912_s30   ;;  %s6527_s29 = sphi %s6644_s29, %s9911_s29  }
   0x5   : > { %s6659_s17 = sadd.s32 1, %s6535_s15   ;;  %s330_s19 = sadd.s32 1, %s6531_s30 }
   0x6   : > { %s327_s18 = ssub.s32 %s6535_s15, %s6659_s17  ;;  %p340_p1 = scmp.ne.s32.totalorder %s6531_s30, %s6527_s29 }
   0x7   : > { %p328_p0 = scmp.eq.s32.totalorder %s327_s18, 0  ;;  %p341_p2 = scmp.eq.s32.totalorder %s6657_s16, 1 }
   0x8   : > { %p5330_p3 = scmp.ge.s32.totalorder %s6535_s15, 1  ;;  %p421_p5 = scmp.lt.s32.totalorder %s6535_s15, 3 }
   0x9   : > { %s6667_s20 = scalar_select %p328_p0, %s6531_s30, %s330_s19  }
   0xa   : > { %p6669_p4 = por %p341_p2, %p340_p1  ;;  %p422_p6 = pnand %p5330_p3, %p421_p5 }
   0xb   : > { %9737 = sst [smem:[#allocation4_spill]] %s6667_s20 }
   0xc   : > { %425 = sbr.rel (%p422_p6) target bundleno = 1806 (0x70e), region = 76 }
  0x11   : > { %v546_v0 = vld [vmem:[%s9720_s1 + $0x20] sm:$0x3]  ;;  %vm627_vm0 = vcmask 1041408   ;;  %s6677_s24 = sshll.u32 %s6657_s16, 5  ;;  %v5890_v4 = vld [vmem:[%s9720_s1 + $0x18] sm:$0xff]  ;;  %v5889_v5 = vld [vmem:[%s9720_s1 + $0x10] sm:$0xff] }
  0x12   : > { %v568_v1 = vunpack.c.l.b16 %v546_v0  ;;  %p475_p7 = scmp.lt.s32.totalorder %s6677_s24, 47  ;;  %v5888_v6 = vld [vmem:[%s9720_s1 + $0x8] sm:$0xff]  ;;  %s9739_s0 = sld [smem:[#allocation17_spill]]  ;;  %v5887_v7 = vld [vmem:[%s9720_s1] sm:$0xff]  ;;  %vm578_vm1 = vcmask 556032   ;;  %vm1502_vm2 = vcmask 785408  }
  0x13   : > { %v776_v26 = vld [vmem:[%s9722_s3 + $0x40] sm:$0x33]  ;;  %v5392_v35 = vld [vmem:[%s9722_s3 + $0x30] sm:$0xf]  ;;  %v5898_v36 = vld [vmem:[%s9722_s3 + $0x34] sm:$0xf0] }
  0x14   : > { %v573_v2 = vpack.c.b16 %v568_v1, %v568_v1  ;;  %s476_s27 = scalar_select %p475_p7, %s6677_s24, 47  ;;  %v808_v27 = vunpack.c.l.b16 %v776_v26  ;;  %v809_v28 = vunpack.c.h.b16 %v776_v26  ;;  %v5897_v37 = vld [vmem:[%s9722_s3 + $0x34] sm:$0xf]  ;;  %v5393_v38 = vor.u32 %v5898_v36, %v5392_v35  ;;  %v5394_v39 = vld [vmem:[%s9722_s3 + $0x38] sm:$0xf0] }
  0x15   : > { %v5397_v41 = vor.u32 %v5897_v37, %v5394_v39  ;;  %v5384_v42 = vld [vmem:[%s9722_s3 + $0x20] sm:$0xf]  ;;  %v5896_v43 = vld [vmem:[%s9722_s3 + $0x24] sm:$0xf0]  ;;  %v5895_v44 = vld [vmem:[%s9722_s3 + $0x24] sm:$0xf] }
  0x16   : > { %v629_v3 = vsel %vm627_vm0, %v573_v2, 0  ;;  %s5333_s18 = sshll.u32 %s476_s27, 3  ;;  %v818_v29 = vpack.c.b16 %v808_v27, %v808_v27  ;;  %v819_v30 = vpack.c.b16 %v809_v28, %v809_v28  ;;  %v5385_v45 = vor.u32 %v5896_v43, %v5384_v42  ;;  %v5386_v46 = vld [vmem:[%s9722_s3 + $0x28] sm:$0xf0]  ;;  %v5376_v48 = vld [vmem:[%s9722_s3 + $0x10] sm:$0xf] }
  0x17   : > { %634 = vmatpush.bf16.msra.mxu0 %v629_v3  ;;  %v5389_v47 = vor.u32 %v5895_v44, %v5386_v46  ;;  %v5894_v49 = vld [vmem:[%s9722_s3 + $0x14] sm:$0xf0]  ;;  %v5893_v50 = vld [vmem:[%s9722_s3 + $0x14] sm:$0xf]  ;;  %v5378_v52 = vld [vmem:[%s9722_s3 + $0x18] sm:$0xf0] }
  0x18   : > { %s6694_s30 = scalar_lea.vmem %s9739_s0, %s5333_s18  ;;  %v877_v31 = vsel %vm627_vm0, %v818_v29, 0  ;;  %v880_v32 = vsel %vm627_vm0, %v819_v30, 0  ;;  %v5377_v51 = vor.u32 %v5894_v49, %v5376_v48  ;;  %v5381_v53 = vor.u32 %v5893_v50, %v5378_v52  ;;  %v5368_v54 = vld [vmem:[%s9722_s3] sm:$0xf]  ;;  %v5892_v55 = vld [vmem:[%s9722_s3 + $0x4] sm:$0xf0] }
  0x19   : > { %v490_v8 = vld [vmem:[%s6694_s30] sm:$0xff]  ;;  %v491_v9 = vld [vmem:[%s6694_s30 + $0x8] sm:$0xff]  ;;  %v492_v11 = vld [vmem:[%s6694_s30 + $0x10] sm:$0xff]  ;;  %885 = vmatpush.bf16.msra.mxu1 %v877_v31  ;;  %974 = vmatpush.bf16.msra.mxu2 %v880_v32  ;;  %v5369_v57 = vor.u32 %v5892_v55, %v5368_v54  ;;  %vm2667_vm3 = vcmask 261120   ;;  %vm3345_vm4 = vcmask 523264   ;;  %vm4954_vm0 = vcmask 39936  }
  0x1a   : > { %v522_v10 = vpack.c.bf16 %v491_v9, %v490_v8  ;;  %v493_v12 = vld [vmem:[%s6694_s30 + $0x18] sm:$0xff]  ;;  %v494_v14 = vld [vmem:[%s6694_s30 + $0x20] sm:$0xff]  ;;  %v495_v15 = vld [vmem:[%s6694_s30 + $0x28] sm:$0xff] }
  0x1b   : > { %635 = vmatpush.bf16.msra.mxu0 %v5890_v4  ;;  %v523_v13 = vpack.c.bf16 %v493_v12, %v492_v11  ;;  %v524_v16 = vpack.c.bf16 %v495_v15, %v494_v14  ;;  %v496_v17 = vld [vmem:[%s6694_s30 + $0x30] sm:$0xff]  ;;  %v497_v18 = vld [vmem:[%s6694_s30 + $0x38] sm:$0xff]  ;;  %v498_v20 = vld [vmem:[%s6694_s30 + $0x40] sm:$0xff] }
  0x1c   : > { %v525_v19 = vpack.c.bf16 %v497_v18, %v496_v17  ;;  %v499_v21 = vld [vmem:[%s6694_s30 + $0x48] sm:$0xff]  ;;  %v500_v23 = vld [vmem:[%s6694_s30 + $0x50] sm:$0xff]  ;;  %v501_v24 = vld [vmem:[%s6694_s30 + $0x58] sm:$0xff] }
  0x1d   : > { %v526_v22 = vpack.c.bf16 %v499_v21, %v498_v20  ;;  %v527_v25 = vpack.c.bf16 %v501_v24, %v500_v23  ;;  %v502_v33 = vld [vmem:[%s6694_s30 + $0x60] sm:$0xff]  ;;  %v503_v34 = vld [vmem:[%s6694_s30 + $0x68] sm:$0xff]  ;;  %886 = vmatpush.bf16.msra.mxu1 %v5393_v38  ;;  %975 = vmatpush.bf16.msra.mxu2 %v5397_v41  ;;  %v504_v60 = vld [vmem:[%s6694_s30 + $0x70] sm:$0xff] }
  0x1e   : > { %v528_v40 = vpack.c.bf16 %v503_v34, %v502_v33  ;;  %v5891_v56 = vld [vmem:[%s9722_s3 + $0x4] sm:$0xf]  ;;  %v5370_v58 = vld [vmem:[%s9722_s3 + $0x8] sm:$0xf0]  ;;  %v505_v61 = vld [vmem:[%s6694_s30 + $0x78] sm:$0xff] }
  0x1f   : > { %636 = vmatpush.bf16.msra.mxu0 %v5889_v5  ;;  %v5373_v59 = vor.u32 %v5891_v56, %v5370_v58  ;;  %v529_v62 = vpack.c.bf16 %v505_v61, %v504_v60  ;;  %v5951_v63 = vld [vmem:[%s9724_s5 + $0x1a4] sm:$0xf]  ;;  %v5642_v0 = vld [vmem:[%s9724_s5 + $0x1b0] sm:$0xf0]  ;;  %v5640_v2 = vld [vmem:[%s9724_s5 + $0x1a0] sm:$0xf] }
  0x20   : > { %v5645_v1 = vor.u32 %v5951_v63, %v5642_v0  ;;  %v5953_v3 = vld [vmem:[%s9724_s5 + $0x1ac] sm:$0xf0]  ;;  %v5927_v4 = vld [vmem:[%s9724_s5 + $0xe4] sm:$0xf]  ;;  %v507_v9 = vld [vmem:[%s6694_s30 + $0x88] sm:$0xff] }
  0x21   : > { %887 = vmatpush.bf16.msra.mxu1 %v5385_v45  ;;  %976 = vmatpush.bf16.msra.mxu2 %v5389_v47  ;;  %v5641_v5 = vor.u32 %v5953_v3, %v5640_v2  ;;  %v506_v8 = vld [vmem:[%s6694_s30 + $0x80] sm:$0xff]  ;;  %v508_v18 = vld [vmem:[%s6694_s30 + $0x90] sm:$0xff]  ;;  %v511_v34 = vld [vmem:[%s6694_s30 + $0xa8] sm:$0xff] }
  0x22   : > { %v6799_v12 = vld [vmem:[%s9721_s2] ss:$0 sm:$0xff]  ;;  %v5923_v23 = vld [vmem:[%s9724_s5 + $0xc4] sm:$0xf]  ;;  %v5530_v24 = vld [vmem:[%s9724_s5 + $0xd0] sm:$0xf0] }
  0x23   : > { %637 = vmatpush.bf16.msra.mxu0 %v5888_v6  ;;  %v5546_v6 = vld [vmem:[%s9724_s5 + $0xf0] sm:$0xf0]  ;;  %v510_v29 = vld [vmem:[%s6694_s30 + $0xa0] sm:$0xff]  ;;  %v5949_v37 = vld [vmem:[%s9724_s5 + $0x18c] sm:$0xf0] }
  0x24   : > { %v5947_v32 = vld [vmem:[%s9724_s5 + $0x184] sm:$0xf]  ;;  %v5626_v33 = vld [vmem:[%s9724_s5 + $0x190] sm:$0xf0]  ;;  %v5624_v36 = vld [vmem:[%s9724_s5 + $0x180] sm:$0xf] }
  0x25   : > { %888 = vmatpush.bf16.msra.mxu1 %v5377_v51  ;;  %977 = vmatpush.bf16.msra.mxu2 %v5381_v53  ;;  %v5629_v35 = vor.u32 %v5947_v32, %v5626_v33  ;;  %v5625_v39 = vor.u32 %v5949_v37, %v5624_v36  ;;  %v512_v47 = vld [vmem:[%s6694_s30 + $0xb0] sm:$0xff]  ;;  %v513_v48 = vld [vmem:[%s6694_s30 + $0xb8] sm:$0xff]  ;;  %v5919_v52 = vld [vmem:[%s9724_s5 + $0xa4] sm:$0xf] }
  0x26   : > { %v533_v50 = vpack.c.bf16 %v513_v48, %v512_v47  ;;  %v5514_v53 = vld [vmem:[%s9724_s5 + $0xb0] sm:$0xf0]  ;;  %v514_v60 = vld [vmem:[%s6694_s30 + $0xc0] sm:$0xff]  ;;  %v515_v61 = vld [vmem:[%s6694_s30 + $0xc8] sm:$0xff] }
  0x27   : > { %638 = vmatpush.bf16.msra.mxu0 %v5887_v7  ;;  %v5549_v7 = vor.u32 %v5927_v4, %v5546_v6  ;;  %v5517_v54 = vor.u32 %v5919_v52, %v5514_v53  ;;  %v534_v63 = vpack.c.bf16 %v515_v61, %v514_v60  ;;  %v5610_v2 = vld [vmem:[%s9724_s5 + $0x170] sm:$0xf0]  ;;  %v5608_v4 = vld [vmem:[%s9724_s5 + $0x160] sm:$0xf]  ;;  %v5925_v33 = vld [vmem:[%s9724_s5 + $0xcc] sm:$0xf0] }
  0x28   : > { %v5528_v32 = vld [vmem:[%s9724_s5 + $0xc0] sm:$0xf]  ;;  %v5913_v47 = vld [vmem:[%s9724_s5 + $0x6c] sm:$0xf0]  ;;  %v521_v52 = vld [vmem:[%s6694_s30 + $0xf8] sm:$0xff] }
  0x29   : > { %889 = vmatpush.bf16.msra.mxu1 %v5369_v57  ;;  %978 = vmatpush.bf16.msra.mxu2 %v5373_v59  ;;  %v5512_v37 = vld [vmem:[%s9724_s5 + $0xa0] sm:$0xf] }
  0x2a   : > { %5350 = vmatmul.msk.bf16.vlgmr.msra.gmra.mxu0 %vm578_vm1, %v522_v10  ;;  %v530_v10 = vpack.c.bf16 %v507_v9, %v506_v8 }
  0x2b   : > { %1642 = vmatpush.bf16.msrb.mxu0 %v5641_v5  ;;  %v5945_v5 = vld [vmem:[%s9724_s5 + $0x16c] sm:$0xf0] }
  0x2c   : > { %v5609_v6 = vor.u32 %v5945_v5, %v5608_v4  ;;  %v5911_v4 = vld [vmem:[%s9724_s5 + $0x64] sm:$0xf]  ;;  %v5482_v5 = vld [vmem:[%s9724_s5 + $0x70] sm:$0xf0] }
  0x2d   : > { %1820 = vmatpush.bf16.msrb.mxu2 %v5645_v1  ;;  %1729 = vmatpush.bf16.msrb.mxu1 %v5549_v7  ;;  %v5943_v1 = vld [vmem:[%s9724_s5 + $0x164] sm:$0xf] }
  0x2e   : > { %v5613_v3 = vor.u32 %v5943_v1, %v5610_v2  ;;  %v5592_v1 = vld [vmem:[%s9724_s5 + $0x140] sm:$0xf]  ;;  %v5941_v2 = vld [vmem:[%s9724_s5 + $0x14c] sm:$0xf0] }
  0x2f   : > { %1643 = vmatpush.bf16.msrb.mxu0 %v5625_v39 }
  0x31   : > { %1821 = vmatpush.bf16.msrb.mxu2 %v5629_v35 }
  0x33   : > { %1644 = vmatpush.bf16.msrb.mxu0 %v5609_v6  ;;  %v5432_v6 = vld [vmem:[%s9724_s5] sm:$0xf] }
  0x35   : > { %1822 = vmatpush.bf16.msrb.mxu2 %v5613_v3  ;;  %v5593_v3 = vor.u32 %v5941_v2, %v5592_v1 }
  0x37   : > { %1645 = vmatpush.bf16.msrb.mxu0 %v5593_v3  ;;  %v5536_v3 = vld [vmem:[%s9724_s5 + $0xc8] sm:$0xf] }
  0x3a   : > { %5351 = vmatmul.msk.bf16.gmra.mxu0 %vm578_vm1, %v523_v13 }
  0x4a   : > { %5352 = vmatmul.msk.bf16.gmra.mxu0 %vm578_vm1, %v524_v16 }
  0x5a   : > { %5353 = vmatmul.msk.bf16.gmra.mxu0 %vm578_vm1, %v525_v19  ;;  %v509_v19 = vld [vmem:[%s6694_s30 + $0x98] sm:$0xff] }
  0x5b   : > { %v531_v21 = vpack.c.bf16 %v509_v19, %v508_v18  ;;  %v5915_v18 = vld [vmem:[%s9724_s5 + $0x84] sm:$0xf]  ;;  %v5498_v19 = vld [vmem:[%s9724_s5 + $0x90] sm:$0xf0] }
  0x6a   : > { %5354 = vmatmul.msk.bf16.gmra.mxu0 %vm578_vm1, %v526_v22 }
  0x7a   : > { %5355 = vmatmul.msk.bf16.gmra.mxu0 %vm578_vm1, %v527_v25  ;;  %v5533_v25 = vor.u32 %v5923_v23, %v5530_v24  ;;  %v5544_v24 = vld [vmem:[%s9724_s5 + $0xe0] sm:$0xf] }
  0x7c   : > { %1730 = vmatpush.bf16.msrb.mxu1 %v5533_v25  ;;  %v5929_v25 = vld [vmem:[%s9724_s5 + $0xec] sm:$0xf0] }
  0x80   : > { %1731 = vmatpush.bf16.msrb.mxu1 %v5517_v54  ;;  %v5464_v54 = vld [vmem:[%s9724_s5 + $0x40] sm:$0xf] }
  0x8a   : > { %5356 = vmatmul.msk.bf16.gmra.mxu0 %vm578_vm1, %v528_v40  ;;  %v532_v40 = vpack.c.bf16 %v511_v34, %v510_v29  ;;  %v518_v29 = vld [vmem:[%s6694_s30 + $0xe0] sm:$0xff]  ;;  %v5529_v34 = vor.u32 %v5925_v33, %v5528_v32 }
  0x8b   : > { %v777_v32 = vld [vmem:[%s9723_s4] sm:$0x3] }
  0x9a   : > { %5357 = vmatmul.msk.bf16.gmra.mxu0 %vm578_vm1, %v529_v62 }
  0xa7   : > { %v640_v11 = vpop.f32.mrf.mxu0 }
  0xa8   : > { %v641_v13 = vadd.f32 %v6799_v12, %v640_v11 }
  0xaa   : > { %5358 = vmatmul.msk.bf16.gmra.mxu0 %vm578_vm1, %v530_v10  ;;  %v720_v16 = vmax.f32 %v641_v13, 0.0  ;;  %v516_v13 = vld [vmem:[%s6694_s30 + $0xd0] sm:$0xff] }
  0xaf   : > { %v642_v14 = vpop.f32.mrf.mxu0 }
  0xb0   : > { %v643_v15 = vadd.f32 %v6799_v12, %v642_v14  ;;  %v517_v14 = vld [vmem:[%s6694_s30 + $0xd8] sm:$0xff] }
  0xb2   : > { %v721_v17 = vmax.f32 %v643_v15, 0.0 }
  0xb4   : > { %v752_v20 = vpack.c.bf16 %v721_v17, %v720_v16  ;;  %v535_v16 = vpack.c.bf16 %v517_v14, %v516_v13  ;;  %v5937_v13 = vld [vmem:[%s9724_s5 + $0x12c] sm:$0xf0] }
  0xb6   : > { %5398 = vmatmul.msk.bf16.vlgmr.msra.gmra.mxu1 %vm578_vm1, %v752_v20  ;;  %5414 = vmatmul.msk.bf16.vlgmr.msra.gmra.mxu2 %vm578_vm1, %v752_v20  ;;  %v5501_v20 = vor.u32 %v5915_v18, %v5498_v19  ;;  %v5560_v19 = vld [vmem:[%s9724_s5 + $0x100] sm:$0xf] }
  0xb7   : > { %v645_v22 = vpop.f32.mrf.mxu0 }
  0xb8   : > { %v646_v26 = vadd.f32 %v6799_v12, %v645_v22  ;;  %1732 = vmatpush.bf16.msrb.mxu1 %v5501_v20  ;;  %v5933_v20 = vld [vmem:[%s9724_s5 + $0x10c] sm:$0xf0] }
  0xba   : > { %5359 = vmatmul.msk.bf16.gmra.mxu0 %vm578_vm1, %v531_v21  ;;  %v722_v30 = vmax.f32 %v646_v26, 0.0  ;;  %v5545_v26 = vor.u32 %v5929_v25, %v5544_v24  ;;  %v5552_v24 = vld [vmem:[%s9724_s5 + $0xe8] sm:$0xf]  ;;  %v5930_v25 = vld [vmem:[%s9724_s5 + $0xf4] sm:$0xf0] }
  0xbc   : > { %1551 = vmatpush.bf16.msra.mxu3 %v5545_v26  ;;  %v5553_v26 = vor.u32 %v5930_v25, %v5552_v24 }
  0xbf   : > { %v647_v27 = vpop.f32.mrf.mxu0 }
  0xc0   : > { %v648_v28 = vadd.f32 %v6799_v12, %v647_v27  ;;  %1552 = vmatpush.bf16.msra.mxu3 %v5529_v34 }
  0xc2   : > { %v723_v31 = vmax.f32 %v648_v28, 0.0 }
  0xc4   : > { %v753_v38 = vpack.c.bf16 %v723_v31, %v722_v30  ;;  %v519_v30 = vld [vmem:[%s6694_s30 + $0xe8] sm:$0xff] }
  0xc5   : > { %v536_v35 = vpack.c.bf16 %v519_v30, %v518_v29 }
  0xc6   : > { %5399 = vmatmul.msk.bf16.gmra.mxu1 %vm578_vm1, %v753_v38  ;;  %5415 = vmatmul.msk.bf16.gmra.mxu2 %vm578_vm1, %v753_v38  ;;  %v5921_v38 = vld [vmem:[%s9724_s5 + $0xac] sm:$0xf0] }
  0xc7   : > { %v650_v41 = vpop.f32.mrf.mxu0  ;;  %v5513_v39 = vor.u32 %v5921_v38, %v5512_v37 }
  0xc8   : > { %v651_v42 = vadd.f32 %v6799_v12, %v650_v41  ;;  %v5917_v41 = vld [vmem:[%s9724_s5 + $0x8c] sm:$0xf0] }
  0xc9   : > { %1553 = vmatpush.bf16.msra.mxu3 %v5513_v39 }
  0xca   : > { %5360 = vmatmul.msk.bf16.gmra.mxu0 %vm578_vm1, %v532_v40  ;;  %v724_v45 = vmax.f32 %v651_v42, 0.0  ;;  %v5496_v40 = vld [vmem:[%s9724_s5 + $0x80] sm:$0xf] }
  0xcb   : > { %v5497_v42 = vor.u32 %v5917_v41, %v5496_v40  ;;  %v6991_v40 = vperm.slane %v777_v32, 1 }
  0xcd   : > { %1554 = vmatpush.bf16.msra.mxu3 %v5497_v42  ;;  %v5907_v42 = vld [vmem:[%s9724_s5 + $0x44] sm:$0xf] }
  0xcf   : > { %v652_v43 = vpop.f32.mrf.mxu0 }
  0xd0   : > { %v653_v44 = vadd.f32 %v6799_v12, %v652_v43 }
  0xd2   : > { %v725_v46 = vmax.f32 %v653_v44, 0.0 }
  0xd4   : > { %v754_v49 = vpack.c.bf16 %v725_v46, %v724_v45  ;;  %v5480_v46 = vld [vmem:[%s9724_s5 + $0x60] sm:$0xf] }
  0xd5   : > { %v5481_v48 = vor.u32 %v5913_v47, %v5480_v46 }
  0xd6   : > { %5400 = vmatmul.msk.bf16.gmra.mxu1 %vm578_vm1, %v754_v49  ;;  %5416 = vmatmul.msk.bf16.gmra.mxu2 %vm578_vm1, %v754_v49 }
  0xd7   : > { %v655_v51 = vpop.f32.mrf.mxu0  ;;  %1555 = vmatpush.bf16.msra.mxu3 %v5481_v48 }
  0xd8   : > { %v656_v55 = vadd.f32 %v6799_v12, %v655_v51  ;;  %v520_v51 = vld [vmem:[%s6694_s30 + $0xf0] sm:$0xff]  ;;  %s467_s30 = sand.u32 1, %s6527_s29  }
  0xd9   : > { %s5331_s29 = sshll.u32 %s467_s30, 8  ;;  %s4995_s30 = ssub.s32 (%p6669_p4), 48, %s6677_s24 }
  0xda   : > { %5361 = vmatmul.msk.bf16.gmra.mxu0 %vm578_vm1, %v533_v50  ;;  %v726_v58 = vmax.f32 %v656_v55, 0.0  ;;  %v5909_v55 = vld [vmem:[%s9724_s5 + $0x4c] sm:$0xf0]  ;;  %s8334_s28 = scalar_lea.vmem [#allocation2], %s5331_s29   ;;  %s5989_s29 = sshll.u32 (%p6669_p4), %s6657_s16, 8 }
  0xdb   : > { %p4996_p8 = scmp.lt.s32.totalorder (%p6669_p4), %s4995_s30, 32  ;;  %s9584_s19 = scalar_lea.vmem (%p6669_p4), %s9733_s14, %s5989_s29  }
  0xdf   : > { %v657_v56 = vpop.f32.mrf.mxu0 }
  0xe0   : > { %v658_v57 = vadd.f32 %v6799_v12, %v657_v56  ;;  %v5465_v56 = vor.u32 %v5909_v55, %v5464_v54 }
  0xe2   : > { %v727_v59 = vmax.f32 %v658_v57, 0.0  ;;  %v537_v57 = vpack.c.bf16 %v521_v52, %v520_v51  ;;  %1556 = vmatpush.bf16.msra.mxu3 %v5465_v56 }
  0xe4   : > { %v755_v62 = vpack.c.bf16 %v727_v59, %v726_v58  ;;  %v5939_v58 = vld [vmem:[%s9724_s5 + $0x144] sm:$0xf]  ;;  %v5594_v59 = vld [vmem:[%s9724_s5 + $0x150] sm:$0xf0] }
  0xe5   : > { %v5597_v61 = vor.u32 %v5939_v58, %v5594_v59 }
  0xe6   : > { %5401 = vmatmul.msk.bf16.gmra.mxu1 %vm578_vm1, %v755_v62  ;;  %5417 = vmatmul.msk.bf16.gmra.mxu2 %vm578_vm1, %v755_v62  ;;  %v5448_v62 = vld [vmem:[%s9724_s5 + $0x20] sm:$0xf] }
  0xe7   : > { %v660_v0 = vpop.f32.mrf.mxu0  ;;  %1823 = vmatpush.bf16.msrb.mxu2 %v5597_v61  ;;  %v5935_v61 = vld [vmem:[%s9724_s5 + $0x124] sm:$0xf] }
  0xe8   : > { %v661_v7 = vadd.f32 %v6799_v12, %v660_v0 }
  0xea   : > { %5362 = vmatmul.msk.bf16.gmra.mxu0 %vm578_vm1, %v534_v63  ;;  %v728_v10 = vmax.f32 %v661_v7, 0.0  ;;  %v5905_v63 = vld [vmem:[%s9724_s5 + $0x2c] sm:$0xf0]  ;;  %v5485_v7 = vor.u32 %v5911_v4, %v5482_v5  ;;  %v5926_v4 = vld [vmem:[%s9724_s5 + $0xd4] sm:$0xf0] }
  0xeb   : > { %v5449_v0 = vor.u32 %v5905_v63, %v5448_v62  ;;  %v5578_v62 = vld [vmem:[%s9724_s5 + $0x130] sm:$0xf0] }
  0xec   : > { %1733 = vmatpush.bf16.msrb.mxu1 %v5485_v7 }
  0xed   : > { %1557 = vmatpush.bf16.msra.mxu3 %v5449_v0  ;;  %v5581_v0 = vor.u32 %v5935_v61, %v5578_v62 }
  0xef   : > { %v662_v8 = vpop.f32.mrf.mxu0  ;;  %1824 = vmatpush.bf16.msrb.mxu2 %v5581_v0 }
  0xf0   : > { %v663_v9 = vadd.f32 %v6799_v12, %v662_v8  ;;  %v5901_v8 = vld [vmem:[%s9724_s5 + $0xc] sm:$0xf0] }
  0xf2   : > { %v729_v11 = vmax.f32 %v663_v9, 0.0 }
  0xf4   : > { %v756_v15 = vpack.c.bf16 %v729_v11, %v728_v10  ;;  %v5433_v10 = vor.u32 %v5901_v8, %v5432_v6  ;;  %v5576_v11 = vld [vmem:[%s9724_s5 + $0x120] sm:$0xf]  ;;  %v5537_v6 = vor.u32 %v5926_v4, %v5536_v3  ;;  %v5931_v4 = vld [vmem:[%s9724_s5 + $0x104] sm:$0xf] }
  0xf6   : > { %5402 = vmatmul.msk.bf16.gmra.mxu1 %vm578_vm1, %v756_v15  ;;  %5418 = vmatmul.msk.bf16.gmra.mxu2 %vm578_vm1, %v756_v15  ;;  %v5577_v15 = vor.u32 %v5937_v13, %v5576_v11 }
  0xf7   : > { %v665_v17 = vpop.f32.mrf.mxu0  ;;  %1558 = vmatpush.bf16.msra.mxu3 %v5433_v10 }
  0xf8   : > { %v666_v21 = vadd.f32 %v6799_v12, %v665_v17  ;;  %1646 = vmatpush.bf16.msrb.mxu0 %v5577_v15 }
  0xfa   : > { %5363 = vmatmul.msk.bf16.gmra.mxu0 %vm578_vm1, %v535_v16  ;;  %v730_v27 = vmax.f32 %v666_v21, 0.0  ;;  %v5561_v21 = vor.u32 %v5933_v20, %v5560_v19 }
  0xfb   : > { %1907 = vmatpush.bf16.msrb.mxu3 %v5553_v26 }
  0xfc   : > { %1647 = vmatpush.bf16.msrb.mxu0 %v5561_v21 }
  0xff   : > { %v667_v22 = vpop.f32.mrf.mxu0  ;;  %1908 = vmatpush.bf16.msrb.mxu3 %v5537_v6 }
 0x100   : > { %v668_v23 = vadd.f32 %v6799_v12, %v667_v22 }
 0x102   : > { %v731_v28 = vmax.f32 %v668_v23, 0.0 }
 0x104   : > { %v757_v31 = vpack.c.bf16 %v731_v28, %v730_v27 }
 0x106   : > { %5403 = vmatmul.msk.bf16.gmra.mxu1 %vm578_vm1, %v757_v31  ;;  %5419 = vmatmul.msk.bf16.gmra.mxu2 %vm578_vm1, %v757_v31 }
 0x107   : > { %v670_v36 = vpop.f32.mrf.mxu0 }
 0x108   : > { %v671_v43 = vadd.f32 %v6799_v12, %v670_v36 }
 0x10a   : > { %5364 = vmatmul.msk.bf16.gmra.mxu0 %vm578_vm1, %v536_v35  ;;  %v732_v49 = vmax.f32 %v671_v43, 0.0  ;;  %v6986_v35 = vperm.slane %v777_v32, 0  ;;  %v5466_v43 = vld [vmem:[%s9724_s5 + $0x50] sm:$0xf0] }
 0x10f   : > { %v672_v44 = vpop.f32.mrf.mxu0 }
 0x110   : > { %v673_v45 = vadd.f32 %v6799_v12, %v672_v44  ;;  %v5469_v44 = vor.u32 %v5907_v42, %v5466_v43 }
 0x112   : > { %v733_v50 = vmax.f32 %v673_v45, 0.0  ;;  %1734 = vmatpush.bf16.msrb.mxu1 %v5469_v44 }
 0x114   : > { %v758_v53 = vpack.c.bf16 %v733_v50, %v732_v49 }
 0x116   : > { %5404 = vmatmul.msk.bf16.gmra.mxu1 %vm578_vm1, %v758_v53  ;;  %5420 = vmatmul.msk.bf16.gmra.mxu2 %vm578_vm1, %v758_v53 }
 0x117   : > { %v675_v60 = vpop.f32.mrf.mxu0 }
 0x118   : > { %v676_v9 = vadd.f32 %v6799_v12, %v675_v60 }
 0x11a   : > { %5365 = vmatmul.msk.bf16.gmra.mxu0 %vm578_vm1, %v537_v57  ;;  %v734_v17 = vmax.f32 %v676_v9, 0.0 }
 0x11f   : > { %v677_v14 = vpop.f32.mrf.mxu0 }
 0x120   : > { %v678_v16 = vadd.f32 %v6799_v12, %v677_v14 }
 0x122   : > { %v735_v18 = vmax.f32 %v678_v16, 0.0 }
 0x124   : > { %v759_v22 = vpack.c.bf16 %v735_v18, %v734_v17 }
 0x126   : > { %5405 = vmatmul.msk.bf16.gmra.mxu1 %vm578_vm1, %v759_v22  ;;  %5421 = vmatmul.msk.bf16.gmra.mxu2 %vm578_vm1, %v759_v22 }
 0x127   : > { %v680_v23 = vpop.f32.mrf.mxu0 }
 0x128   : > { %v681_v27 = vadd.f32 %v6799_v12, %v680_v23 }
 0x12a   : > { %v736_v30 = vmax.f32 %v681_v27, 0.0 }
 0x12f   : > { %v682_v28 = vpop.f32.mrf.mxu0 }
 0x130   : > { %v683_v29 = vadd.f32 %v6799_v12, %v682_v28 }
 0x132   : > { %v737_v31 = vmax.f32 %v683_v29, 0.0 }
 0x133   : > { %v891_v33 = vpop.f32.mrf.mxu1 }
 0x134   : > { %v760_v34 = vpack.c.bf16 %v737_v31, %v736_v30  ;;  %v892_v38 = vadd.f32 %v891_v33, %v6986_v35  ;;  %v5903_v30 = vld [vmem:[%s9724_s5 + $0x24] sm:$0xf]  ;;  %v5450_v31 = vld [vmem:[%s9724_s5 + $0x30] sm:$0xf0] }
 0x135   : > { %v5453_v32 = vor.u32 %v5903_v30, %v5450_v31 }
 0x136   : > { %5406 = vmatmul.msk.bf16.gmra.mxu1 %vm578_vm1, %v760_v34  ;;  %5422 = vmatmul.msk.bf16.gmra.mxu2 %vm578_vm1, %v760_v34  ;;  %v1060_v45 = vmax.f32 %v892_v38, 0.0 }
 0x137   : > { %v685_v36 = vpop.f32.mrf.mxu0  ;;  %1735 = vmatpush.bf16.msrb.mxu1 %v5453_v32 }
 0x138   : > { %v686_v46 = vadd.f32 %v6799_v12, %v685_v36 }
 0x139   : > { %v980_v37 = vpop.f32.mrf.mxu2 }
 0x13a   : > { %v981_v49 = vadd.f32 %v980_v37, %v6991_v40  ;;  %v738_v53 = vmax.f32 %v686_v46, 0.0 }
 0x13b   : > { %v893_v39 = vpop.f32.mrf.mxu1 }
 0x13c   : > { %v894_v41 = vadd.f32 %v893_v39, %v6986_v35  ;;  %v1061_v57 = vmax.f32 %v981_v49, 0.0 }
 0x13e   : > { %v1062_v47 = vmax.f32 %v894_v41, 0.0 }
 0x13f   : > { %v687_v48 = vpop.f32.mrf.mxu0 }
 0x140   : > { %v7002_v50 = vpack.c.bf16 %v1062_v47, %v1060_v45  ;;  %v688_v51 = vadd.f32 %v6799_v12, %v687_v48 }
 0x141   : > { %v982_v52 = vpop.f32.mrf.mxu2 }
 0x142   : > { %v739_v54 = vmax.f32 %v688_v51, 0.0  ;;  %v983_v55 = vadd.f32 %v982_v52, %v6991_v40  ;;  %1559 = vmatmul.bf16.vlgmr.msra.gmra.mxu3 %v7002_v50 }
 0x143   : > { %v896_v56 = vpop.f32.mrf.mxu1 }
 0x144   : > { %v1063_v58 = vmax.f32 %v983_v55, 0.0  ;;  %v761_v59 = vpack.c.bf16 %v739_v54, %v738_v53  ;;  %v897_v2 = vadd.f32 %v896_v56, %v6986_v35  ;;  %v5520_v55 = vld [vmem:[%s9724_s5 + $0xa8] sm:$0xf]  ;;  %v5922_v56 = vld [vmem:[%s9724_s5 + $0xb4] sm:$0xf0] }
 0x146   : > { %v7007_v60 = vpack.c.bf16 %v1063_v58, %v1061_v57  ;;  %5407 = vmatmul.msk.bf16.gmra.mxu1 %vm578_vm1, %v761_v59  ;;  %5423 = vmatmul.msk.bf16.gmra.mxu2 %vm578_vm1, %v761_v59  ;;  %v1064_v8 = vmax.f32 %v897_v2, 0.0  ;;  %v5521_v58 = vor.u32 %v5922_v56, %v5520_v55 }
 0x147   : > { %v690_v63 = vpop.f32.mrf.mxu0 }
 0x148   : > { %5654 = vmatmul.msk.bf16.vlgmr.msrb.gmra.mxu0 %vm1502_vm2, %v7007_v60  ;;  %v691_v9 = vadd.f32 %v6799_v12, %v690_v63  ;;  %1909 = vmatpush.bf16.msrb.mxu3 %v5521_v58 }
 0x149   : > { %v985_v1 = vpop.f32.mrf.mxu2 }
 0x14a   : > { %v986_v13 = vadd.f32 %v985_v1, %v6991_v40  ;;  %v740_v17 = vmax.f32 %v691_v9, 0.0 }
 0x14b   : > { %v898_v5 = vpop.f32.mrf.mxu1 }
 0x14c   : > { %v899_v7 = vadd.f32 %v898_v5, %v6986_v35  ;;  %v1065_v21 = vmax.f32 %v986_v13, 0.0  ;;  %v5562_v5 = vld [vmem:[%s9724_s5 + $0x110] sm:$0xf0] }
 0x14e   : > { %v1066_v10 = vmax.f32 %v899_v7, 0.0  ;;  %v5565_v7 = vor.u32 %v5931_v4, %v5562_v5 }
 0x14f   : > { %v692_v11 = vpop.f32.mrf.mxu0 }
 0x150   : > { %v7029_v14 = vpack.c.bf16 %v1066_v10, %v1064_v8  ;;  %v693_v15 = vadd.f32 %v6799_v12, %v692_v11  ;;  %1825 = vmatpush.bf16.msrb.mxu2 %v5565_v7 }
 0x151   : > { %v987_v16 = vpop.f32.mrf.mxu2 }
 0x152   : > { %v741_v18 = vmax.f32 %v693_v15, 0.0  ;;  %v988_v19 = vadd.f32 %v987_v16, %v6991_v40  ;;  %1564 = vmatmul.bf16.gmra.mxu3 %v7029_v14 }
 0x153   : > { %v901_v20 = vpop.f32.mrf.mxu1 }
 0x154   : > { %v1067_v22 = vmax.f32 %v988_v19, 0.0  ;;  %v762_v23 = vpack.c.bf16 %v741_v18, %v740_v17  ;;  %v902_v27 = vadd.f32 %v901_v20, %v6986_v35 }
 0x156   : > { %v7034_v24 = vpack.c.bf16 %v1067_v22, %v1065_v21  ;;  %5408 = vmatmul.msk.bf16.gmra.mxu1 %vm578_vm1, %v762_v23  ;;  %5424 = vmatmul.msk.bf16.gmra.mxu2 %vm578_vm1, %v762_v23  ;;  %v1068_v33 = vmax.f32 %v902_v27, 0.0  ;;  %v5899_v23 = vld [vmem:[%s9724_s5 + $0x4] sm:$0xf] }
 0x157   : > { %v695_v25 = vpop.f32.mrf.mxu0 }
 0x158   : > { %5655 = vmatmul.msk.bf16.gmra.mxu0 %vm1502_vm2, %v7034_v24  ;;  %v696_v34 = vadd.f32 %v6799_v12, %v695_v25  ;;  %v5434_v25 = vld [vmem:[%s9724_s5 + $0x10] sm:$0xf0] }
 0x159   : > { %v990_v26 = vpop.f32.mrf.mxu2 }
 0x15a   : > { %v991_v38 = vadd.f32 %v990_v26, %v6991_v40  ;;  %v742_v43 = vmax.f32 %v696_v34, 0.0  ;;  %v5437_v26 = vor.u32 %v5899_v23, %v5434_v25  ;;  %v5928_v25 = vld [vmem:[%s9724_s5 + $0xec] sm:$0xf] }
 0x15b   : > { %v903_v28 = vpop.f32.mrf.mxu1 }
 0x15c   : > { %v904_v29 = vadd.f32 %v903_v28, %v6986_v35  ;;  %v1069_v47 = vmax.f32 %v991_v38, 0.0  ;;  %1736 = vmatpush.bf16.msrb.mxu1 %v5437_v26  ;;  %v5554_v26 = vld [vmem:[%s9724_s5 + $0xf8] sm:$0xf0] }
 0x15e   : > { %v1070_v36 = vmax.f32 %v904_v29, 0.0 }
 0x15f   : > { %v697_v37 = vpop.f32.mrf.mxu0 }
 0x160   : > { %v7050_v39 = vpack.c.bf16 %v1070_v36, %v1068_v33  ;;  %v698_v41 = vadd.f32 %v6799_v12, %v697_v37 }
 0x161   : > { %v992_v42 = vpop.f32.mrf.mxu2 }
 0x162   : > { %v743_v44 = vmax.f32 %v698_v41, 0.0  ;;  %v993_v45 = vadd.f32 %v992_v42, %v6991_v40  ;;  %1569 = vmatmul.bf16.gmra.mxu3 %v7050_v39 }
 0x163   : > { %v906_v46 = vpop.f32.mrf.mxu1 }
 0x164   : > { %v1071_v48 = vmax.f32 %v993_v45, 0.0  ;;  %v763_v49 = vpack.c.bf16 %v743_v44, %v742_v43  ;;  %v907_v54 = vadd.f32 %v906_v46, %v6986_v35 }
 0x166   : > { %v7055_v51 = vpack.c.bf16 %v1071_v48, %v1069_v47  ;;  %5409 = vmatmul.msk.bf16.gmra.mxu1 %vm578_vm1, %v763_v49  ;;  %5425 = vmatmul.msk.bf16.gmra.mxu2 %vm578_vm1, %v763_v49  ;;  %v1072_v61 = vmax.f32 %v907_v54, 0.0  ;;  %v5504_v47 = vld [vmem:[%s9724_s5 + $0x88] sm:$0xf]  ;;  %v5918_v48 = vld [vmem:[%s9724_s5 + $0x94] sm:$0xf0] }
 0x167   : > { %v700_v52 = vpop.f32.mrf.mxu0 }
 0x168   : > { %5656 = vmatmul.msk.bf16.gmra.mxu0 %vm1502_vm2, %v7055_v51  ;;  %v701_v62 = vadd.f32 %v6799_v12, %v700_v52  ;;  %v5505_v52 = vor.u32 %v5918_v48, %v5504_v47 }
 0x169   : > { %v995_v53 = vpop.f32.mrf.mxu2 }
 0x16a   : > { %v996_v1 = vadd.f32 %v995_v53, %v6991_v40  ;;  %v744_v8 = vmax.f32 %v701_v62, 0.0  ;;  %1910 = vmatpush.bf16.msrb.mxu3 %v5505_v52  ;;  %v5488_v52 = vld [vmem:[%s9724_s5 + $0x68] sm:$0xf] }
 0x16b   : > { %v908_v57 = vpop.f32.mrf.mxu1 }
 0x16c   : > { %v909_v59 = vadd.f32 %v908_v57, %v6986_v35  ;;  %v1073_v13 = vmax.f32 %v996_v1, 0.0 }
 0x16e   : > { %v1074_v63 = vmax.f32 %v909_v59, 0.0 }
 0x16f   : > { %v702_v0 = vpop.f32.mrf.mxu0 }
 0x170   : > { %v7071_v2 = vpack.c.bf16 %v1074_v63, %v1072_v61  ;;  %v703_v3 = vadd.f32 %v6799_v12, %v702_v0 }
 0x171   : > { %v997_v6 = vpop.f32.mrf.mxu2 }
 0x172   : > { %v745_v9 = vmax.f32 %v703_v3, 0.0  ;;  %v998_v10 = vadd.f32 %v997_v6, %v6991_v40  ;;  %1574 = vmatmul.bf16.gmra.mxu3 %v7071_v2 }
 0x173   : > { %v911_v11 = vpop.f32.mrf.mxu1 }
 0x174   : > { %v764_v15 = vpack.c.bf16 %v745_v9, %v744_v8  ;;  %v1075_v16 = vmax.f32 %v998_v10, 0.0  ;;  %v912_v20 = vadd.f32 %v911_v11, %v6986_v35  ;;  %v5952_v10 = vld [vmem:[%s9724_s5 + $0x1ac] sm:$0xf]  ;;  %v5650_v11 = vld [vmem:[%s9724_s5 + $0x1b8] sm:$0xf0] }
 0x176   : > { %v7082_v17 = vpack.c.bf16 %v1075_v16, %v1073_v13  ;;  %5410 = vmatmul.msk.bf16.gmra.mxu1 %vm578_vm1, %v764_v15  ;;  %5426 = vmatmul.msk.bf16.gmra.mxu2 %vm578_vm1, %v764_v15  ;;  %v1076_v27 = vmax.f32 %v912_v20, 0.0  ;;  %v5653_v15 = vor.u32 %v5952_v10, %v5650_v11  ;;  %v5648_v16 = vld [vmem:[%s9724_s5 + $0x1a8] sm:$0xf]  ;;  %v5924_v11 = vld [vmem:[%s9724_s5 + $0xcc] sm:$0xf] }
 0x177   : > { %v705_v18 = vpop.f32.mrf.mxu0 }
 0x178   : > { %5657 = vmatmul.msk.bf16.gmra.mxu0 %vm1502_vm2, %v7082_v17  ;;  %v706_v28 = vadd.f32 %v6799_v12, %v705_v18  ;;  %v5954_v18 = vld [vmem:[%s9724_s5 + $0x1b4] sm:$0xf0]  ;;  %2176 = vmatpush.bf16.msra.mxu2 %v5653_v15 }
 0x179   : > { %v1000_v19 = vpop.f32.mrf.mxu2  ;;  %v5649_v20 = vor.u32 %v5954_v18, %v5648_v16 }
 0x17a   : > { %v1001_v31 = vadd.f32 %v1000_v19, %v6991_v40  ;;  %v746_v36 = vmax.f32 %v706_v28, 0.0 }
 0x17b   : > { %v913_v21 = vpop.f32.mrf.mxu1  ;;  %1998 = vmatpush.bf16.msra.mxu0 %v5649_v20 }
 0x17c   : > { %v914_v22 = vadd.f32 %v913_v21, %v6986_v35  ;;  %v1077_v42 = vmax.f32 %v1001_v31, 0.0 }
 0x17e   : > { %v1078_v29 = vmax.f32 %v914_v22, 0.0 }
 0x17f   : > { %v707_v30 = vpop.f32.mrf.mxu0 }
 0x180   : > { %v7098_v32 = vpack.c.bf16 %v1078_v29, %v1076_v27  ;;  %v708_v33 = vadd.f32 %v6799_v12, %v707_v30  ;;  %v5557_v27 = vor.u32 %v5928_v25, %v5554_v26 }
 0x181   : > { %v1002_v34 = vpop.f32.mrf.mxu2 }
 0x182   : > { %v747_v37 = vmax.f32 %v708_v33, 0.0  ;;  %v1003_v38 = vadd.f32 %v1002_v34, %v6991_v40  ;;  %1579 = vmatmul.bf16.gmra.mxu3 %v7098_v32  ;;  %2085 = vmatpush.bf16.msra.mxu1 %v5557_v27 }
 0x183   : > { %v916_v41 = vpop.f32.mrf.mxu1 }
 0x184   : > { %v765_v43 = vpack.c.bf16 %v747_v37, %v746_v36  ;;  %v1079_v44 = vmax.f32 %v1003_v38, 0.0  ;;  %v917_v53 = vadd.f32 %v916_v41, %v6986_v35 }
 0x186   : > { %v7103_v45 = vpack.c.bf16 %v1079_v44, %v1077_v42  ;;  %5411 = vmatmul.msk.bf16.gmra.mxu1 %vm578_vm1, %v765_v43  ;;  %5427 = vmatmul.msk.bf16.gmra.mxu2 %vm578_vm1, %v765_v43  ;;  %v1080_v56 = vmax.f32 %v917_v53, 0.0  ;;  %v5914_v53 = vld [vmem:[%s9724_s5 + $0x74] sm:$0xf0] }
 0x187   : > { %v710_v46 = vpop.f32.mrf.mxu0 }
 0x188   : > { %5658 = vmatmul.msk.bf16.gmra.mxu0 %vm1502_vm2, %v7103_v45  ;;  %v711_v57 = vadd.f32 %v6799_v12, %v710_v46 }
 0x189   : > { %v1005_v49 = vpop.f32.mrf.mxu2 }
 0x18a   : > { %v1006_v61 = vadd.f32 %v1005_v49, %v6991_v40  ;;  %v748_v1 = vmax.f32 %v711_v57, 0.0 }
 0x18b   : > { %v918_v54 = vpop.f32.mrf.mxu1 }
 0x18c   : > { %v919_v55 = vadd.f32 %v918_v54, %v6986_v35  ;;  %v1081_v6 = vmax.f32 %v1006_v61, 0.0 }
 0x18e   : > { %v1082_v58 = vmax.f32 %v919_v55, 0.0  ;;  %v5489_v55 = vor.u32 %v5914_v53, %v5488_v52 }
 0x18f   : > { %v712_v59 = vpop.f32.mrf.mxu0 }
 0x190   : > { %v7119_v62 = vpack.c.bf16 %v1082_v58, %v1080_v56  ;;  %v713_v63 = vadd.f32 %v6799_v12, %v712_v59  ;;  %1911 = vmatpush.bf16.msrb.mxu3 %v5489_v55 }
 0x191   : > { %v1007_v0 = vpop.f32.mrf.mxu2 }
 0x192   : > { %v749_v3 = vmax.f32 %v713_v63, 0.0  ;;  %v1008_v4 = vadd.f32 %v1007_v0, %v6991_v40  ;;  %1584 = vmatmul.bf16.gmra.mxu3 %v7119_v62 }
 0x193   : > { %v921_v5 = vpop.f32.mrf.mxu1 }
 0x194   : > { %v766_v7 = vpack.c.bf16 %v749_v3, %v748_v1  ;;  %v1083_v8 = vmax.f32 %v1008_v4, 0.0  ;;  %v922_v21 = vadd.f32 %v921_v5, %v6986_v35 }
 0x196   : > { %v7124_v9 = vpack.c.bf16 %v1083_v8, %v1081_v6  ;;  %5412 = vmatmul.msk.bf16.gmra.mxu1 %vm578_vm1, %v766_v7  ;;  %5428 = vmatmul.msk.bf16.gmra.mxu2 %vm578_vm1, %v766_v7  ;;  %v1084_v28 = vmax.f32 %v922_v21, 0.0 }
 0x197   : > { %v715_v13 = vpop.f32.mrf.mxu0 }
 0x198   : > { %5659 = vmatmul.msk.bf16.gmra.mxu0 %vm1502_vm2, %v7124_v9  ;;  %v716_v29 = vadd.f32 %v6799_v12, %v715_v13  ;;  %v5538_v13 = vld [vmem:[%s9724_s5 + $0xd8] sm:$0xf0] }
 0x199   : > { %v1010_v19 = vpop.f32.mrf.mxu2  ;;  %v5541_v15 = vor.u32 %v5924_v11, %v5538_v13 }
 0x19a   : > { %v1011_v33 = vadd.f32 %v1010_v19, %v6991_v40  ;;  %v750_v38 = vmax.f32 %v716_v29, 0.0  ;;  %v7194_v19 = vld [vmem:[%s9725_s6] sm:$0xf] }
 0x19b   : > { %v923_v22 = vpop.f32.mrf.mxu1  ;;  %2086 = vmatpush.bf16.msra.mxu1 %v5541_v15  ;;  %v7202_v25 = vperm.slane %v7194_v19, 0 }
 0x19c   : > { %v924_v23 = vadd.f32 %v923_v22, %v6986_v35  ;;  %v1085_v44 = vmax.f32 %v1011_v33, 0.0 }
 0x19e   : > { %v1086_v30 = vmax.f32 %v924_v23, 0.0 }
 0x19f   : > { %v717_v31 = vpop.f32.mrf.mxu0 }
 0x1a0   : > { %v7152_v34 = vpack.c.bf16 %v1086_v30, %v1084_v28  ;;  %v718_v36 = vadd.f32 %v6799_v12, %v717_v31 }
 0x1a1   : > { %v1012_v37 = vpop.f32.mrf.mxu2 }
 0x1a2   : > { %v751_v41 = vmax.f32 %v718_v36, 0.0  ;;  %v1013_v42 = vadd.f32 %v1012_v37, %v6991_v40  ;;  %1589 = vmatmul.bf16.gmra.mxu3 %v7152_v34  ;;  %v5948_v36 = vld [vmem:[%s9724_s5 + $0x18c] sm:$0xf]  ;;  %v5634_v37 = vld [vmem:[%s9724_s5 + $0x198] sm:$0xf0] }
 0x1a3   : > { %v926_v43 = vpop.f32.mrf.mxu1 }
 0x1a4   : > { %v767_v46 = vpack.c.bf16 %v751_v41, %v750_v38  ;;  %v1087_v47 = vmax.f32 %v1013_v42, 0.0  ;;  %v927_v49 = vadd.f32 %v926_v43, %v6986_v35  ;;  %v5637_v38 = vor.u32 %v5948_v36, %v5634_v37  ;;  %v5632_v41 = vld [vmem:[%s9724_s5 + $0x188] sm:$0xf]  ;;  %v5950_v42 = vld [vmem:[%s9724_s5 + $0x194] sm:$0xf0] }
 0x1a6   : > { %v7157_v48 = vpack.c.bf16 %v1087_v47, %v1085_v44  ;;  %5413 = vmatmul.msk.bf16.gmra.mxu1 %vm578_vm1, %v767_v46  ;;  %5429 = vmatmul.msk.bf16.gmra.mxu2 %vm578_vm1, %v767_v46  ;;  %v1088_v57 = vmax.f32 %v927_v49, 0.0  ;;  %v5633_v44 = vor.u32 %v5950_v42, %v5632_v41  ;;  %v5910_v49 = vld [vmem:[%s9724_s5 + $0x54] sm:$0xf0] }
 0x1a7   : > { %2177 = vmatpush.bf16.msra.mxu2 %v5637_v38 }
 0x1a8   : > { %5660 = vmatmul.msk.bf16.gmra.mxu0 %vm1502_vm2, %v7157_v48 }
 0x1a9   : > { %v1015_v12 = vpop.f32.mrf.mxu2  ;;  %1999 = vmatpush.bf16.msra.mxu0 %v5633_v44 }
 0x1aa   : > { %v1016_v59 = vadd.f32 %v1015_v12, %v6991_v40  ;;  %v5472_v12 = vld [vmem:[%s9724_s5 + $0x48] sm:$0xf] }
 0x1ab   : > { %v928_v54 = vpop.f32.mrf.mxu1  ;;  %v5473_v53 = vor.u32 %v5910_v49, %v5472_v12 }
 0x1ac   : > { %v929_v56 = vadd.f32 %v928_v54, %v6986_v35  ;;  %v1089_v3 = vmax.f32 %v1016_v59, 0.0 }
 0x1ad   : > { %1912 = vmatpush.bf16.msrb.mxu3 %v5473_v53 }
 0x1ae   : > { %v1090_v58 = vmax.f32 %v929_v56, 0.0 }
 0x1b0   : > { %v7172_v61 = vpack.c.bf16 %v1090_v58, %v1088_v57 }
 0x1b1   : > { %v1017_v63 = vpop.f32.mrf.mxu2 }
 0x1b2   : > { %v1018_v0 = vadd.f32 %v1017_v63, %v6991_v40  ;;  %1594 = vmatmul.bf16.gmra.mxu3 %v7172_v61 }
 0x1b3   : > { %v931_v1 = vpop.f32.mrf.mxu1 }
 0x1b4   : > { %v1091_v4 = vmax.f32 %v1018_v0, 0.0  ;;  %v932_v7 = vadd.f32 %v931_v1, %v6986_v35 }
 0x1b6   : > { %v7176_v5 = vpack.c.bf16 %v1091_v4, %v1089_v3  ;;  %1737 = vmatmul.bf16.vlgmr.msrb.gmra.mxu1 %v7002_v50  ;;  %5670 = vmatmul.msk.bf16.vlgmr.msrb.gmra.mxu2 %vm1502_vm2, %v7007_v60  ;;  %v1092_v16 = vmax.f32 %v932_v7, 0.0 }
 0x1b8   : > { %5661 = vmatmul.msk.bf16.gmra.mxu0 %vm1502_vm2, %v7176_v5 }
 0x1b9   : > { %v1020_v6 = vpop.f32.mrf.mxu2 }
 0x1ba   : > { %v1021_v20 = vadd.f32 %v1020_v6, %v6991_v40 }
 0x1bb   : > { %v933_v8 = vpop.f32.mrf.mxu1 }
 0x1bc   : > { %v934_v10 = vadd.f32 %v933_v8, %v6986_v35  ;;  %v1093_v27 = vmax.f32 %v1021_v20, 0.0 }
 0x1be   : > { %v1094_v18 = vmax.f32 %v934_v10, 0.0 }
 0x1c0   : > { %v7197_v21 = vpack.c.bf16 %v1094_v18, %v1092_v16 }
 0x1c1   : > { %v1022_v22 = vpop.f32.mrf.mxu2 }
 0x1c2   : > { %v1023_v23 = vadd.f32 %v1022_v22, %v6991_v40  ;;  %1599 = vmatmul.bf16.gmra.mxu3 %v7197_v21 }
 0x1c3   : > { %v936_v26 = vpop.f32.mrf.mxu1 }
 0x1c4   : > { %v1095_v28 = vmax.f32 %v1023_v23, 0.0  ;;  %v937_v47 = vadd.f32 %v936_v26, %v6986_v35 }
 0x1c5   : > { %v1560_v29 = vpop.f32.mrf.mxu3  ;;  %v1649_v30 = vpop.f32.mrf.mxu0 }
 0x1c6   : > { %v7204_v31 = vpack.c.bf16 %v1095_v28, %v1093_v27  ;;  %v1561_v33 = vadd.f32 %v1560_v29, %v7202_v25  ;;  %1742 = vmatmul.bf16.gmra.mxu1 %v7029_v14  ;;  %5671 = vmatmul.msk.bf16.gmra.mxu2 %vm1502_vm2, %v7034_v24  ;;  %v1096_v57 = vmax.f32 %v937_v47, 0.0  ;;  %v5920_v29 = vld [vmem:[%s9724_s5 + $0xac] sm:$0xf] }
 0x1c8   : > { %v1650_v43 = vadd.f32 %v1649_v30, %v1561_v33  ;;  %5662 = vmatmul.msk.bf16.gmra.mxu0 %vm1502_vm2, %v7204_v31  ;;  %v5522_v30 = vld [vmem:[%s9724_s5 + $0xb8] sm:$0xf0] }
 0x1c9   : > { %v1025_v46 = vpop.f32.mrf.mxu2  ;;  %v5525_v37 = vor.u32 %v5920_v29, %v5522_v30  ;;  %v5944_v29 = vld [vmem:[%s9724_s5 + $0x16c] sm:$0xf]  ;;  %v5618_v30 = vld [vmem:[%s9724_s5 + $0x178] sm:$0xf0] }
 0x1ca   : > { %v1026_v63 = vadd.f32 %v1025_v46, %v6991_v40  ;;  %v2263_v4 = vmax.f32 %v1650_v43, 0.0 }
 0x1cb   : > { %v938_v52 = vpop.f32.mrf.mxu1  ;;  %2087 = vmatpush.bf16.msra.mxu1 %v5525_v37 }
 0x1cc   : > { %v939_v54 = vadd.f32 %v938_v52, %v6986_v35  ;;  %v1097_v10 = vmax.f32 %v1026_v63, 0.0 }
 0x1cd   : > { %v1562_v55 = vpop.f32.mrf.mxu3  ;;  %v1651_v56 = vpop.f32.mrf.mxu0 }
 0x1ce   : > { %v1098_v58 = vmax.f32 %v939_v54, 0.0  ;;  %v1563_v59 = vadd.f32 %v1562_v55, %v7202_v25 }
 0x1d0   : > { %v7234_v0 = vpack.c.bf16 %v1098_v58, %v1096_v57  ;;  %v1652_v1 = vadd.f32 %v1651_v56, %v1563_v59 }
 0x1d1   : > { %v1027_v3 = vpop.f32.mrf.mxu2 }
 0x1d2   : > { %v2267_v6 = vmax.f32 %v1652_v1, 0.0  ;;  %v1028_v7 = vadd.f32 %v1027_v3, %v6991_v40  ;;  %1604 = vmatmul.bf16.gmra.mxu3 %v7234_v0 }
 0x1d3   : > { %v941_v8 = vpop.f32.mrf.mxu1 }
 0x1d4   : > { %v7238_v11 = vpack.c.bf16 %v2267_v6, %v2263_v4  ;;  %v1099_v13 = vmax.f32 %v1028_v7, 0.0  ;;  %v942_v26 = vadd.f32 %v941_v8, %v6986_v35  ;;  %v5456_v6 = vld [vmem:[%s9724_s5 + $0x28] sm:$0xf]  ;;  %v5906_v7 = vld [vmem:[%s9724_s5 + $0x34] sm:$0xf0] }
 0x1d5   : > { %v1565_v15 = vpop.f32.mrf.mxu3  ;;  %v1654_v16 = vpop.f32.mrf.mxu0 }
 0x1d6   : > { %v7240_v18 = vpack.c.bf16 %v1099_v13, %v1097_v10  ;;  %v1566_v20 = vadd.f32 %v1565_v15, %v7202_v25  ;;  %1747 = vmatmul.bf16.gmra.mxu1 %v7050_v39  ;;  %5672 = vmatmul.msk.bf16.gmra.mxu2 %vm1502_vm2, %v7055_v51  ;;  %v1100_v38 = vmax.f32 %v942_v26, 0.0  ;;  %v5457_v10 = vor.u32 %v5906_v7, %v5456_v6  ;;  %v5916_v6 = vld [vmem:[%s9724_s5 + $0x8c] sm:$0xf]  ;;  %v5506_v7 = vld [vmem:[%s9724_s5 + $0x98] sm:$0xf0] }
 0x1d8   : > { %v1655_v22 = vadd.f32 %v1654_v16, %v1566_v20  ;;  %5663 = vmatmul.msk.bf16.gmra.mxu0 %vm1502_vm2, %v7240_v18  ;;  %1913 = vmatpush.bf16.msrb.mxu3 %v5457_v10 }
 0x1d9   : > { %v1030_v23 = vpop.f32.mrf.mxu2 }
 0x1da   : > { %v1031_v43 = vadd.f32 %v1030_v23, %v6991_v40  ;;  %v2271_v12 = vmax.f32 %v1655_v22, 0.0 }
 0x1db   : > { %v943_v27 = vpop.f32.mrf.mxu1 }
 0x1dc   : > { %v944_v28 = vadd.f32 %v943_v27, %v6986_v35  ;;  %v1101_v54 = vmax.f32 %v1031_v43, 0.0  ;;  %v5946_v43 = vld [vmem:[%s9724_s5 + $0x174] sm:$0xf0] }
 0x1dd   : > { %v1567_v33 = vpop.f32.mrf.mxu3  ;;  %v1656_v36 = vpop.f32.mrf.mxu0 }
 0x1de   : > { %v1102_v41 = vmax.f32 %v944_v28, 0.0  ;;  %v1568_v42 = vadd.f32 %v1567_v33, %v7202_v25 }
 0x1e0   : > { %v7258_v44 = vpack.c.bf16 %v1102_v41, %v1100_v38  ;;  %v1657_v46 = vadd.f32 %v1656_v36, %v1568_v42  ;;  %v5621_v36 = vor.u32 %v5944_v29, %v5618_v30  ;;  %v5616_v42 = vld [vmem:[%s9724_s5 + $0x168] sm:$0xf] }
 0x1e1   : > { %v1032_v47 = vpop.f32.mrf.mxu2 }
 0x1e2   : > { %v2275_v49 = vmax.f32 %v1657_v46, 0.0  ;;  %v1033_v52 = vadd.f32 %v1032_v47, %v6991_v40  ;;  %1609 = vmatmul.bf16.gmra.mxu3 %v7258_v44  ;;  %2178 = vmatpush.bf16.msra.mxu2 %v5621_v36  ;;  %v5617_v47 = vor.u32 %v5946_v43, %v5616_v42 }
 0x1e3   : > { %v946_v53 = vpop.f32.mrf.mxu1 }
 0x1e4   : > { %v1103_v55 = vmax.f32 %v1033_v52, 0.0  ;;  %v7262_v56 = vpack.c.bf16 %v2275_v49, %v2271_v12  ;;  %v947_v4 = vadd.f32 %v946_v53, %v6986_v35  ;;  %2000 = vmatpush.bf16.msra.mxu0 %v5617_v47 }
 0x1e5   : > { %v1570_v57 = vpop.f32.mrf.mxu3  ;;  %v1659_v58 = vpop.f32.mrf.mxu0 }
 0x1e6   : > { %v7264_v59 = vpack.c.bf16 %v1103_v55, %v1101_v54  ;;  %v1571_v63 = vadd.f32 %v1570_v57, %v7202_v25  ;;  %1752 = vmatmul.bf16.gmra.mxu1 %v7071_v2  ;;  %5673 = vmatmul.msk.bf16.gmra.mxu2 %vm1502_vm2, %v7082_v17  ;;  %v1104_v20 = vmax.f32 %v947_v4, 0.0 }
 0x1e8   : > { %v1660_v1 = vadd.f32 %v1659_v58, %v1571_v63  ;;  %5664 = vmatmul.msk.bf16.gmra.mxu0 %vm1502_vm2, %v7264_v59 }
 0x1e9   : > { %v1035_v3 = vpop.f32.mrf.mxu2 }
 0x1ea   : > { %v1036_v26 = vadd.f32 %v1035_v3, %v6991_v40  ;;  %v2279_v37 = vmax.f32 %v1660_v1, 0.0 }
 0x1eb   : > { %v948_v8 = vpop.f32.mrf.mxu1 }
 0x1ec   : > { %v949_v13 = vadd.f32 %v948_v8, %v6986_v35  ;;  %v1105_v12 = vmax.f32 %v1036_v26, 0.0 }
 0x1ed   : > { %v1572_v15 = vpop.f32.mrf.mxu3  ;;  %v1661_v16 = vpop.f32.mrf.mxu0 }
 0x1ee   : > { %v1106_v22 = vmax.f32 %v949_v13, 0.0  ;;  %v1573_v23 = vadd.f32 %v1572_v15, %v7202_v25  ;;  %v5509_v13 = vor.u32 %v5916_v6, %v5506_v7 }
 0x1f0   : > { %v7282_v27 = vpack.c.bf16 %v1106_v22, %v1104_v20  ;;  %v1662_v28 = vadd.f32 %v1661_v16, %v1573_v23  ;;  %2088 = vmatpush.bf16.msra.mxu1 %v5509_v13 }
 0x1f1   : > { %v1037_v33 = vpop.f32.mrf.mxu2 }
 0x1f2   : > { %v2283_v38 = vmax.f32 %v1662_v28, 0.0  ;;  %v1038_v41 = vadd.f32 %v1037_v33, %v6991_v40  ;;  %1614 = vmatmul.bf16.gmra.mxu3 %v7282_v27 }
 0x1f3   : > { %v951_v46 = vpop.f32.mrf.mxu1 }
 0x1f4   : > { %v1107_v49 = vmax.f32 %v1038_v41, 0.0  ;;  %v7298_v52 = vpack.c.bf16 %v2283_v38, %v2279_v37  ;;  %v952_v1 = vadd.f32 %v951_v46, %v6986_v35 }
 0x1f5   : > { %v1575_v53 = vpop.f32.mrf.mxu3  ;;  %v1664_v54 = vpop.f32.mrf.mxu0 }
 0x1f6   : > { %v7300_v55 = vpack.c.bf16 %v1107_v49, %v1105_v12  ;;  %v1576_v57 = vadd.f32 %v1575_v53, %v7202_v25  ;;  %1757 = vmatmul.bf16.gmra.mxu1 %v7098_v32  ;;  %5674 = vmatmul.msk.bf16.gmra.mxu2 %vm1502_vm2, %v7103_v45  ;;  %v1108_v15 = vmax.f32 %v952_v1, 0.0 }
 0x1f8   : > { %v1665_v58 = vadd.f32 %v1664_v54, %v1576_v57  ;;  %5665 = vmatmul.msk.bf16.gmra.mxu0 %vm1502_vm2, %v7300_v55  ;;  %v5440_v54 = vld [vmem:[%s9724_s5 + $0x8] sm:$0xf]  ;;  %v5902_v57 = vld [vmem:[%s9724_s5 + $0x14] sm:$0xf0] }
 0x1f9   : > { %v1040_v63 = vpop.f32.mrf.mxu2 }
 0x1fa   : > { %v1041_v22 = vadd.f32 %v1040_v63, %v6991_v40  ;;  %v2287_v29 = vmax.f32 %v1665_v58, 0.0  ;;  %v5441_v63 = vor.u32 %v5902_v57, %v5440_v54 }
 0x1fb   : > { %v953_v3 = vpop.f32.mrf.mxu1 }
 0x1fc   : > { %v954_v4 = vadd.f32 %v953_v3, %v6986_v35  ;;  %v1109_v37 = vmax.f32 %v1041_v22, 0.0  ;;  %1914 = vmatpush.bf16.msrb.mxu3 %v5441_v63  ;;  %v5942_v63 = vld [vmem:[%s9724_s5 + $0x154] sm:$0xf0] }
 0x1fd   : > { %v1577_v8 = vpop.f32.mrf.mxu3  ;;  %v1666_v10 = vpop.f32.mrf.mxu0 }
 0x1fe   : > { %v1110_v16 = vmax.f32 %v954_v4, 0.0  ;;  %v1578_v20 = vadd.f32 %v1577_v8, %v7202_v25 }
 0x200   : > { %v7318_v23 = vpack.c.bf16 %v1110_v16, %v1108_v15  ;;  %v1667_v26 = vadd.f32 %v1666_v10, %v1578_v20 }
 0x201   : > { %v1042_v28 = vpop.f32.mrf.mxu2 }
 0x202   : > { %v2291_v30 = vmax.f32 %v1667_v26, 0.0  ;;  %v1043_v33 = vadd.f32 %v1042_v28, %v6991_v40  ;;  %1619 = vmatmul.bf16.gmra.mxu3 %v7318_v23 }
 0x203   : > { %v956_v36 = vpop.f32.mrf.mxu1 }
 0x204   : > { %v1111_v38 = vmax.f32 %v1043_v33, 0.0  ;;  %v7322_v41 = vpack.c.bf16 %v2291_v30, %v2287_v29  ;;  %v957_v53 = vadd.f32 %v956_v36, %v6986_v35 }
 0x205   : > { %v1580_v42 = vpop.f32.mrf.mxu3  ;;  %v1669_v43 = vpop.f32.mrf.mxu0 }
 0x206   : > { %v7324_v46 = vpack.c.bf16 %v1111_v38, %v1109_v37  ;;  %v1581_v47 = vadd.f32 %v1580_v42, %v7202_v25  ;;  %1762 = vmatmul.bf16.gmra.mxu1 %v7119_v62  ;;  %5675 = vmatmul.msk.bf16.gmra.mxu2 %vm1502_vm2, %v7124_v9  ;;  %v1112_v6 = vmax.f32 %v957_v53, 0.0  ;;  %v5602_v53 = vld [vmem:[%s9724_s5 + $0x158] sm:$0xf0] }
 0x208   : > { %v1670_v12 = vadd.f32 %v1669_v43, %v1581_v47  ;;  %5666 = vmatmul.msk.bf16.gmra.mxu0 %vm1502_vm2, %v7324_v46 }
 0x209   : > { %v1045_v49 = vpop.f32.mrf.mxu2 }
 0x20a   : > { %v1046_v10 = vadd.f32 %v1045_v49, %v6991_v40  ;;  %v2295_v20 = vmax.f32 %v1670_v12, 0.0  ;;  %v5940_v49 = vld [vmem:[%s9724_s5 + $0x14c] sm:$0xf] }
 0x20b   : > { %v958_v58 = vpop.f32.mrf.mxu1  ;;  %v5605_v57 = vor.u32 %v5940_v49, %v5602_v53  ;;  %v5568_v53 = vld [vmem:[%s9724_s5 + $0x108] sm:$0xf] }
 0x20c   : > { %v959_v1 = vadd.f32 %v958_v58, %v6986_v35  ;;  %v1113_v29 = vmax.f32 %v1046_v10, 0.0  ;;  %v5600_v58 = vld [vmem:[%s9724_s5 + $0x148] sm:$0xf] }
 0x20d   : > { %v1582_v3 = vpop.f32.mrf.mxu3  ;;  %v1671_v4 = vpop.f32.mrf.mxu0  ;;  %2179 = vmatpush.bf16.msra.mxu2 %v5605_v57 }
 0x20e   : > { %v1114_v7 = vmax.f32 %v959_v1, 0.0  ;;  %v1583_v8 = vadd.f32 %v1582_v3, %v7202_v25  ;;  %v5601_v3 = vor.u32 %v5942_v63, %v5600_v58 }
 0x210   : > { %v7342_v13 = vpack.c.bf16 %v1114_v7, %v1112_v6  ;;  %v1672_v15 = vadd.f32 %v1671_v4, %v1583_v8  ;;  %v5912_v4 = vld [vmem:[%s9724_s5 + $0x6c] sm:$0xf]  ;;  %v5490_v6 = vld [vmem:[%s9724_s5 + $0x78] sm:$0xf0]  ;;  %2001 = vmatpush.bf16.msra.mxu0 %v5601_v3 }
 0x211   : > { %v1047_v16 = vpop.f32.mrf.mxu2  ;;  %v5493_v10 = vor.u32 %v5912_v4, %v5490_v6 }
 0x212   : > { %v2299_v22 = vmax.f32 %v1672_v15, 0.0  ;;  %v1048_v26 = vadd.f32 %v1047_v16, %v6991_v40  ;;  %1624 = vmatmul.bf16.gmra.mxu3 %v7342_v13 }
 0x213   : > { %v961_v28 = vpop.f32.mrf.mxu1  ;;  %2089 = vmatpush.bf16.msra.mxu1 %v5493_v10 }
 0x214   : > { %v1115_v30 = vmax.f32 %v1048_v26, 0.0  ;;  %v7346_v33 = vpack.c.bf16 %v2299_v22, %v2295_v20  ;;  %v962_v12 = vadd.f32 %v961_v28, %v6986_v35  ;;  %v5584_v22 = vld [vmem:[%s9724_s5 + $0x128] sm:$0xf]  ;;  %v5938_v26 = vld [vmem:[%s9724_s5 + $0x134] sm:$0xf0] }
 0x215   : > { %v1585_v36 = vpop.f32.mrf.mxu3  ;;  %v1674_v37 = vpop.f32.mrf.mxu0  ;;  %v5585_v28 = vor.u32 %v5938_v26, %v5584_v22 }
 0x216   : > { %v7348_v38 = vpack.c.bf16 %v1115_v30, %v1113_v29  ;;  %v1586_v42 = vadd.f32 %v1585_v36, %v7202_v25  ;;  %1767 = vmatmul.bf16.gmra.mxu1 %v7152_v34  ;;  %5676 = vmatmul.msk.bf16.gmra.mxu2 %vm1502_vm2, %v7157_v48  ;;  %v1116_v15 = vmax.f32 %v962_v12, 0.0 }
 0x217   : > { %2002 = vmatpush.bf16.msra.mxu0 %v5585_v28 }
 0x218   : > { %v1675_v43 = vadd.f32 %v1674_v37, %v1586_v42  ;;  %5667 = vmatmul.msk.bf16.gmra.mxu0 %vm1502_vm2, %v7348_v38 }
 0x219   : > { %v1050_v47 = vpop.f32.mrf.mxu2 }
 0x21a   : > { %v1051_v29 = vadd.f32 %v1050_v47, %v6991_v40  ;;  %v2303_v42 = vmax.f32 %v1675_v43, 0.0 }
 0x21b   : > { %v963_v54 = vpop.f32.mrf.mxu1 }
 0x21c   : > { %v964_v1 = vadd.f32 %v963_v54, %v6986_v35  ;;  %v5934_v54 = vld [vmem:[%s9724_s5 + $0x114] sm:$0xf0]  ;;  %v1117_v58 = vmax.f32 %v1051_v29, 0.0 }
 0x21d   : > { %v1587_v7 = vpop.f32.mrf.mxu3  ;;  %v1676_v8 = vpop.f32.mrf.mxu0  ;;  %v5569_v57 = vor.u32 %v5934_v54, %v5568_v53 }
 0x21e   : > { %v1118_v16 = vmax.f32 %v964_v1, 0.0  ;;  %v1588_v20 = vadd.f32 %v1587_v7, %v7202_v25 }
 0x21f   : > { %2003 = vmatpush.bf16.msra.mxu0 %v5569_v57 }
 0x220   : > { %v7384_v30 = vpack.c.bf16 %v1118_v16, %v1116_v15  ;;  %v1677_v36 = vadd.f32 %v1676_v8, %v1588_v20  ;;  %v5962_v15 = vld [vmem:[%s9726_s7 + $0x38] sm:$0xff] }
 0x221   : > { %v1052_v37 = vpop.f32.mrf.mxu2  ;;  %2716 = vmatpush.bf16.msra.mxu3 %v5962_v15 }
 0x222   : > { %v2307_v12 = vmax.f32 %v1677_v36, 0.0  ;;  %v1053_v49 = vadd.f32 %v1052_v37, %v6991_v40  ;;  %1629 = vmatmul.bf16.gmra.mxu3 %v7384_v30 }
 0x223   : > { %v966_v47 = vpop.f32.mrf.mxu1 }
 0x224   : > { %v1119_v63 = vmax.f32 %v1053_v49, 0.0  ;;  %v7394_v1 = vpack.c.bf16 %v2307_v12, %v2303_v42  ;;  %v967_v10 = vadd.f32 %v966_v47, %v6986_v35 }
 0x225   : > { %v1590_v43 = vpop.f32.mrf.mxu3  ;;  %v1679_v3 = vpop.f32.mrf.mxu0 }
 0x226   : > { %9740 = vst [vmem:[#allocation5_spill] sm:$0xff] %v7394_v1  ;;  %v7396_v4 = vpack.c.bf16 %v1119_v63, %v1117_v58  ;;  %v1591_v6 = vadd.f32 %v1590_v43, %v7202_v25  ;;  %1772 = vmatmul.bf16.gmra.mxu1 %v7172_v61  ;;  %5677 = vmatmul.msk.bf16.gmra.mxu2 %vm1502_vm2, %v7176_v5  ;;  %v1120_v28 = vmax.f32 %v967_v10, 0.0  ;;  %v7416_v63 = vperm.slane %v7194_v19, 1 }
 0x228   : > { %v1680_v7 = vadd.f32 %v1679_v3, %v1591_v6  ;;  %5668 = vmatmul.msk.bf16.gmra.mxu0 %vm1502_vm2, %v7396_v4 }
 0x229   : > { %v1055_v8 = vpop.f32.mrf.mxu2 }
 0x22a   : > { %v1056_v37 = vadd.f32 %v1055_v8, %v6991_v40  ;;  %v2311_v53 = vmax.f32 %v1680_v7, 0.0 }
 0x22b   : > { %v968_v16 = vpop.f32.mrf.mxu1 }
 0x22c   : > { %v969_v20 = vadd.f32 %v968_v16, %v6986_v35  ;;  %v1121_v57 = vmax.f32 %v1056_v37, 0.0 }
 0x22d   : > { %v1592_v22 = vpop.f32.mrf.mxu3  ;;  %v1681_v26 = vpop.f32.mrf.mxu0 }
 0x22e   : > { %v1122_v29 = vmax.f32 %v969_v20, 0.0  ;;  %v1593_v36 = vadd.f32 %v1592_v22, %v7202_v25  ;;  %v5908_v20 = vld [vmem:[%s9724_s5 + $0x4c] sm:$0xf]  ;;  %v5474_v22 = vld [vmem:[%s9724_s5 + $0x58] sm:$0xf0] }
 0x230   : > { %v7411_v42 = vpack.c.bf16 %v1122_v29, %v1120_v28  ;;  %v1682_v12 = vadd.f32 %v1681_v26, %v1593_v36  ;;  %v5477_v29 = vor.u32 %v5908_v20, %v5474_v22 }
 0x231   : > { %v1057_v49 = vpop.f32.mrf.mxu2 }
 0x232   : > { %v2315_v54 = vmax.f32 %v1682_v12, 0.0  ;;  %v1058_v47 = vadd.f32 %v1057_v49, %v6991_v40  ;;  %1634 = vmatmul.bf16.gmra.mxu3 %v7411_v42  ;;  %2090 = vmatpush.bf16.msra.mxu1 %v5477_v29  ;;  %v5961_v29 = vld [vmem:[%s9726_s7 + $0x30] sm:$0xff] }
 0x233   : > { %v1738_v35 = vpop.f32.mrf.mxu1  ;;  %2717 = vmatpush.bf16.msra.mxu3 %v5961_v29 }
 0x234   : > { %v1123_v58 = vmax.f32 %v1058_v47, 0.0  ;;  %v7418_v43 = vpack.c.bf16 %v2315_v54, %v2311_v53  ;;  %v1739_v40 = vadd.f32 %v1738_v35, %v7416_v63 }
 0x235   : > { %v1595_v3 = vpop.f32.mrf.mxu3  ;;  %v1684_v6 = vpop.f32.mrf.mxu0 }
 0x236   : > { %9741 = vst [vmem:[#allocation6_spill] sm:$0xff] %v7418_v43  ;;  %v7420_v8 = vpack.c.bf16 %v1123_v58, %v1121_v57  ;;  %v1596_v10 = vadd.f32 %v1595_v3, %v7202_v25  ;;  %1777 = vmatmul.bf16.gmra.mxu1 %v7197_v21  ;;  %5678 = vmatmul.msk.bf16.gmra.mxu2 %vm1502_vm2, %v7204_v31  ;;  %v5936_v3 = vld [vmem:[%s9724_s5 + $0x12c] sm:$0xf] }
 0x238   : > { %v1685_v7 = vadd.f32 %v1684_v6, %v1596_v10  ;;  %5669 = vmatmul.msk.bf16.gmra.mxu0 %vm1502_vm2, %v7420_v8  ;;  %v5586_v6 = vld [vmem:[%s9724_s5 + $0x138] sm:$0xf0] }
 0x239   : > { %v1827_v19 = vpop.f32.mrf.mxu2 }
 0x23a   : > { %v1828_v15 = vadd.f32 %v1827_v19, %v1739_v40  ;;  %v2319_v53 = vmax.f32 %v1685_v7, 0.0  ;;  %v5589_v7 = vor.u32 %v5936_v3, %v5586_v6 }
 0x23b   : > { %v1740_v16 = vpop.f32.mrf.mxu1 }
 0x23c   : > { %v1741_v37 = vadd.f32 %v1740_v16, %v7416_v63  ;;  %v2264_v57 = vmax.f32 %v1828_v15, 0.0  ;;  %2180 = vmatpush.bf16.msra.mxu2 %v5589_v7 }
 0x23d   : > { %v1597_v26 = vpop.f32.mrf.mxu3  ;;  %v1686_v28 = vpop.f32.mrf.mxu0 }
 0x23e   : > { %v1598_v36 = vadd.f32 %v1597_v26, %v7202_v25 }
 0x240   : > { %v1687_v12 = vadd.f32 %v1686_v28, %v1598_v36 }
 0x241   : > { %v1829_v49 = vpop.f32.mrf.mxu2 }
 0x242   : > { %v2323_v54 = vmax.f32 %v1687_v12, 0.0  ;;  %v1830_v47 = vadd.f32 %v1829_v49, %v1741_v37  ;;  %1915 = vmatmul.bf16.vlgmr.msrb.gmra.mxu3 %v7002_v50 }
 0x243   : > { %v1743_v35 = vpop.f32.mrf.mxu1 }
 0x244   : > { %v2268_v58 = vmax.f32 %v1830_v47, 0.0  ;;  %v7444_v10 = vpack.c.bf16 %v2323_v54, %v2319_v53  ;;  %v1744_v15 = vadd.f32 %v1743_v35, %v7416_v63 }
 0x245   : > { %v1600_v40 = vpop.f32.mrf.mxu3  ;;  %v1689_v19 = vpop.f32.mrf.mxu0 }
 0x246   : > { %9742 = vst [vmem:[#allocation7_spill] sm:$0xff] %v7444_v10  ;;  %v7446_v16 = vpack.c.bf16 %v2268_v58, %v2264_v57  ;;  %v1601_v20 = vadd.f32 %v1600_v40, %v7202_v25  ;;  %1782 = vmatmul.bf16.gmra.mxu1 %v7234_v0  ;;  %5679 = vmatmul.msk.bf16.gmra.mxu2 %vm1502_vm2, %v7240_v18 }
 0x248   : > { %v1690_v22 = vadd.f32 %v1689_v19, %v1601_v20  ;;  %5686 = vmatmul.msk.bf16.vlgmr.msra.gmra.mxu0 %vm1502_vm2, %v7007_v60 }
 0x249   : > { %v1832_v26 = vpop.f32.mrf.mxu2 }
 0x24a   : > { %v1833_v28 = vadd.f32 %v1832_v26, %v1744_v15  ;;  %v2327_v35 = vmax.f32 %v1690_v22, 0.0 }
 0x24b   : > { %v1745_v36 = vpop.f32.mrf.mxu1 }
 0x24c   : > { %v1746_v53 = vadd.f32 %v1745_v36, %v7416_v63  ;;  %v2272_v6 = vmax.f32 %v1833_v28, 0.0 }
 0x24d   : > { %v1602_v37 = vpop.f32.mrf.mxu3  ;;  %v1691_v12 = vpop.f32.mrf.mxu0 }
 0x24e   : > { %v1603_v49 = vadd.f32 %v1602_v37, %v7202_v25 }
 0x250   : > { %v1692_v54 = vadd.f32 %v1691_v12, %v1603_v49  ;;  %v5904_v12 = vld [vmem:[%s9724_s5 + $0x2c] sm:$0xf]  ;;  %v5458_v49 = vld [vmem:[%s9724_s5 + $0x38] sm:$0xf0] }
 0x251   : > { %v1834_v47 = vpop.f32.mrf.mxu2 }
 0x252   : > { %v2331_v57 = vmax.f32 %v1692_v54, 0.0  ;;  %v1835_v58 = vadd.f32 %v1834_v47, %v1746_v53  ;;  %1920 = vmatmul.bf16.gmra.mxu3 %v7029_v14  ;;  %v5461_v47 = vor.u32 %v5904_v12, %v5458_v49 }
 0x253   : > { %v1748_v3 = vpop.f32.mrf.mxu1 }
 0x254   : > { %v2276_v40 = vmax.f32 %v1835_v58, 0.0  ;;  %v7461_v19 = vpack.c.bf16 %v2331_v57, %v2327_v35  ;;  %v1749_v22 = vadd.f32 %v1748_v3, %v7416_v63  ;;  %2091 = vmatpush.bf16.msra.mxu1 %v5461_v47  ;;  %v5932_v47 = vld [vmem:[%s9724_s5 + $0x10c] sm:$0xf] }
 0x255   : > { %v1605_v7 = vpop.f32.mrf.mxu3  ;;  %v1694_v20 = vpop.f32.mrf.mxu0 }
 0x256   : > { %9743 = vst [vmem:[#allocation8_spill] sm:$0xff] %v7461_v19  ;;  %v1606_v15 = vadd.f32 %v1605_v7, %v7202_v25  ;;  %1787 = vmatmul.bf16.gmra.mxu1 %v7258_v44  ;;  %5680 = vmatmul.msk.bf16.gmra.mxu2 %vm1502_vm2, %v7264_v59  ;;  %v7467_v26 = vpack.c.bf16 %v2276_v40, %v2272_v6 }
 0x258   : > { %v1695_v29 = vadd.f32 %v1694_v20, %v1606_v15  ;;  %5687 = vmatmul.msk.bf16.gmra.mxu0 %vm1502_vm2, %v7034_v24 }
 0x259   : > { %v1837_v28 = vpop.f32.mrf.mxu2 }
 0x25a   : > { %v1838_v36 = vadd.f32 %v1837_v28, %v1749_v22  ;;  %v2335_v6 = vmax.f32 %v1695_v29, 0.0 }
 0x25b   : > { %v1750_v37 = vpop.f32.mrf.mxu1 }
 0x25c   : > { %v1751_v57 = vadd.f32 %v1750_v37, %v7416_v63  ;;  %v2280_v15 = vmax.f32 %v1838_v36, 0.0 }
 0x25d   : > { %v1607_v53 = vpop.f32.mrf.mxu3  ;;  %v1696_v54 = vpop.f32.mrf.mxu0 }
 0x25e   : > { %v1608_v35 = vadd.f32 %v1607_v53, %v7202_v25 }
 0x260   : > { %v1697_v58 = vadd.f32 %v1696_v54, %v1608_v35  ;;  %v5960_v54 = vld [vmem:[%s9726_s7 + $0x28] sm:$0xff]  ;;  %v5570_v35 = vld [vmem:[%s9724_s5 + $0x118] sm:$0xf0] }
 0x261   : > { %v1839_v3 = vpop.f32.mrf.mxu2  ;;  %2718 = vmatpush.bf16.msra.mxu3 %v5960_v54 }
 0x262   : > { %v2339_v40 = vmax.f32 %v1697_v58, 0.0  ;;  %v1840_v7 = vadd.f32 %v1839_v3, %v1751_v57  ;;  %1925 = vmatmul.bf16.gmra.mxu3 %v7050_v39  ;;  %v5573_v58 = vor.u32 %v5932_v47, %v5570_v35 }
 0x263   : > { %v1753_v20 = vpop.f32.mrf.mxu1 }
 0x264   : > { %v2284_v22 = vmax.f32 %v1840_v7, 0.0  ;;  %v7481_v28 = vpack.c.bf16 %v2339_v40, %v2335_v6  ;;  %v1754_v29 = vadd.f32 %v1753_v20, %v7416_v63  ;;  %2181 = vmatpush.bf16.msra.mxu2 %v5573_v58  ;;  %v5442_v58 = vld [vmem:[%s9724_s5 + $0x18] sm:$0xf0] }
 0x265   : > { %v1610_v19 = vpop.f32.mrf.mxu3  ;;  %v1699_v10 = vpop.f32.mrf.mxu0 }
 0x266   : > { %9744 = vst [vmem:[#allocation9_spill] sm:$0xff] %v7481_v28  ;;  %v1611_v12 = vadd.f32 %v1610_v19, %v7202_v25  ;;  %1792 = vmatmul.bf16.gmra.mxu1 %v7282_v27  ;;  %5681 = vmatmul.msk.bf16.gmra.mxu2 %vm1502_vm2, %v7300_v55  ;;  %v7487_v37 = vpack.c.bf16 %v2284_v22, %v2280_v15 }
 0x268   : > { %v1700_v49 = vadd.f32 %v1699_v10, %v1611_v12  ;;  %5688 = vmatmul.msk.bf16.gmra.mxu0 %vm1502_vm2, %v7055_v51 }
 0x269   : > { %v1842_v36 = vpop.f32.mrf.mxu2 }
 0x26a   : > { %v1843_v53 = vadd.f32 %v1842_v36, %v1754_v29  ;;  %v2343_v20 = vmax.f32 %v1700_v49, 0.0 }
 0x26b   : > { %v1755_v19 = vpop.f32.mrf.mxu1 }
 0x26c   : > { %v1756_v6 = vadd.f32 %v1755_v19, %v7416_v63  ;;  %v2288_v29 = vmax.f32 %v1843_v53, 0.0 }
 0x26d   : > { %v1612_v10 = vpop.f32.mrf.mxu3  ;;  %v1701_v57 = vpop.f32.mrf.mxu0 }
 0x26e   : > { %v1613_v3 = vadd.f32 %v1612_v10, %v7202_v25 }
 0x270   : > { %v1702_v40 = vadd.f32 %v1701_v57, %v1613_v3 }
 0x271   : > { %v1844_v7 = vpop.f32.mrf.mxu2 }
 0x272   : > { %v2347_v15 = vmax.f32 %v1702_v40, 0.0  ;;  %v1845_v22 = vadd.f32 %v1844_v7, %v1756_v6  ;;  %1930 = vmatmul.bf16.gmra.mxu3 %v7071_v2 }
 0x273   : > { %v1758_v12 = vpop.f32.mrf.mxu1 }
 0x274   : > { %v2292_v36 = vmax.f32 %v1845_v22, 0.0  ;;  %v7504_v54 = vpack.c.bf16 %v2347_v15, %v2343_v20  ;;  %v1759_v49 = vadd.f32 %v1758_v12, %v7416_v63 }
 0x275   : > { %v1615_v28 = vpop.f32.mrf.mxu3  ;;  %v1704_v43 = vpop.f32.mrf.mxu0 }
 0x276   : > { %9745 = vst [vmem:[#allocation10_spill] sm:$0xff] %v7504_v54  ;;  %v1616_v47 = vadd.f32 %v1615_v28, %v7202_v25  ;;  %1797 = vmatmul.bf16.gmra.mxu1 %v7318_v23  ;;  %5682 = vmatmul.msk.bf16.gmra.mxu2 %vm1502_vm2, %v7324_v46  ;;  %v7510_v19 = vpack.c.bf16 %v2292_v36, %v2288_v29  ;;  %v5900_v28 = vld [vmem:[%s9724_s5 + $0xc] sm:$0xf] }
 0x277   : > { %v5445_v40 = vor.u32 %v5900_v28, %v5442_v58 }
 0x278   : > { %v1705_v35 = vadd.f32 %v1704_v43, %v1616_v47  ;;  %5689 = vmatmul.msk.bf16.gmra.mxu0 %vm1502_vm2, %v7082_v17 }
 0x279   : > { %v1847_v53 = vpop.f32.mrf.mxu2  ;;  %2092 = vmatpush.bf16.msra.mxu1 %v5445_v40 }
 0x27a   : > { %v1848_v10 = vadd.f32 %v1847_v53, %v1759_v49  ;;  %v2351_v22 = vmax.f32 %v1705_v35, 0.0 }
 0x27b   : > { %v1760_v57 = vpop.f32.mrf.mxu1 }
 0x27c   : > { %v1761_v43 = vadd.f32 %v1760_v57, %v7416_v63  ;;  %v2296_v47 = vmax.f32 %v1848_v10, 0.0 }
 0x27d   : > { %v1617_v3 = vpop.f32.mrf.mxu3  ;;  %v1706_v6 = vpop.f32.mrf.mxu0 }
 0x27e   : > { %v1618_v7 = vadd.f32 %v1617_v3, %v7202_v25 }
 0x280   : > { %v1707_v20 = vadd.f32 %v1706_v6, %v1618_v7  ;;  %v5959_v6 = vld [vmem:[%s9726_s7 + $0x20] sm:$0xff] }
 0x281   : > { %v1849_v15 = vpop.f32.mrf.mxu2  ;;  %2719 = vmatpush.bf16.msra.mxu3 %v5959_v6 }
 0x282   : > { %v2355_v12 = vmax.f32 %v1707_v20, 0.0  ;;  %v1850_v29 = vadd.f32 %v1849_v15, %v1761_v43  ;;  %1935 = vmatmul.bf16.gmra.mxu3 %v7098_v32 }
 0x283   : > { %v1763_v36 = vpop.f32.mrf.mxu1 }
 0x284   : > { %v2300_v49 = vmax.f32 %v1850_v29, 0.0  ;;  %v7524_v53 = vpack.c.bf16 %v2355_v12, %v2351_v22  ;;  %v1764_v35 = vadd.f32 %v1763_v36, %v7416_v63 }
 0x285   : > { %v1620_v54 = vpop.f32.mrf.mxu3  ;;  %v1709_v1 = vpop.f32.mrf.mxu0 }
 0x286   : > { %9746 = vst [vmem:[#allocation11_spill] sm:$0xff] %v7524_v53  ;;  %v1621_v28 = vadd.f32 %v1620_v54, %v7202_v25  ;;  %1802 = vmatmul.bf16.gmra.mxu1 %v7342_v13  ;;  %5683 = vmatmul.msk.bf16.gmra.mxu2 %vm1502_vm2, %v7348_v38  ;;  %v7530_v57 = vpack.c.bf16 %v2300_v49, %v2296_v47 }
 0x288   : > { %v1710_v58 = vadd.f32 %v1709_v1, %v1621_v28  ;;  %5690 = vmatmul.msk.bf16.gmra.mxu0 %vm1502_vm2, %v7103_v45 }
 0x289   : > { %v1852_v10 = vpop.f32.mrf.mxu2 }
 0x28a   : > { %v1853_v3 = vadd.f32 %v1852_v10, %v1764_v35  ;;  %v2359_v1 = vmax.f32 %v1710_v58, 0.0 }
 0x28b   : > { %v1765_v54 = vpop.f32.mrf.mxu1 }
 0x28c   : > { %v1766_v20 = vadd.f32 %v1765_v54, %v7416_v63  ;;  %v2304_v47 = vmax.f32 %v1853_v3, 0.0 }
 0x28d   : > { %v1622_v40 = vpop.f32.mrf.mxu3  ;;  %v1711_v7 = vpop.f32.mrf.mxu0 }
 0x28e   : > { %v1623_v43 = vadd.f32 %v1622_v40, %v7202_v25 }
 0x290   : > { %v1712_v15 = vadd.f32 %v1711_v7, %v1623_v43  ;;  %v5980_v43 = vld [vmem:[%s9726_s7 + $0xc8] sm:$0xff] }
 0x291   : > { %v1854_v22 = vpop.f32.mrf.mxu2  ;;  %2989 = vmatpush.bf16.msrb.mxu2 %v5980_v43 }
 0x292   : > { %v2363_v12 = vmax.f32 %v1712_v15, 0.0  ;;  %v1855_v29 = vadd.f32 %v1854_v22, %v1766_v20  ;;  %1940 = vmatmul.bf16.gmra.mxu3 %v7119_v62  ;;  %v5970_v20 = vld [vmem:[%s9726_s7 + $0x78] sm:$0xff] }
 0x293   : > { %v1768_v36 = vpop.f32.mrf.mxu1  ;;  %2805 = vmatpush.bf16.msrb.mxu0 %v5970_v20  ;;  %v5978_v22 = vld [vmem:[%s9726_s7 + $0xb8] sm:$0xff] }
 0x294   : > { %v2308_v49 = vmax.f32 %v1855_v29, 0.0  ;;  %v7541_v28 = vpack.c.bf16 %v2363_v12, %v2359_v1  ;;  %v1769_v58 = vadd.f32 %v1768_v36, %v7416_v63  ;;  %2894 = vmatpush.bf16.msrb.mxu1 %v5978_v22 }
 0x295   : > { %v1625_v35 = vpop.f32.mrf.mxu3  ;;  %v1714_v10 = vpop.f32.mrf.mxu0 }
 0x296   : > { %9747 = vst [vmem:[#allocation12_spill] sm:$0xff] %v7541_v28  ;;  %v1626_v6 = vadd.f32 %v1625_v35, %v7202_v25  ;;  %1807 = vmatmul.bf16.gmra.mxu1 %v7384_v30  ;;  %5684 = vmatmul.msk.bf16.gmra.mxu2 %vm1502_vm2, %v7396_v4  ;;  %v7547_v54 = vpack.c.bf16 %v2308_v49, %v2304_v47 }
 0x298   : > { %9748 = vst [vmem:[#allocation13_spill] sm:$0xff] %v7547_v54  ;;  %v1715_v40 = vadd.f32 %v1714_v10, %v1626_v6  ;;  %5691 = vmatmul.msk.bf16.gmra.mxu0 %vm1502_vm2, %v7124_v9 }
 0x299   : > { %v1857_v3 = vpop.f32.mrf.mxu2 }
 0x29a   : > { %v1858_v7 = vadd.f32 %v1857_v3, %v1769_v58  ;;  %v2367_v35 = vmax.f32 %v1715_v40, 0.0 }
 0x29b   : > { %v1770_v15 = vpop.f32.mrf.mxu1 }
 0x29c   : > { %v1771_v36 = vadd.f32 %v1770_v15, %v7416_v63  ;;  %v2312_v3 = vmax.f32 %v1858_v7, 0.0 }
 0x29d   : > { %v1627_v1 = vpop.f32.mrf.mxu3  ;;  %v1716_v12 = vpop.f32.mrf.mxu0 }
 0x29e   : > { %v1628_v29 = vadd.f32 %v1627_v1, %v7202_v25 }
 0x2a0   : > { %v1717_v47 = vadd.f32 %v1716_v12, %v1628_v29  ;;  %v5958_v12 = vld [vmem:[%s9726_s7 + $0x18] sm:$0xff] }
 0x2a1   : > { %v1859_v49 = vpop.f32.mrf.mxu2  ;;  %2720 = vmatpush.bf16.msra.mxu3 %v5958_v12 }
 0x2a2   : > { %v2371_v10 = vmax.f32 %v1717_v47, 0.0  ;;  %v1860_v6 = vadd.f32 %v1859_v49, %v1771_v36  ;;  %1945 = vmatmul.bf16.gmra.mxu3 %v7152_v34 }
 0x2a3   : > { %v1773_v58 = vpop.f32.mrf.mxu1 }
 0x2a4   : > { %v2316_v43 = vmax.f32 %v1860_v6, 0.0  ;;  %v7564_v20 = vpack.c.bf16 %v2371_v10, %v2367_v35  ;;  %v1774_v40 = vadd.f32 %v1773_v58, %v7416_v63 }
 0x2a5   : > { %v1630_v28 = vpop.f32.mrf.mxu3  ;;  %v1719_v53 = vpop.f32.mrf.mxu0 }
 0x2a6   : > { %9749 = vst [vmem:[#allocation14_spill] sm:$0xff] %v7564_v20  ;;  %v1631_v54 = vadd.f32 %v1630_v28, %v7202_v25  ;;  %1812 = vmatmul.bf16.gmra.mxu1 %v7411_v42  ;;  %5685 = vmatmul.msk.bf16.gmra.mxu2 %vm1502_vm2, %v7420_v8  ;;  %v7570_v15 = vpack.c.bf16 %v2316_v43, %v2312_v3 }
 0x2a8   : > { %v1720_v22 = vadd.f32 %v1719_v53, %v1631_v54  ;;  %5692 = vmatmul.msk.bf16.gmra.mxu0 %vm1502_vm2, %v7157_v48 }
 0x2a9   : > { %v1862_v7 = vpop.f32.mrf.mxu2 }
 0x2aa   : > { %v1863_v1 = vadd.f32 %v1862_v7, %v1774_v40  ;;  %v2375_v53 = vmax.f32 %v1720_v22, 0.0 }
 0x2ab   : > { %v1775_v28 = vpop.f32.mrf.mxu1 }
 0x2ac   : > { %v1776_v49 = vadd.f32 %v1775_v28, %v7416_v63  ;;  %v2320_v3 = vmax.f32 %v1863_v1, 0.0 }
 0x2ad   : > { %v1632_v29 = vpop.f32.mrf.mxu3  ;;  %v1721_v36 = vpop.f32.mrf.mxu0 }
 0x2ae   : > { %v1633_v47 = vadd.f32 %v1632_v29, %v7202_v25 }
 0x2b0   : > { %v1722_v35 = vadd.f32 %v1721_v36, %v1633_v47  ;;  %v5969_v47 = vld [vmem:[%s9726_s7 + $0x70] sm:$0xff] }
 0x2b1   : > { %v1864_v10 = vpop.f32.mrf.mxu2  ;;  %2806 = vmatpush.bf16.msrb.mxu0 %v5969_v47 }
 0x2b2   : > { %v2379_v54 = vmax.f32 %v1722_v35, 0.0  ;;  %v1865_v6 = vadd.f32 %v1864_v10, %v1776_v49  ;;  %1950 = vmatmul.bf16.gmra.mxu3 %v7172_v61 }
 0x2b3   : > { %v1778_v58 = vpop.f32.mrf.mxu1 }
 0x2b4   : > { %v2324_v43 = vmax.f32 %v1865_v6, 0.0  ;;  %v7581_v40 = vpack.c.bf16 %v2379_v54, %v2375_v53  ;;  %v1779_v22 = vadd.f32 %v1778_v58, %v7416_v63 }
 0x2b5   : > { %v1635_v7 = vpop.f32.mrf.mxu3  ;;  %v1724_v12 = vpop.f32.mrf.mxu0 }
 0x2b6   : > { %9750 = vst [vmem:[#allocation15_spill] sm:$0xff] %v7581_v40  ;;  %v1636_v20 = vadd.f32 %v1635_v7, %v7202_v25  ;;  %2093 = vmatmul.bf16.vlgmr.msra.gmra.mxu1 %v7002_v50  ;;  %5702 = vmatmul.msk.bf16.vlgmr.msra.gmra.mxu2 %vm1502_vm2, %v7007_v60  ;;  %v7587_v28 = vpack.c.bf16 %v2324_v43, %v2320_v3  ;;  %v5977_v50 = vld [vmem:[%s9726_s7 + $0xb0] sm:$0xff]  ;;  %v7604_v43 = vld [vmem:[%s9725_s6] sm:$0xf] }
 0x2b7   : > { %2895 = vmatpush.bf16.msrb.mxu1 %v5977_v50  ;;  %v7607_v7 = vperm.slane %v7604_v43, 2 }
 0x2b8   : > { %v1725_v29 = vadd.f32 %v1724_v12, %v1636_v20  ;;  %5693 = vmatmul.msk.bf16.gmra.mxu0 %vm1502_vm2, %v7176_v5 }
 0x2b9   : > { %v1867_v1 = vpop.f32.mrf.mxu2 }
 0x2ba   : > { %v1868_v36 = vadd.f32 %v1867_v1, %v1779_v22  ;;  %v2383_v6 = vmax.f32 %v1725_v29, 0.0 }
 0x2bb   : > { %v1780_v49 = vpop.f32.mrf.mxu1 }
 0x2bc   : > { %v1781_v20 = vadd.f32 %v1780_v49, %v7416_v63 }
 0x2bd   : > { %v1637_v60 = vpop.f32.mrf.mxu3  ;;  %v1726_v35 = vpop.f32.mrf.mxu0 }
 0x2be   : > { %v1638_v10 = vadd.f32 %v1637_v60, %v7202_v25  ;;  %v2328_v25 = vmax.f32 %v1868_v36, 0.0 }
 0x2c0   : > { %v1727_v53 = vadd.f32 %v1726_v35, %v1638_v10 }
 0x2c1   : > { %v1869_v54 = vpop.f32.mrf.mxu2 }
 0x2c2   : > { %v2387_v58 = vmax.f32 %v1727_v53, 0.0  ;;  %v1870_v3 = vadd.f32 %v1869_v54, %v1781_v20  ;;  %1955 = vmatmul.bf16.gmra.mxu3 %v7197_v21  ;;  %v5957_v20 = vld [vmem:[%s9726_s7 + $0x10] sm:$0xff] }
 0x2c3   : > { %v1783_v12 = vpop.f32.mrf.mxu1  ;;  %2721 = vmatpush.bf16.msra.mxu3 %v5957_v20 }
 0x2c4   : > { %v2332_v22 = vmax.f32 %v1870_v3, 0.0  ;;  %v7609_v1 = vpack.c.bf16 %v2387_v58, %v2383_v6  ;;  %v1784_v60 = vadd.f32 %v1783_v12, %v7416_v63 }
 0x2c5   : > { %v1916_v47 = vpop.f32.mrf.mxu3  ;;  %v2005_v49 = vpop.f32.mrf.mxu0 }
 0x2c6   : > { %9751 = vst [vmem:[#allocation16_spill] sm:$0xff] %v7609_v1  ;;  %v1917_v29 = vadd.f32 %v1916_v47, %v7607_v7  ;;  %2098 = vmatmul.bf16.gmra.mxu1 %v7029_v14  ;;  %5703 = vmatmul.msk.bf16.gmra.mxu2 %vm1502_vm2, %v7034_v24  ;;  %v7615_v50 = vpack.c.bf16 %v2332_v22, %v2328_v25 }
 0x2c8   : > { %v2006_v35 = vadd.f32 %v2005_v49, %v1917_v29  ;;  %5694 = vmatmul.msk.bf16.gmra.mxu0 %vm1502_vm2, %v7204_v31 }
 0x2c9   : > { %v1872_v36 = vpop.f32.mrf.mxu2 }
 0x2ca   : > { %v1873_v10 = vadd.f32 %v1872_v36, %v1784_v60  ;;  %v2265_v12 = vmax.f32 %v2006_v35, 0.0 }
 0x2cb   : > { %v1785_v53 = vpop.f32.mrf.mxu1 }
 0x2cc   : > { %v1786_v6 = vadd.f32 %v1785_v53, %v7416_v63  ;;  %v2336_v49 = vmax.f32 %v1873_v10, 0.0 }
 0x2cd   : > { %v1918_v14 = vpop.f32.mrf.mxu3  ;;  %v2007_v54 = vpop.f32.mrf.mxu0 }
 0x2ce   : > { %v1919_v24 = vadd.f32 %v1918_v14, %v7607_v7 }
 0x2d0   : > { %v2008_v58 = vadd.f32 %v2007_v54, %v1919_v24  ;;  %v5968_v24 = vld [vmem:[%s9726_s7 + $0x68] sm:$0xff] }
 0x2d1   : > { %v1874_v3 = vpop.f32.mrf.mxu2  ;;  %2807 = vmatpush.bf16.msrb.mxu0 %v5968_v24 }
 0x2d2   : > { %v2269_v25 = vmax.f32 %v2008_v58, 0.0  ;;  %v1875_v22 = vadd.f32 %v1874_v3, %v1786_v6  ;;  %1960 = vmatmul.bf16.gmra.mxu3 %v7234_v0 }
 0x2d3   : > { %v1788_v47 = vpop.f32.mrf.mxu1 }
 0x2d4   : > { %v7626_v29 = vpack.c.bf16 %v2269_v25, %v2265_v12  ;;  %v2340_v60 = vmax.f32 %v1875_v22, 0.0  ;;  %v1789_v35 = vadd.f32 %v1788_v47, %v7416_v63 }
 0x2d5   : > { %v1921_v36 = vpop.f32.mrf.mxu3  ;;  %v2010_v20 = vpop.f32.mrf.mxu0 }
 0x2d6   : > { %v1922_v1 = vadd.f32 %v1921_v36, %v7607_v7  ;;  %2103 = vmatmul.bf16.gmra.mxu1 %v7050_v39  ;;  %5704 = vmatmul.msk.bf16.gmra.mxu2 %vm1502_vm2, %v7055_v51  ;;  %v7632_v53 = vpack.c.bf16 %v2340_v60, %v2336_v49  ;;  %v5976_v39 = vld [vmem:[%s9726_s7 + $0xa8] sm:$0xff] }
 0x2d7   : > { %2896 = vmatpush.bf16.msrb.mxu1 %v5976_v39 }
 0x2d8   : > { %v2011_v14 = vadd.f32 %v2010_v20, %v1922_v1  ;;  %5695 = vmatmul.msk.bf16.gmra.mxu0 %vm1502_vm2, %v7240_v18 }
 0x2d9   : > { %v1877_v10 = vpop.f32.mrf.mxu2 }
 0x2da   : > { %v1878_v54 = vadd.f32 %v1877_v10, %v1789_v35  ;;  %v2273_v22 = vmax.f32 %v2011_v14, 0.0 }
 0x2db   : > { %v1790_v6 = vpop.f32.mrf.mxu1 }
 0x2dc   : > { %v1791_v1 = vadd.f32 %v1790_v6, %v7416_v63  ;;  %v2344_v36 = vmax.f32 %v1878_v54, 0.0 }
 0x2dd   : > { %v1923_v51 = vpop.f32.mrf.mxu3  ;;  %v2012_v58 = vpop.f32.mrf.mxu0 }
 0x2de   : > { %v1924_v3 = vadd.f32 %v1923_v51, %v7607_v7 }
 0x2e0   : > { %v2013_v12 = vadd.f32 %v2012_v58, %v1924_v3  ;;  %v5956_v58 = vld [vmem:[%s9726_s7 + $0x8] sm:$0xff] }
 0x2e1   : > { %v1879_v25 = vpop.f32.mrf.mxu2  ;;  %2722 = vmatpush.bf16.msra.mxu3 %v5956_v58 }
 0x2e2   : > { %v2277_v47 = vmax.f32 %v2013_v12, 0.0  ;;  %v1880_v49 = vadd.f32 %v1879_v25, %v1791_v1  ;;  %1965 = vmatmul.bf16.gmra.mxu3 %v7258_v44 }
 0x2e3   : > { %v1793_v60 = vpop.f32.mrf.mxu1 }
 0x2e4   : > { %v2348_v20 = vmax.f32 %v1880_v49, 0.0  ;;  %v7646_v35 = vpack.c.bf16 %v2277_v47, %v2273_v22  ;;  %v1794_v14 = vadd.f32 %v1793_v60, %v7416_v63 }
 0x2e5   : > { %v1926_v10 = vpop.f32.mrf.mxu3  ;;  %v2015_v24 = vpop.f32.mrf.mxu0 }
 0x2e6   : > { %v1927_v40 = vadd.f32 %v1926_v10, %v7607_v7  ;;  %2108 = vmatmul.bf16.gmra.mxu1 %v7071_v2  ;;  %5705 = vmatmul.msk.bf16.gmra.mxu2 %vm1502_vm2, %v7082_v17  ;;  %v7652_v6 = vpack.c.bf16 %v2348_v20, %v2344_v36 }
 0x2e8   : > { %v2016_v39 = vadd.f32 %v2015_v24, %v1927_v40  ;;  %5696 = vmatmul.msk.bf16.gmra.mxu0 %vm1502_vm2, %v7264_v59 }
 0x2e9   : > { %v1882_v54 = vpop.f32.mrf.mxu2 }
 0x2ea   : > { %v1883_v51 = vadd.f32 %v1882_v54, %v1794_v14  ;;  %v2281_v40 = vmax.f32 %v2016_v39, 0.0 }
 0x2eb   : > { %v1795_v3 = vpop.f32.mrf.mxu1 }
 0x2ec   : > { %v1796_v12 = vadd.f32 %v1795_v3, %v7416_v63  ;;  %v2352_v36 = vmax.f32 %v1883_v51, 0.0 }
 0x2ed   : > { %v1928_v2 = vpop.f32.mrf.mxu3  ;;  %v2017_v1 = vpop.f32.mrf.mxu0 }
 0x2ee   : > { %v1929_v17 = vadd.f32 %v1928_v2, %v7607_v7 }
 0x2f0   : > { %v2018_v25 = vadd.f32 %v2017_v1, %v1929_v17  ;;  %v5967_v1 = vld [vmem:[%s9726_s7 + $0x60] sm:$0xff] }
 0x2f1   : > { %v1884_v22 = vpop.f32.mrf.mxu2  ;;  %2808 = vmatpush.bf16.msrb.mxu0 %v5967_v1 }
 0x2f2   : > { %v2285_v47 = vmax.f32 %v2018_v25, 0.0  ;;  %v1885_v49 = vadd.f32 %v1884_v22, %v1796_v12  ;;  %1970 = vmatmul.bf16.gmra.mxu3 %v7282_v27 }
 0x2f3   : > { %v1798_v60 = vpop.f32.mrf.mxu1 }
 0x2f4   : > { %v2356_v20 = vmax.f32 %v1885_v49, 0.0  ;;  %v7663_v10 = vpack.c.bf16 %v2285_v47, %v2281_v40  ;;  %v1799_v39 = vadd.f32 %v1798_v60, %v7416_v63 }
 0x2f5   : > { %v1931_v24 = vpop.f32.mrf.mxu3  ;;  %v2020_v14 = vpop.f32.mrf.mxu0 }
 0x2f6   : > { %v1932_v54 = vadd.f32 %v1931_v24, %v7607_v7  ;;  %2113 = vmatmul.bf16.gmra.mxu1 %v7098_v32  ;;  %5706 = vmatmul.msk.bf16.gmra.mxu2 %vm1502_vm2, %v7103_v45  ;;  %v7669_v58 = vpack.c.bf16 %v2356_v20, %v2352_v36  ;;  %v5975_v32 = vld [vmem:[%s9726_s7 + $0xa0] sm:$0xff] }
 0x2f7   : > { %2897 = vmatpush.bf16.msrb.mxu1 %v5975_v32 }
 0x2f8   : > { %v2021_v3 = vadd.f32 %v2020_v14, %v1932_v54  ;;  %5697 = vmatmul.msk.bf16.gmra.mxu0 %vm1502_vm2, %v7300_v55 }
 0x2f9   : > { %v1887_v51 = vpop.f32.mrf.mxu2 }
 0x2fa   : > { %v1888_v2 = vadd.f32 %v1887_v51, %v1799_v39  ;;  %v2289_v49 = vmax.f32 %v2021_v3, 0.0 }
 0x2fb   : > { %v1800_v17 = vpop.f32.mrf.mxu1 }
 0x2fc   : > { %v1801_v22 = vadd.f32 %v1800_v17, %v7416_v63  ;;  %v2360_v24 = vmax.f32 %v1888_v2, 0.0 }
 0x2fd   : > { %v1933_v45 = vpop.f32.mrf.mxu3  ;;  %v2022_v12 = vpop.f32.mrf.mxu0 }
 0x2fe   : > { %v1934_v25 = vadd.f32 %v1933_v45, %v7607_v7 }
 0x300   : > { %v2023_v40 = vadd.f32 %v2022_v12, %v1934_v25  ;;  %v5955_v12 = vld [vmem:[%s9726_s7] sm:$0xff] }
 0x301   : > { %v1889_v47 = vpop.f32.mrf.mxu2  ;;  %2723 = vmatpush.bf16.msra.mxu3 %v5955_v12 }
 0x302   : > { %v2293_v60 = vmax.f32 %v2023_v40, 0.0  ;;  %v1890_v36 = vadd.f32 %v1889_v47, %v1801_v22  ;;  %1975 = vmatmul.bf16.gmra.mxu3 %v7318_v23 }
 0x303   : > { %v1803_v20 = vpop.f32.mrf.mxu1 }
 0x304   : > { %v2364_v14 = vmax.f32 %v1890_v36, 0.0  ;;  %v7683_v54 = vpack.c.bf16 %v2293_v60, %v2289_v49  ;;  %v1804_v3 = vadd.f32 %v1803_v20, %v7416_v63 }
 0x305   : > { %v1936_v39 = vpop.f32.mrf.mxu3  ;;  %v2025_v51 = vpop.f32.mrf.mxu0 }
 0x306   : > { %v1937_v1 = vadd.f32 %v1936_v39, %v7607_v7  ;;  %2118 = vmatmul.bf16.gmra.mxu1 %v7119_v62  ;;  %5707 = vmatmul.msk.bf16.gmra.mxu2 %vm1502_vm2, %v7124_v9  ;;  %v7689_v17 = vpack.c.bf16 %v2364_v14, %v2360_v24 }
 0x308   : > { %v2026_v32 = vadd.f32 %v2025_v51, %v1937_v1  ;;  %5698 = vmatmul.msk.bf16.gmra.mxu0 %vm1502_vm2, %v7324_v46 }
 0x309   : > { %v1892_v2 = vpop.f32.mrf.mxu2 }
 0x30a   : > { %v1893_v45 = vadd.f32 %v1892_v2, %v1804_v3  ;;  %v2297_v60 = vmax.f32 %v2026_v32, 0.0  ;;  %v5966_v32 = vld [vmem:[%s9726_s7 + $0x58] sm:$0xff] }
 0x30b   : > { %v1805_v25 = vpop.f32.mrf.mxu1  ;;  %2809 = vmatpush.bf16.msrb.mxu0 %v5966_v32  ;;  %v5963_v32 = vld [vmem:[%s9726_s7 + $0x40] sm:$0xff] }
 0x30c   : > { %v1806_v40 = vadd.f32 %v1805_v25, %v7416_v63  ;;  %v2368_v14 = vmax.f32 %v1893_v45, 0.0 }
 0x30d   : > { %v1938_v62 = vpop.f32.mrf.mxu3  ;;  %v2027_v22 = vpop.f32.mrf.mxu0 }
 0x30e   : > { %v1939_v9 = vadd.f32 %v1938_v62, %v7607_v7 }
 0x310   : > { %v2028_v47 = vadd.f32 %v2027_v22, %v1939_v9  ;;  %v5965_v9 = vld [vmem:[%s9726_s7 + $0x50] sm:$0xff] }
 0x311   : > { %v1894_v49 = vpop.f32.mrf.mxu2  ;;  %2810 = vmatpush.bf16.msrb.mxu0 %v5965_v9 }
 0x312   : > { %v2301_v36 = vmax.f32 %v2028_v47, 0.0  ;;  %v1895_v20 = vadd.f32 %v1894_v49, %v1806_v40  ;;  %1980 = vmatmul.bf16.gmra.mxu3 %v7342_v13  ;;  %v5974_v40 = vld [vmem:[%s9726_s7 + $0x98] sm:$0xff] }
 0x313   : > { %v1808_v24 = vpop.f32.mrf.mxu1  ;;  %2898 = vmatpush.bf16.msrb.mxu1 %v5974_v40 }
 0x314   : > { %v2372_v39 = vmax.f32 %v1895_v20, 0.0  ;;  %v7700_v51 = vpack.c.bf16 %v2301_v36, %v2297_v60  ;;  %v1809_v45 = vadd.f32 %v1808_v24, %v7416_v63  ;;  %v5964_v36 = vld [vmem:[%s9726_s7 + $0x48] sm:$0xff] }
 0x315   : > { %v1941_v1 = vpop.f32.mrf.mxu3  ;;  %v2030_v3 = vpop.f32.mrf.mxu0  ;;  %2811 = vmatpush.bf16.msrb.mxu0 %v5964_v36  ;;  %v5988_v36 = vld [vmem:[%s9728_s9 + $0x38] sm:$0xff] }
 0x316   : > { %v1942_v2 = vadd.f32 %v1941_v1, %v7607_v7  ;;  %2123 = vmatmul.bf16.gmra.mxu1 %v7152_v34  ;;  %5708 = vmatmul.msk.bf16.gmra.mxu2 %vm1502_vm2, %v7157_v48  ;;  %v7706_v12 = vpack.c.bf16 %v2372_v39, %v2368_v14  ;;  %v5979_v34 = vld [vmem:[%s9726_s7 + $0xc0] sm:$0xff] }
 0x317   : > { %2990 = vmatpush.bf16.msrb.mxu2 %v5979_v34  ;;  %3188 = vmatpush.bf16.msrb.mxu3 %v5988_v36 }
 0x318   : > { %v2031_v25 = vadd.f32 %v2030_v3, %v1942_v2  ;;  %5699 = vmatmul.msk.bf16.gmra.mxu0 %vm1502_vm2, %v7348_v38 }
 0x319   : > { %v1897_v62 = vpop.f32.mrf.mxu2  ;;  %2812 = vmatpush.bf16.msrb.mxu0 %v5963_v32 }
 0x31a   : > { %v1898_v22 = vadd.f32 %v1897_v62, %v1809_v45  ;;  %v2305_v39 = vmax.f32 %v2031_v25, 0.0 }
 0x31b   : > { %v1810_v48 = vpop.f32.mrf.mxu1 }
 0x31c   : > { %v1811_v20 = vadd.f32 %v1810_v48, %v7416_v63  ;;  %v2376_v45 = vmax.f32 %v1898_v22, 0.0 }
 0x31d   : > { %v1943_v47 = vpop.f32.mrf.mxu3  ;;  %v2032_v49 = vpop.f32.mrf.mxu0 }
 0x31e   : > { %v1944_v60 = vadd.f32 %v1943_v47, %v7607_v7 }
 0x320   : > { %v2033_v24 = vadd.f32 %v2032_v49, %v1944_v60 }
 0x321   : > { %v1899_v14 = vpop.f32.mrf.mxu2 }
 0x322   : > { %v2309_v1 = vmax.f32 %v2033_v24, 0.0  ;;  %v1900_v3 = vadd.f32 %v1899_v14, %v1811_v20  ;;  %1985 = vmatmul.bf16.gmra.mxu3 %v7384_v30 }
 0x323   : > { %v1813_v2 = vpop.f32.mrf.mxu1 }
 0x324   : > { %v2380_v62 = vmax.f32 %v1900_v3, 0.0  ;;  %v7732_v34 = vpack.c.bf16 %v2309_v1, %v2305_v39  ;;  %v1814_v47 = vadd.f32 %v1813_v2, %v7416_v63 }
 0x325   : > { %v1946_v9 = vpop.f32.mrf.mxu3  ;;  %v2035_v40 = vpop.f32.mrf.mxu0 }
 0x326   : > { %v1947_v48 = vadd.f32 %v1946_v9, %v7607_v7  ;;  %2128 = vmatmul.bf16.gmra.mxu1 %v7172_v61  ;;  %5709 = vmatmul.msk.bf16.gmra.mxu2 %vm1502_vm2, %v7176_v5  ;;  %v7738_v25 = vpack.c.bf16 %v2380_v62, %v2376_v45 }
 0x328   : > { %v2036_v49 = vadd.f32 %v2035_v40, %v1947_v48  ;;  %5700 = vmatmul.msk.bf16.gmra.mxu0 %vm1502_vm2, %v7396_v4  ;;  %v7750_v40 = vperm.slane %v7604_v43, 3 }
 0x329   : > { %v1902_v22 = vpop.f32.mrf.mxu2 }
 0x32a   : > { %v1903_v60 = vadd.f32 %v1902_v22, %v1814_v47  ;;  %v2313_v3 = vmax.f32 %v2036_v49, 0.0 }
 0x32b   : > { %v1815_v20 = vpop.f32.mrf.mxu1 }
 0x32c   : > { %v1816_v14 = vadd.f32 %v1815_v20, %v7416_v63  ;;  %v2384_v62 = vmax.f32 %v1903_v60, 0.0 }
 0x32d   : > { %v1948_v61 = vpop.f32.mrf.mxu3  ;;  %v2037_v24 = vpop.f32.mrf.mxu0 }
 0x32e   : > { %v1949_v5 = vadd.f32 %v1948_v61, %v7607_v7 }
 0x330   : > { %v2038_v39 = vadd.f32 %v2037_v24, %v1949_v5  ;;  %v5973_v24 = vld [vmem:[%s9726_s7 + $0x90] sm:$0xff] }
 0x331   : > { %v1904_v1 = vpop.f32.mrf.mxu2  ;;  %2899 = vmatpush.bf16.msrb.mxu1 %v5973_v24  ;;  %v5987_v24 = vld [vmem:[%s9728_s9 + $0x30] sm:$0xff] }
 0x332   : > { %v2317_v2 = vmax.f32 %v2038_v39, 0.0  ;;  %v1905_v32 = vadd.f32 %v1904_v1, %v1816_v14  ;;  %1990 = vmatmul.bf16.gmra.mxu3 %v7411_v42 }
 0x333   : > { %v2094_v45 = vpop.f32.mrf.mxu1  ;;  %3189 = vmatpush.bf16.msrb.mxu3 %v5987_v24  ;;  %v5972_v24 = vld [vmem:[%s9726_s7 + $0x88] sm:$0xff] }
 0x334   : > { %v2388_v9 = vmax.f32 %v1905_v32, 0.0  ;;  %v7752_v48 = vpack.c.bf16 %v2317_v2, %v2313_v3  ;;  %v2095_v49 = vadd.f32 %v2094_v45, %v7750_v40 }
 0x335   : > { %v1951_v47 = vpop.f32.mrf.mxu3  ;;  %v2040_v22 = vpop.f32.mrf.mxu0  ;;  %2900 = vmatpush.bf16.msrb.mxu1 %v5972_v24 }
 0x336   : > { %v1952_v36 = vadd.f32 %v1951_v47, %v7607_v7  ;;  %2133 = vmatmul.bf16.gmra.mxu1 %v7197_v21  ;;  %5710 = vmatmul.msk.bf16.gmra.mxu2 %vm1502_vm2, %v7204_v31  ;;  %v7758_v63 = vpack.c.bf16 %v2388_v9, %v2384_v62 }
 0x338   : > { %v2041_v60 = vadd.f32 %v2040_v22, %v1952_v36  ;;  %5701 = vmatmul.msk.bf16.gmra.mxu0 %vm1502_vm2, %v7420_v8 }
 0x339   : > { %v2183_v43 = vpop.f32.mrf.mxu2 }
 0x33a   : > { %v2184_v20 = vadd.f32 %v2183_v43, %v2095_v49  ;;  %v2321_v3 = vmax.f32 %v2041_v60, 0.0 }
 0x33b   : > { %v2096_v61 = vpop.f32.mrf.mxu1 }
 0x33c   : > { %v2097_v31 = vadd.f32 %v2096_v61, %v7750_v40  ;;  %v2266_v62 = vmax.f32 %v2184_v20, 0.0 }
 0x33d   : > { %v1953_v5 = vpop.f32.mrf.mxu3  ;;  %v2042_v21 = vpop.f32.mrf.mxu0 }
 0x33e   : > { %v1954_v14 = vadd.f32 %v1953_v5, %v7607_v7 }
 0x340   : > { %v2043_v39 = vadd.f32 %v2042_v21, %v1954_v14 }
 0x341   : > { %v2185_v1 = vpop.f32.mrf.mxu2 }
 0x342   : > { %v2325_v2 = vmax.f32 %v2043_v39, 0.0  ;;  %v2186_v32 = vadd.f32 %v2185_v1, %v2097_v31  ;;  %2724 = vmatmul.bf16.vlgmr.msra.gmra.mxu3 %v7238_v11 }
 0x343   : > { %v2099_v45 = vpop.f32.mrf.mxu1 }
 0x344   : > { %v2270_v9 = vmax.f32 %v2186_v32, 0.0  ;;  %v7769_v47 = vpack.c.bf16 %v2325_v2, %v2321_v3  ;;  %v2100_v60 = vadd.f32 %v2099_v45, %v7750_v40 }
 0x345   : > { %v1956_v22 = vpop.f32.mrf.mxu3  ;;  %v2045_v36 = vpop.f32.mrf.mxu0 }
 0x346   : > { %v7771_v49 = vpack.c.bf16 %v2270_v9, %v2266_v62  ;;  %v1957_v43 = vadd.f32 %v1956_v22, %v7607_v7  ;;  %2138 = vmatmul.bf16.gmra.mxu1 %v7234_v0  ;;  %5711 = vmatmul.msk.bf16.gmra.mxu2 %vm1502_vm2, %v7240_v18 }
 0x348   : > { %v2046_v61 = vadd.f32 %v2045_v36, %v1957_v43  ;;  %2813 = vmatmul.bf16.vlgmr.msrb.gmra.mxu0 %v7446_v16 }
 0x349   : > { %v2188_v11 = vpop.f32.mrf.mxu2 }
 0x34a   : > { %v2189_v20 = vadd.f32 %v2188_v11, %v2100_v60  ;;  %v2329_v1 = vmax.f32 %v2046_v61, 0.0 }
 0x34b   : > { %v2101_v5 = vpop.f32.mrf.mxu1 }
 0x34c   : > { %v2102_v31 = vadd.f32 %v2101_v5, %v7750_v40  ;;  %v2274_v32 = vmax.f32 %v2189_v20, 0.0 }
 0x34d   : > { %v1958_v21 = vpop.f32.mrf.mxu3  ;;  %v2047_v14 = vpop.f32.mrf.mxu0 }
 0x34e   : > { %v1959_v0 = vadd.f32 %v1958_v21, %v7607_v7 }
 0x350   : > { %v2048_v18 = vadd.f32 %v2047_v14, %v1959_v0 }
 0x351   : > { %v2190_v39 = vpop.f32.mrf.mxu2 }
 0x352   : > { %v2333_v3 = vmax.f32 %v2048_v18, 0.0  ;;  %v2191_v2 = vadd.f32 %v2190_v39, %v2102_v31  ;;  %2729 = vmatmul.bf16.gmra.mxu3 %v7262_v56 }
 0x353   : > { %v2104_v16 = vpop.f32.mrf.mxu1 }
 0x354   : > { %v2278_v45 = vmax.f32 %v2191_v2, 0.0  ;;  %v7785_v62 = vpack.c.bf16 %v2333_v3, %v2329_v1  ;;  %v2105_v60 = vadd.f32 %v2104_v16, %v7750_v40 }
 0x355   : > { %v1961_v9 = vpop.f32.mrf.mxu3  ;;  %v2050_v22 = vpop.f32.mrf.mxu0 }
 0x356   : > { %v7787_v36 = vpack.c.bf16 %v2278_v45, %v2274_v32  ;;  %v1962_v43 = vadd.f32 %v1961_v9, %v7607_v7  ;;  %2143 = vmatmul.bf16.gmra.mxu1 %v7258_v44  ;;  %5712 = vmatmul.msk.bf16.gmra.mxu2 %vm1502_vm2, %v7264_v59 }
 0x358   : > { %v2051_v61 = vadd.f32 %v2050_v22, %v1962_v43  ;;  %2818 = vmatmul.bf16.gmra.mxu0 %v7467_v26 }
 0x359   : > { %v2193_v56 = vpop.f32.mrf.mxu2 }
 0x35a   : > { %v2194_v11 = vadd.f32 %v2193_v56, %v2105_v60  ;;  %v2337_v31 = vmax.f32 %v2051_v61, 0.0  ;;  %v5986_v61 = vld [vmem:[%s9728_s9 + $0x28] sm:$0xff] }
 0x35b   : > { %v2106_v20 = vpop.f32.mrf.mxu1  ;;  %3190 = vmatpush.bf16.msrb.mxu3 %v5986_v61 }
 0x35c   : > { %v2107_v44 = vadd.f32 %v2106_v20, %v7750_v40  ;;  %v2282_v1 = vmax.f32 %v2194_v11, 0.0 }
 0x35d   : > { %v1963_v5 = vpop.f32.mrf.mxu3  ;;  %v2052_v21 = vpop.f32.mrf.mxu0 }
 0x35e   : > { %v1964_v14 = vadd.f32 %v1963_v5, %v7607_v7 }
 0x360   : > { %v2053_v59 = vadd.f32 %v2052_v21, %v1964_v14 }
 0x361   : > { %v2195_v0 = vpop.f32.mrf.mxu2 }
 0x362   : > { %v2341_v18 = vmax.f32 %v2053_v59, 0.0  ;;  %v2196_v39 = vadd.f32 %v2195_v0, %v2107_v44  ;;  %2734 = vmatmul.bf16.gmra.mxu3 %v7298_v52 }
 0x363   : > { %v2109_v26 = vpop.f32.mrf.mxu1 }
 0x364   : > { %v2286_v3 = vmax.f32 %v2196_v39, 0.0  ;;  %v7801_v2 = vpack.c.bf16 %v2341_v18, %v2337_v31  ;;  %v2110_v22 = vadd.f32 %v2109_v26, %v7750_v40 }
 0x365   : > { %v1966_v16 = vpop.f32.mrf.mxu3  ;;  %v2055_v32 = vpop.f32.mrf.mxu0 }
 0x366   : > { %v7803_v45 = vpack.c.bf16 %v2286_v3, %v2282_v1  ;;  %v1967_v9 = vadd.f32 %v1966_v16, %v7607_v7  ;;  %2148 = vmatmul.bf16.gmra.mxu1 %v7282_v27  ;;  %5713 = vmatmul.msk.bf16.gmra.mxu2 %vm1502_vm2, %v7300_v55 }
 0x368   : > { %v2056_v43 = vadd.f32 %v2055_v32, %v1967_v9  ;;  %2823 = vmatmul.bf16.gmra.mxu0 %v7487_v37 }
 0x369   : > { %v2198_v52 = vpop.f32.mrf.mxu2 }
 0x36a   : > { %v2199_v60 = vadd.f32 %v2198_v52, %v2110_v22  ;;  %v2345_v21 = vmax.f32 %v2056_v43, 0.0  ;;  %v5971_v22 = vld [vmem:[%s9726_s7 + $0x80] sm:$0xff] }
 0x36b   : > { %v2111_v56 = vpop.f32.mrf.mxu1  ;;  %2901 = vmatpush.bf16.msrb.mxu1 %v5971_v22 }
 0x36c   : > { %v2112_v24 = vadd.f32 %v2111_v56, %v7750_v40  ;;  %v2290_v59 = vmax.f32 %v2199_v60, 0.0 }
 0x36d   : > { %v1968_v11 = vpop.f32.mrf.mxu3  ;;  %v2057_v20 = vpop.f32.mrf.mxu0 }
 0x36e   : > { %v1969_v27 = vadd.f32 %v1968_v11, %v7607_v7 }
 0x370   : > { %v2058_v55 = vadd.f32 %v2057_v20, %v1969_v27 }
 0x371   : > { %v2200_v5 = vpop.f32.mrf.mxu2 }
 0x372   : > { %v2349_v14 = vmax.f32 %v2058_v55, 0.0  ;;  %v2201_v44 = vadd.f32 %v2200_v5, %v2112_v24  ;;  %2739 = vmatmul.bf16.gmra.mxu3 %v7322_v41 }
 0x373   : > { %v2114_v37 = vpop.f32.mrf.mxu1 }
 0x374   : > { %v2294_v0 = vmax.f32 %v2201_v44, 0.0  ;;  %v7817_v31 = vpack.c.bf16 %v2349_v14, %v2345_v21  ;;  %v2115_v3 = vadd.f32 %v2114_v37, %v7750_v40 }
 0x375   : > { %v1971_v18 = vpop.f32.mrf.mxu3  ;;  %v2060_v39 = vpop.f32.mrf.mxu0 }
 0x376   : > { %v7819_v26 = vpack.c.bf16 %v2294_v0, %v2290_v59  ;;  %v1972_v1 = vadd.f32 %v1971_v18, %v7607_v7  ;;  %2153 = vmatmul.bf16.gmra.mxu1 %v7318_v23  ;;  %5714 = vmatmul.msk.bf16.gmra.mxu2 %vm1502_vm2, %v7324_v46  ;;  %v5985_v18 = vld [vmem:[%s9728_s9 + $0x20] sm:$0xff] }
 0x377   : > { %3191 = vmatpush.bf16.msrb.mxu3 %v5985_v18 }
 0x378   : > { %v2061_v16 = vadd.f32 %v2060_v39, %v1972_v1  ;;  %2828 = vmatmul.bf16.gmra.mxu0 %v7510_v19 }
 0x379   : > { %v2203_v41 = vpop.f32.mrf.mxu2 }
 0x37a   : > { %v2204_v32 = vadd.f32 %v2203_v41, %v2115_v3  ;;  %v2353_v56 = vmax.f32 %v2061_v16, 0.0 }
 0x37b   : > { %v2116_v9 = vpop.f32.mrf.mxu1 }
 0x37c   : > { %v2117_v23 = vadd.f32 %v2116_v9, %v7750_v40  ;;  %v2298_v27 = vmax.f32 %v2204_v32, 0.0 }
 0x37d   : > { %v1973_v43 = vpop.f32.mrf.mxu3  ;;  %v2062_v52 = vpop.f32.mrf.mxu0 }
 0x37e   : > { %v1974_v60 = vadd.f32 %v1973_v43, %v7607_v7 }
 0x380   : > { %v2063_v46 = vadd.f32 %v2062_v52, %v1974_v60 }
 0x381   : > { %v2205_v61 = vpop.f32.mrf.mxu2 }
 0x382   : > { %v2357_v11 = vmax.f32 %v2063_v46, 0.0  ;;  %v2206_v20 = vadd.f32 %v2205_v61, %v2117_v23  ;;  %2744 = vmatmul.bf16.gmra.mxu3 %v7346_v33 }
 0x383   : > { %v2119_v19 = vpop.f32.mrf.mxu1 }
 0x384   : > { %v2302_v24 = vmax.f32 %v2206_v20, 0.0  ;;  %v7833_v55 = vpack.c.bf16 %v2357_v11, %v2353_v56  ;;  %v2120_v37 = vadd.f32 %v2119_v19, %v7750_v40 }
 0x385   : > { %v1976_v5 = vpop.f32.mrf.mxu3  ;;  %v2065_v21 = vpop.f32.mrf.mxu0 }
 0x386   : > { %v7835_v14 = vpack.c.bf16 %v2302_v24, %v2298_v27  ;;  %v1977_v44 = vadd.f32 %v1976_v5, %v7607_v7  ;;  %2158 = vmatmul.bf16.gmra.mxu1 %v7342_v13  ;;  %5715 = vmatmul.msk.bf16.gmra.mxu2 %vm1502_vm2, %v7348_v38  ;;  %v9753_v27 = vld [vmem:[#allocation13_spill] sm:$0xff] }
 0x388   : > { %v2066_v59 = vadd.f32 %v2065_v21, %v1977_v44  ;;  %2833 = vmatmul.bf16.gmra.mxu0 %v7530_v57  ;;  %v9752_v57 = vld [vmem:[#allocation5_spill] sm:$0xff] }
 0x389   : > { %v2208_v33 = vpop.f32.mrf.mxu2 }
 0x38a   : > { %v2209_v0 = vadd.f32 %v2208_v33, %v2120_v37  ;;  %v2361_v32 = vmax.f32 %v2066_v59, 0.0 }
 0x38b   : > { %v2121_v39 = vpop.f32.mrf.mxu1 }
 0x38c   : > { %v2122_v16 = vadd.f32 %v2121_v39, %v7750_v40  ;;  %v2306_v52 = vmax.f32 %v2209_v0, 0.0 }
 0x38d   : > { %v1978_v1 = vpop.f32.mrf.mxu3  ;;  %v2067_v3 = vpop.f32.mrf.mxu0 }
 0x38e   : > { %v1979_v13 = vadd.f32 %v1978_v1, %v7607_v7 }
 0x390   : > { %v2068_v38 = vadd.f32 %v2067_v3, %v1979_v13 }
 0x391   : > { %v2210_v41 = vpop.f32.mrf.mxu2 }
 0x392   : > { %v2365_v9 = vmax.f32 %v2068_v38, 0.0  ;;  %v2211_v22 = vadd.f32 %v2210_v41, %v2122_v16  ;;  %2749 = vmatmul.bf16.gmra.mxu3 %v9752_v57 }
 0x393   : > { %v2124_v43 = vpop.f32.mrf.mxu1 }
 0x394   : > { %v2310_v60 = vmax.f32 %v2211_v22, 0.0  ;;  %v7849_v23 = vpack.c.bf16 %v2365_v9, %v2361_v32  ;;  %v2125_v20 = vadd.f32 %v2124_v43, %v7750_v40 }
 0x395   : > { %v1981_v46 = vpop.f32.mrf.mxu3  ;;  %v2070_v61 = vpop.f32.mrf.mxu0 }
 0x396   : > { %v7851_v56 = vpack.c.bf16 %v2310_v60, %v2306_v52  ;;  %v1982_v11 = vadd.f32 %v1981_v46, %v7607_v7  ;;  %2163 = vmatmul.bf16.gmra.mxu1 %v7384_v30  ;;  %5716 = vmatmul.msk.bf16.gmra.mxu2 %vm1502_vm2, %v7396_v4  ;;  %v9754_v4 = vld [vmem:[#allocation6_spill] sm:$0xff]  ;;  %v5984_v52 = vld [vmem:[%s9728_s9 + $0x18] sm:$0xff] }
 0x397   : > { %3192 = vmatpush.bf16.msrb.mxu3 %v5984_v52 }
 0x398   : > { %v2071_v19 = vadd.f32 %v2070_v61, %v1982_v11  ;;  %2838 = vmatmul.bf16.gmra.mxu0 %v9753_v27 }
 0x399   : > { %v2213_v24 = vpop.f32.mrf.mxu2 }
 0x39a   : > { %v2214_v5 = vadd.f32 %v2213_v24, %v2125_v20  ;;  %v2369_v30 = vmax.f32 %v2071_v19, 0.0 }
 0x39b   : > { %v2126_v21 = vpop.f32.mrf.mxu1 }
 0x39c   : > { %v2127_v33 = vadd.f32 %v2126_v21, %v7750_v40  ;;  %v2314_v13 = vmax.f32 %v2214_v5, 0.0 }
 0x39d   : > { %v1983_v44 = vpop.f32.mrf.mxu3  ;;  %v2072_v37 = vpop.f32.mrf.mxu0 }
 0x39e   : > { %v1984_v59 = vadd.f32 %v1983_v44, %v7607_v7 }
 0x3a0   : > { %v2073_v0 = vadd.f32 %v2072_v37, %v1984_v59 }
 0x3a1   : > { %v2215_v18 = vpop.f32.mrf.mxu2 }
 0x3a2   : > { %v2373_v39 = vmax.f32 %v2073_v0, 0.0  ;;  %v2216_v1 = vadd.f32 %v2215_v18, %v2127_v33  ;;  %2754 = vmatmul.bf16.gmra.mxu3 %v9754_v4 }
 0x3a3   : > { %v2129_v3 = vpop.f32.mrf.mxu1 }
 0x3a4   : > { %v2318_v16 = vmax.f32 %v2216_v1, 0.0  ;;  %v7862_v38 = vpack.c.bf16 %v2373_v39, %v2369_v30  ;;  %v2130_v57 = vadd.f32 %v2129_v3, %v7750_v40 }
 0x3a5   : > { %v1986_v41 = vpop.f32.mrf.mxu3  ;;  %v2075_v32 = vpop.f32.mrf.mxu0 }
 0x3a6   : > { %v7864_v9 = vpack.c.bf16 %v2318_v16, %v2314_v13  ;;  %v1987_v22 = vadd.f32 %v1986_v41, %v7607_v7  ;;  %2168 = vmatmul.bf16.gmra.mxu1 %v7411_v42  ;;  %5717 = vmatmul.msk.bf16.gmra.mxu2 %vm1502_vm2, %v7420_v8 }
 0x3a8   : > { %v2076_v43 = vadd.f32 %v2075_v32, %v1987_v22  ;;  %2843 = vmatmul.bf16.gmra.mxu0 %v7570_v15  ;;  %v9755_v15 = vld [vmem:[#allocation7_spill] sm:$0xff] }
 0x3a9   : > { %v2218_v60 = vpop.f32.mrf.mxu2 }
 0x3aa   : > { %v2219_v46 = vadd.f32 %v2218_v60, %v2130_v57  ;;  %v2377_v24 = vmax.f32 %v2076_v43, 0.0 }
 0x3ab   : > { %v2131_v61 = vpop.f32.mrf.mxu1 }
 0x3ac   : > { %v2132_v19 = vadd.f32 %v2131_v61, %v7750_v40  ;;  %v2322_v37 = vmax.f32 %v2219_v46, 0.0 }
 0x3ad   : > { %v1988_v11 = vpop.f32.mrf.mxu3  ;;  %v2077_v20 = vpop.f32.mrf.mxu0 }
 0x3ae   : > { %v1989_v42 = vadd.f32 %v1988_v11, %v7607_v7 }
 0x3b0   : > { %v2078_v8 = vadd.f32 %v2077_v20, %v1989_v42 }
 0x3b1   : > { %v2220_v27 = vpop.f32.mrf.mxu2 }
 0x3b2   : > { %v2381_v5 = vmax.f32 %v2078_v8, 0.0  ;;  %v2221_v21 = vadd.f32 %v2220_v27, %v2132_v19  ;;  %2759 = vmatmul.bf16.gmra.mxu3 %v9755_v15  ;;  %v5983_v8 = vld [vmem:[%s9728_s9 + $0x10] sm:$0xff] }
 0x3b3   : > { %v2134_v44 = vpop.f32.mrf.mxu1  ;;  %3193 = vmatpush.bf16.msrb.mxu3 %v5983_v8 }
 0x3b4   : > { %v2326_v59 = vmax.f32 %v2221_v21, 0.0  ;;  %v7878_v33 = vpack.c.bf16 %v2381_v5, %v2377_v24  ;;  %v2135_v1 = vadd.f32 %v2134_v44, %v7750_v40 }
 0x3b5   : > { %v1991_v0 = vpop.f32.mrf.mxu3  ;;  %v2080_v18 = vpop.f32.mrf.mxu0 }
 0x3b6   : > { %v7880_v30 = vpack.c.bf16 %v2326_v59, %v2322_v37  ;;  %v1992_v39 = vadd.f32 %v1991_v0, %v7607_v7  ;;  %2902 = vmatmul.bf16.vlgmr.msrb.gmra.mxu1 %v7626_v29  ;;  %5822 = vmatmul.msk.bf16.vlgmr.msrb.gmra.mxu2 %vm2667_vm3, %v7771_v49  ;;  %v9756_v49 = vld [vmem:[#allocation8_spill] sm:$0xff]  ;;  %v9757_v37 = vld [vmem:[#allocation9_spill] sm:$0xff] }
 0x3b8   : > { %v2081_v4 = vadd.f32 %v2080_v18, %v1992_v39  ;;  %2848 = vmatmul.bf16.gmra.mxu0 %v7587_v28 }
 0x3b9   : > { %v2223_v3 = vpop.f32.mrf.mxu2 }
 0x3ba   : > { %v2224_v13 = vadd.f32 %v2223_v3, %v2135_v1  ;;  %v2385_v29 = vmax.f32 %v2081_v4, 0.0 }
 0x3bb   : > { %v2136_v16 = vpop.f32.mrf.mxu1 }
 0x3bc   : > { %v2137_v57 = vadd.f32 %v2136_v16, %v7750_v40  ;;  %v2330_v11 = vmax.f32 %v2224_v13, 0.0 }
 0x3bd   : > { %v1993_v41 = vpop.f32.mrf.mxu3  ;;  %v2082_v22 = vpop.f32.mrf.mxu0 }
 0x3be   : > { %v1994_v32 = vadd.f32 %v1993_v41, %v7607_v7 }
 0x3c0   : > { %v2083_v43 = vadd.f32 %v2082_v22, %v1994_v32  ;;  %v9758_v22 = vld [vmem:[#allocation10_spill] sm:$0xff] }
 0x3c1   : > { %v2225_v52 = vpop.f32.mrf.mxu2 }
 0x3c2   : > { %v2389_v60 = vmax.f32 %v2083_v43, 0.0  ;;  %v2226_v46 = vadd.f32 %v2225_v52, %v2137_v57  ;;  %2764 = vmatmul.bf16.gmra.mxu3 %v9756_v49 }
 0x3c3   : > { %v2139_v61 = vpop.f32.mrf.mxu1 }
 0x3c4   : > { %v2334_v20 = vmax.f32 %v2226_v46, 0.0  ;;  %v7891_v28 = vpack.c.bf16 %v2389_v60, %v2385_v29  ;;  %v2140_v7 = vadd.f32 %v2139_v61, %v7750_v40  ;;  %v5982_v29 = vld [vmem:[%s9728_s9 + $0x8] sm:$0xff] }
 0x3c5   : > { %v7893_v42 = vpop.f32.mrf.mxu3  ;;  %3194 = vmatpush.bf16.msrb.mxu3 %v5982_v29 }
 0x3c6   : > { %v7895_v19 = vpack.c.bf16 %v2334_v20, %v2330_v11  ;;  %2907 = vmatmul.bf16.gmra.mxu1 %v7646_v35  ;;  %5823 = vmatmul.msk.bf16.gmra.mxu2 %vm2667_vm3, %v7787_v36  ;;  %v7937_v20 = vpop.f32.mrf.mxu0 }
 0x3c8   : > { %2853 = vmatmul.bf16.gmra.mxu0 %v7615_v50 }
 0x3c9   : > { %v2228_v27 = vpop.f32.mrf.mxu2 }
 0x3ca   : > { %v2229_v24 = vadd.f32 %v2228_v27, %v2140_v7  ;;  %v9759_v7 = vld [vmem:[#allocation11_spill] sm:$0xff] }
 0x3cb   : > { %v2141_v5 = vpop.f32.mrf.mxu1 }
 0x3cc   : > { %v2142_v15 = vadd.f32 %v2141_v5, %v7750_v40  ;;  %v2338_v59 = vmax.f32 %v2229_v24, 0.0 }
 0x3cd   : > { %v7905_v21 = vpop.f32.mrf.mxu3 }
 0x3d1   : > { %v2230_v35 = vpop.f32.mrf.mxu2 }
 0x3d2   : > { %v2231_v44 = vadd.f32 %v2230_v35, %v2142_v15  ;;  %2769 = vmatmul.bf16.gmra.mxu3 %v9757_v37 }
 0x3d3   : > { %v2144_v36 = vpop.f32.mrf.mxu1 }
 0x3d4   : > { %v2342_v0 = vmax.f32 %v2231_v44, 0.0  ;;  %v2145_v39 = vadd.f32 %v2144_v36, %v7750_v40  ;;  %v7949_v36 = vpop.f32.mrf.mxu0 }
 0x3d5   : > { %v7909_v50 = vpop.f32.mrf.mxu3 }
 0x3d6   : > { %v7911_v18 = vpack.c.bf16 %v2342_v0, %v2338_v59  ;;  %2912 = vmatmul.bf16.gmra.mxu1 %v7663_v10  ;;  %5824 = vmatmul.msk.bf16.gmra.mxu2 %vm2667_vm3, %v7803_v45 }
 0x3d8   : > { %2858 = vmatmul.bf16.gmra.mxu0 %v7632_v53 }
 0x3d9   : > { %v2233_v1 = vpop.f32.mrf.mxu2 }
 0x3da   : > { %v2234_v4 = vadd.f32 %v2233_v1, %v2145_v39 }
 0x3db   : > { %v2146_v3 = vpop.f32.mrf.mxu1 }
 0x3dc   : > { %v2147_v16 = vadd.f32 %v2146_v3, %v7750_v40  ;;  %v2346_v10 = vmax.f32 %v2234_v4, 0.0  ;;  %v9760_v4 = vld [vmem:[#allocation12_spill] sm:$0xff] }
 0x3dd   : > { %v7918_v13 = vpop.f32.mrf.mxu3 }
 0x3e1   : > { %v2235_v41 = vpop.f32.mrf.mxu2 }
 0x3e2   : > { %v2236_v32 = vadd.f32 %v2235_v41, %v2147_v16  ;;  %2774 = vmatmul.bf16.gmra.mxu3 %v9758_v22  ;;  %v7957_v41 = vpop.f32.mrf.mxu0  ;;  %v5981_v22 = vld [vmem:[%s9728_s9] sm:$0xff] }
 0x3e3   : > { %v2149_v57 = vpop.f32.mrf.mxu1  ;;  %3195 = vmatpush.bf16.msrb.mxu3 %v5981_v22 }
 0x3e4   : > { %v2350_v43 = vmax.f32 %v2236_v32, 0.0  ;;  %v2150_v53 = vadd.f32 %v2149_v57, %v7750_v40 }
 0x3e5   : > { %v7922_v52 = vpop.f32.mrf.mxu3 }
 0x3e6   : > { %v7924_v45 = vpack.c.bf16 %v2350_v43, %v2346_v10  ;;  %2917 = vmatmul.bf16.gmra.mxu1 %v7683_v54  ;;  %5825 = vmatmul.msk.bf16.gmra.mxu2 %vm2667_vm3, %v7819_v26 }
 0x3e8   : > { %2863 = vmatmul.bf16.gmra.mxu0 %v7652_v6 }
 0x3e9   : > { %v2238_v60 = vpop.f32.mrf.mxu2 }
 0x3ea   : > { %v2239_v46 = vadd.f32 %v2238_v60, %v2150_v53  ;;  %v7971_v29 = vpop.f32.mrf.mxu0 }
 0x3eb   : > { %v2151_v49 = vpop.f32.mrf.mxu1 }
 0x3ec   : > { %v2152_v11 = vadd.f32 %v2151_v49, %v7750_v40  ;;  %v2354_v6 = vmax.f32 %v2239_v46, 0.0  ;;  %v9761_v46 = vld [vmem:[#allocation14_spill] sm:$0xff] }
 0x3ed   : > { %v7934_v61 = vpop.f32.mrf.mxu3 }
 0x3f1   : > { %v2240_v54 = vpop.f32.mrf.mxu2 }
 0x3f2   : > { %v2241_v26 = vadd.f32 %v2240_v54, %v2152_v11  ;;  %2779 = vmatmul.bf16.gmra.mxu3 %v9759_v7 }
 0x3f3   : > { %v2154_v8 = vpop.f32.mrf.mxu1 }
 0x3f4   : > { %v2358_v27 = vmax.f32 %v2241_v26, 0.0  ;;  %v2155_v15 = vadd.f32 %v2154_v8, %v7750_v40 }
 0x3f5   : > { %v7940_v24 = vpop.f32.mrf.mxu3 }
 0x3f6   : > { %v7942_v5 = vpack.c.bf16 %v2358_v27, %v2354_v6  ;;  %2922 = vmatmul.bf16.gmra.mxu1 %v7700_v51  ;;  %5826 = vmatmul.msk.bf16.gmra.mxu2 %vm2667_vm3, %v7835_v14  ;;  %v7984_v6 = vpop.f32.mrf.mxu0 }
 0x3f8   : > { %2868 = vmatmul.bf16.gmra.mxu0 %v7669_v58 }
 0x3f9   : > { %v2243_v35 = vpop.f32.mrf.mxu2 }
 0x3fa   : > { %v2244_v44 = vadd.f32 %v2243_v35, %v2155_v15 }
 0x3fb   : > { %v2156_v37 = vpop.f32.mrf.mxu1 }
 0x3fc   : > { %v2157_v0 = vadd.f32 %v2156_v37, %v7750_v40  ;;  %v2362_v3 = vmax.f32 %v2244_v44, 0.0 }
 0x3fd   : > { %v7951_v59 = vpop.f32.mrf.mxu3 }
 0x401   : > { %v2245_v39 = vpop.f32.mrf.mxu2 }
 0x402   : > { %v2246_v1 = vadd.f32 %v2245_v39, %v2157_v0  ;;  %2784 = vmatmul.bf16.gmra.mxu3 %v9760_v4  ;;  %v9762_v39 = vld [vmem:[#allocation15_spill] sm:$0xff] }
 0x403   : > { %v2159_v51 = vpop.f32.mrf.mxu1 }
 0x404   : > { %v2366_v14 = vmax.f32 %v2246_v1, 0.0  ;;  %v2160_v32 = vadd.f32 %v2159_v51, %v7750_v40  ;;  %v7990_v1 = vpop.f32.mrf.mxu0 }
 0x405   : > { %v7955_v16 = vpop.f32.mrf.mxu3 }
 0x406   : > { %v7959_v58 = vpack.c.bf16 %v2366_v14, %v2362_v3  ;;  %2927 = vmatmul.bf16.gmra.mxu1 %v7732_v34  ;;  %5827 = vmatmul.msk.bf16.gmra.mxu2 %vm2667_vm3, %v7851_v56 }
 0x408   : > { %2873 = vmatmul.bf16.gmra.mxu0 %v7689_v17 }
 0x409   : > { %v2248_v57 = vpop.f32.mrf.mxu2 }
 0x40a   : > { %v2249_v10 = vadd.f32 %v2248_v57, %v2160_v32 }
 0x40b   : > { %v2161_v43 = vpop.f32.mrf.mxu1 }
 0x40c   : > { %v2162_v34 = vadd.f32 %v2161_v43, %v7750_v40  ;;  %v2370_v17 = vmax.f32 %v2249_v10, 0.0  ;;  %v8003_v10 = vpop.f32.mrf.mxu0 }
 0x40d   : > { %v7969_v53 = vpop.f32.mrf.mxu3 }
 0x411   : > { %v2250_v60 = vpop.f32.mrf.mxu2 }
 0x412   : > { %v2251_v56 = vadd.f32 %v2250_v60, %v2162_v34  ;;  %2789 = vmatmul.bf16.gmra.mxu3 %v9761_v46 }
 0x413   : > { %v2164_v49 = vpop.f32.mrf.mxu1 }
 0x414   : > { %v2374_v11 = vmax.f32 %v2251_v56, 0.0  ;;  %v2165_v7 = vadd.f32 %v2164_v49, %v7750_v40  ;;  %v9763_v56 = vld [vmem:[#allocation16_spill] sm:$0xff] }
 0x415   : > { %v7975_v54 = vpop.f32.mrf.mxu3 }
 0x416   : > { %v7977_v26 = vpack.c.bf16 %v2374_v11, %v2370_v17  ;;  %2932 = vmatmul.bf16.gmra.mxu1 %v7752_v48  ;;  %5828 = vmatmul.msk.bf16.gmra.mxu2 %vm2667_vm3, %v7864_v9  ;;  %v8021_v11 = vpop.f32.mrf.mxu0 }
 0x418   : > { %2878 = vmatmul.bf16.gmra.mxu0 %v7706_v12 }
 0x419   : > { %v2253_v8 = vpop.f32.mrf.mxu2 }
 0x41a   : > { %v2254_v27 = vadd.f32 %v2253_v8, %v2165_v7 }
 0x41b   : > { %v2166_v15 = vpop.f32.mrf.mxu1 }
 0x41c   : > { %v2167_v44 = vadd.f32 %v2166_v15, %v7750_v40  ;;  %v2378_v9 = vmax.f32 %v2254_v27, 0.0 }
 0x41d   : > { %v7986_v35 = vpop.f32.mrf.mxu3 }
 0x421   : > { %v2255_v37 = vpop.f32.mrf.mxu2 }
 0x422   : > { %v2256_v0 = vadd.f32 %v2255_v37, %v2167_v44  ;;  %2794 = vmatmul.bf16.gmra.mxu3 %v9762_v39 }
 0x423   : > { %v2169_v48 = vpop.f32.mrf.mxu1 }
 0x424   : > { %v2382_v4 = vmax.f32 %v2256_v0, 0.0  ;;  %v2170_v3 = vadd.f32 %v2169_v48, %v7750_v40 }
 0x425   : > { %v7992_v51 = vpop.f32.mrf.mxu3 }
 0x426   : > { %v7994_v12 = vpack.c.bf16 %v2382_v4, %v2378_v9  ;;  %2937 = vmatmul.bf16.gmra.mxu1 %v7769_v47  ;;  %5829 = vmatmul.msk.bf16.gmra.mxu2 %vm2667_vm3, %v7880_v30  ;;  %v8010_v30 = vld [vmem:[%s9727_s8] ss:$0 sm:$0xff] }
 0x427   : > { %v2728_v8 = vadd.f32 %v8010_v30, %v7905_v21 }
 0x428   : > { %2883 = vmatmul.bf16.gmra.mxu0 %v7738_v25 }
 0x429   : > { %v2258_v14 = vpop.f32.mrf.mxu2 }
 0x42a   : > { %v2259_v32 = vadd.f32 %v2258_v14, %v2170_v3  ;;  %v8032_v3 = vpop.f32.mrf.mxu0  ;;  %v2733_v14 = vadd.f32 %v8010_v30, %v7918_v13 }
 0x42b   : > { %v2171_v22 = vpop.f32.mrf.mxu1 }
 0x42c   : > { %v2172_v43 = vadd.f32 %v2171_v22, %v7750_v40  ;;  %v2386_v25 = vmax.f32 %v2259_v32, 0.0  ;;  %v2726_v40 = vadd.f32 %v8010_v30, %v7893_v42 }
 0x42d   : > { %v8001_v57 = vpop.f32.mrf.mxu3 }
 0x42e   : > { %v2815_v15 = vadd.f32 %v7937_v20, %v2726_v40  ;;  %v2731_v20 = vadd.f32 %v8010_v30, %v7909_v50 }
 0x430   : > { %v2820_v22 = vadd.f32 %v7957_v41, %v2731_v20  ;;  %v2736_v41 = vadd.f32 %v8010_v30, %v7922_v52  ;;  %v2743_v20 = vadd.f32 %v8010_v30, %v7951_v59 }
 0x431   : > { %v2260_v34 = vpop.f32.mrf.mxu2 }
 0x432   : > { %v2261_v60 = vadd.f32 %v2260_v34, %v2172_v43  ;;  %2799 = vmatmul.bf16.gmra.mxu3 %v9763_v56  ;;  %v2822_v34 = vadd.f32 %v7971_v29, %v2733_v14 }
 0x433   : > { %v2903_v47 = vpop.f32.mrf.mxu1 }
 0x434   : > { %v2390_v46 = vmax.f32 %v2261_v60, 0.0  ;;  %v2904_v37 = vadd.f32 %v2903_v47, %v2815_v15 }
 0x435   : > { %v8012_v49 = vpop.f32.mrf.mxu3 }
 0x436   : > { %v8014_v17 = vpack.c.bf16 %v2390_v46, %v2386_v25  ;;  %2942 = vmatmul.bf16.gmra.mxu1 %v7785_v62  ;;  %5830 = vmatmul.msk.bf16.gmra.mxu2 %vm2667_vm3, %v7895_v19  ;;  %v2817_v62 = vadd.f32 %v7949_v36, %v2728_v8  ;;  %v2738_v8 = vadd.f32 %v8010_v30, %v7934_v61 }
 0x438   : > { %2888 = vmatmul.bf16.gmra.mxu0 %v7758_v63 }
 0x439   : > { %v2992_v7 = vpop.f32.mrf.mxu2 }
 0x43a   : > { %v2993_v19 = vadd.f32 %v2992_v7, %v2904_v37 }
 0x43b   : > { %v2905_v27 = vpop.f32.mrf.mxu1 }
 0x43c   : > { %v2906_v0 = vadd.f32 %v2905_v27, %v2817_v62  ;;  %v3072_v9 = vmax.f32 %v2993_v19, 0.0  ;;  %v2825_v62 = vadd.f32 %v7984_v6, %v2736_v41  ;;  %v2741_v6 = vadd.f32 %v8010_v30, %v7940_v24 }
 0x43d   : > { %v8027_v44 = vpop.f32.mrf.mxu3 }
 0x43e   : > { %v2830_v14 = vadd.f32 %v8003_v10, %v2741_v6  ;;  %v2746_v10 = vadd.f32 %v8010_v30, %v7955_v16 }
 0x440   : > { %v2835_v41 = vadd.f32 %v8032_v3, %v2746_v10 }
 0x441   : > { %v2994_v39 = vpop.f32.mrf.mxu2 }
 0x442   : > { %v2995_v42 = vadd.f32 %v2994_v39, %v2906_v0 }
 0x443   : > { %v2908_v48 = vpop.f32.mrf.mxu1 }
 0x444   : > { %v3073_v4 = vmax.f32 %v2995_v42, 0.0  ;;  %v2909_v60 = vadd.f32 %v2908_v48, %v2820_v22  ;;  %v2832_v22 = vadd.f32 %v8021_v11, %v2743_v20 }
 0x445   : > { %v8030_v63 = vpop.f32.mrf.mxu3 }
 0x446   : > { %v3104_v21 = vpack.c.bf16 %v3073_v4, %v3072_v9  ;;  %2947 = vmatmul.bf16.gmra.mxu1 %v7801_v2  ;;  %5831 = vmatmul.msk.bf16.gmra.mxu2 %vm2667_vm3, %v7911_v18  ;;  %v8045_v2 = vpop.f32.mrf.mxu0 }
 0x448   : > { %3196 = vmatmul.bf16.vlgmr.msrb.gmra.mxu3 %v3104_v21 }
 0x449   : > { %v2997_v36 = vpop.f32.mrf.mxu2 }
 0x44a   : > { %v2998_v56 = vadd.f32 %v2997_v36, %v2909_v60 }
 0x44b   : > { %v2910_v32 = vpop.f32.mrf.mxu1 }
 0x44c   : > { %v2911_v18 = vadd.f32 %v2910_v32, %v2822_v34  ;;  %v3074_v46 = vmax.f32 %v2998_v56, 0.0 }
 0x44d   : > { %v8042_v43 = vpop.f32.mrf.mxu3 }
 0x44e   : > { %v8056_v27 = vpop.f32.mrf.mxu0 }
 0x451   : > { %v2999_v47 = vpop.f32.mrf.mxu2 }
 0x452   : > { %v3000_v25 = vadd.f32 %v2999_v47, %v2911_v18 }
 0x453   : > { %v2913_v50 = vpop.f32.mrf.mxu1 }
 0x454   : > { %v3075_v40 = vmax.f32 %v3000_v25, 0.0  ;;  %v2914_v19 = vadd.f32 %v2913_v50, %v2825_v62 }
 0x455   : > { %v8047_v7 = vpop.f32.mrf.mxu3 }
 0x456   : > { %2952 = vmatmul.bf16.gmra.mxu1 %v7817_v31  ;;  %5832 = vmatmul.msk.bf16.gmra.mxu2 %vm2667_vm3, %v7924_v45  ;;  %v3105_v13 = vpack.c.bf16 %v3075_v40, %v3074_v46  ;;  %v2827_v31 = vadd.f32 %v7990_v1, %v2738_v8  ;;  %v2841_v48 = vpop.f32.mrf.mxu0  ;;  %v2748_v40 = vadd.f32 %v8010_v30, %v7969_v53 }
 0x457   : > { %v2751_v53 = vadd.f32 %v8010_v30, %v7975_v54 }
 0x458   : > { %3201 = vmatmul.bf16.gmra.mxu3 %v3105_v13 }
 0x459   : > { %v3002_v29 = vpop.f32.mrf.mxu2 }
 0x45a   : > { %v3003_v45 = vadd.f32 %v3002_v29, %v2914_v19 }
 0x45b   : > { %v2915_v15 = vpop.f32.mrf.mxu1 }
 0x45c   : > { %v2916_v0 = vadd.f32 %v2915_v15, %v2827_v31  ;;  %v3076_v9 = vmax.f32 %v3003_v45, 0.0 }
 0x45d   : > { %v8059_v37 = vpop.f32.mrf.mxu3 }
 0x461   : > { %v3004_v39 = vpop.f32.mrf.mxu2 }
 0x462   : > { %v3005_v42 = vadd.f32 %v3004_v39, %v2916_v0 }
 0x463   : > { %v2918_v52 = vpop.f32.mrf.mxu1 }
 0x464   : > { %v3077_v4 = vmax.f32 %v3005_v42, 0.0  ;;  %v2919_v34 = vadd.f32 %v2918_v52, %v2830_v14 }
 0x465   : > { %v8062_v21 = vpop.f32.mrf.mxu3 }
 0x466   : > { %2957 = vmatmul.bf16.gmra.mxu1 %v7833_v55  ;;  %5833 = vmatmul.msk.bf16.gmra.mxu2 %vm2667_vm3, %v7942_v5  ;;  %v3106_v61 = vpack.c.bf16 %v3077_v4, %v3076_v9  ;;  %v2844_v55 = vpop.f32.mrf.mxu0  ;;  %v2840_v9 = vadd.f32 %v8056_v27, %v2751_v53 }
 0x468   : > { %3206 = vmatmul.bf16.gmra.mxu3 %v3106_v61 }
 0x469   : > { %v3007_v1 = vpop.f32.mrf.mxu2 }
 0x46a   : > { %v3008_v60 = vadd.f32 %v3007_v1, %v2919_v34 }
 0x46b   : > { %v2920_v36 = vpop.f32.mrf.mxu1 }
 0x46c   : > { %v2921_v5 = vadd.f32 %v2920_v36, %v2832_v22  ;;  %v3078_v24 = vmax.f32 %v3008_v60, 0.0 }
 0x46d   : > { %v8072_v32 = vpop.f32.mrf.mxu3 }
 0x46e   : > { %v2846_v11 = vpop.f32.mrf.mxu0 }
 0x471   : > { %v3009_v56 = vpop.f32.mrf.mxu2 }
 0x472   : > { %v3010_v18 = vadd.f32 %v3009_v56, %v2921_v5 }
 0x473   : > { %v2923_v47 = vpop.f32.mrf.mxu1 }
 0x474   : > { %v3079_v25 = vmax.f32 %v3010_v18, 0.0  ;;  %v2924_v8 = vadd.f32 %v2923_v47, %v2835_v41 }
 0x475   : > { %v8075_v50 = vpop.f32.mrf.mxu3 }
 0x476   : > { %2962 = vmatmul.bf16.gmra.mxu1 %v7849_v23  ;;  %5834 = vmatmul.msk.bf16.gmra.mxu2 %vm2667_vm3, %v7959_v58  ;;  %v3107_v59 = vpack.c.bf16 %v3079_v25, %v3078_v24  ;;  %v2837_v23 = vadd.f32 %v8045_v2, %v2748_v40  ;;  %v2849_v31 = vpop.f32.mrf.mxu0  ;;  %v2753_v2 = vadd.f32 %v8010_v30, %v7986_v35 }
 0x477   : > { %v2756_v35 = vadd.f32 %v8010_v30, %v7992_v51 }
 0x478   : > { %3211 = vmatmul.bf16.gmra.mxu3 %v3107_v59  ;;  %v2842_v6 = vadd.f32 %v2841_v48, %v2753_v2  ;;  %v2758_v48 = vadd.f32 %v8010_v30, %v8001_v57  ;;  %v2761_v57 = vadd.f32 %v8010_v30, %v8012_v49 }
 0x479   : > { %v3012_v46 = vpop.f32.mrf.mxu2  ;;  %v2845_v18 = vadd.f32 %v2844_v55, %v2756_v35 }
 0x47a   : > { %v3013_v15 = vadd.f32 %v3012_v46, %v2924_v8  ;;  %v2847_v24 = vadd.f32 %v2846_v11, %v2758_v48  ;;  %v2763_v11 = vadd.f32 %v8010_v30, %v8027_v44  ;;  %v2771_v48 = vadd.f32 %v8010_v30, %v8047_v7  ;;  %v8143_v7 = vld [vmem:[%s9730_s11] ss:$0 sm:$0xff] }
 0x47b   : > { %v2925_v13 = vpop.f32.mrf.mxu1 }
 0x47c   : > { %v2926_v58 = vadd.f32 %v2925_v13, %v2837_v23  ;;  %v3080_v45 = vmax.f32 %v3013_v15, 0.0 }
 0x47d   : > { %v8085_v29 = vpop.f32.mrf.mxu3 }
 0x47e   : > { %v2851_v4 = vpop.f32.mrf.mxu0 }
 0x481   : > { %v3014_v62 = vpop.f32.mrf.mxu2 }
 0x482   : > { %v3015_v19 = vadd.f32 %v3014_v62, %v2926_v58  ;;  %v2850_v58 = vadd.f32 %v2849_v31, %v2761_v57  ;;  %v2852_v62 = vadd.f32 %v2851_v4, %v2763_v11 }
 0x483   : > { %v2928_v16 = vpop.f32.mrf.mxu1 }
 0x484   : > { %v3081_v0 = vmax.f32 %v3015_v19, 0.0  ;;  %v2929_v1 = vadd.f32 %v2928_v16, %v2840_v9  ;;  %v2768_v9 = vadd.f32 %v8010_v30, %v8042_v43  ;;  %v8135_v43 = vld [vmem:[%s9729_s10] ss:$0 sm:$0xff] }
 0x485   : > { %v8088_v39 = vpop.f32.mrf.mxu3 }
 0x486   : > { %v3108_v42 = vpack.c.bf16 %v3081_v0, %v3080_v45  ;;  %2967 = vmatmul.bf16.gmra.mxu1 %v7862_v38  ;;  %5835 = vmatmul.msk.bf16.gmra.mxu2 %vm2667_vm3, %v7977_v26  ;;  %v2854_v60 = vpop.f32.mrf.mxu0 }
 0x488   : > { %3216 = vmatmul.bf16.gmra.mxu3 %v3108_v42 }
 0x489   : > { %v3017_v3 = vpop.f32.mrf.mxu2 }
 0x48a   : > { %v3018_v38 = vadd.f32 %v3017_v3, %v2929_v1 }
 0x48b   : > { %v2930_v52 = vpop.f32.mrf.mxu1 }
 0x48c   : > { %v2931_v20 = vadd.f32 %v2930_v52, %v2842_v6  ;;  %v3082_v22 = vmax.f32 %v3018_v38, 0.0  ;;  %v2766_v52 = vadd.f32 %v8010_v30, %v8030_v63 }
 0x48d   : > { %v8098_v61 = vpop.f32.mrf.mxu3 }
 0x48e   : > { %v2856_v59 = vpop.f32.mrf.mxu0  ;;  %v2855_v6 = vadd.f32 %v2854_v60, %v2766_v52 }
 0x48f   : > { %v2857_v1 = vadd.f32 %v2856_v59, %v2768_v9 }
 0x491   : > { %v3019_v36 = vpop.f32.mrf.mxu2 }
 0x492   : > { %v3020_v26 = vadd.f32 %v3019_v36, %v2931_v20 }
 0x493   : > { %v2933_v14 = vpop.f32.mrf.mxu1 }
 0x494   : > { %v3083_v54 = vmax.f32 %v3020_v26, 0.0  ;;  %v2934_v25 = vadd.f32 %v2933_v14, %v2845_v18  ;;  %v2773_v18 = vadd.f32 %v8010_v30, %v8059_v37 }
 0x495   : > { %v8100_v34 = vpop.f32.mrf.mxu3 }
 0x496   : > { %v3109_v5 = vpack.c.bf16 %v3083_v54, %v3082_v22  ;;  %2972 = vmatmul.bf16.gmra.mxu1 %v7878_v33  ;;  %5836 = vmatmul.msk.bf16.gmra.mxu2 %vm2667_vm3, %v7994_v12  ;;  %v2859_v8 = vpop.f32.mrf.mxu0 }
 0x497   : > { %v2860_v59 = vadd.f32 %v2859_v8, %v2771_v48 }
 0x498   : > { %3221 = vmatmul.bf16.gmra.mxu3 %v3109_v5 }
 0x499   : > { %v3022_v27 = vpop.f32.mrf.mxu2 }
 0x49a   : > { %v3023_v10 = vadd.f32 %v3022_v27, %v2934_v25 }
 0x49b   : > { %v2935_v56 = vpop.f32.mrf.mxu1 }
 0x49c   : > { %v2936_v33 = vadd.f32 %v2935_v56, %v2847_v24  ;;  %v3084_v13 = vmax.f32 %v3023_v10, 0.0 }
 0x49d   : > { %v8109_v47 = vpop.f32.mrf.mxu3 }
 0x49e   : > { %v2861_v53 = vpop.f32.mrf.mxu0 }
 0x4a1   : > { %v3024_v46 = vpop.f32.mrf.mxu2 }
 0x4a2   : > { %v3025_v40 = vadd.f32 %v3024_v46, %v2936_v33  ;;  %v2862_v33 = vadd.f32 %v2861_v53, %v2773_v18 }
 0x4a3   : > { %v2938_v12 = vpop.f32.mrf.mxu1 }
 0x4a4   : > { %v3085_v41 = vmax.f32 %v3025_v40, 0.0  ;;  %v2939_v19 = vadd.f32 %v2938_v12, %v2850_v58 }
 0x4a5   : > { %v8111_v51 = vpop.f32.mrf.mxu3 }
 0x4a6   : > { %v3110_v23 = vpack.c.bf16 %v3085_v41, %v3084_v13  ;;  %2977 = vmatmul.bf16.gmra.mxu1 %v7891_v28  ;;  %5837 = vmatmul.msk.bf16.gmra.mxu2 %vm2667_vm3, %v8014_v17  ;;  %v2864_v38 = vpop.f32.mrf.mxu0 }
 0x4a8   : > { %3226 = vmatmul.bf16.gmra.mxu3 %v3110_v23 }
 0x4a9   : > { %v3027_v55 = vpop.f32.mrf.mxu2 }
 0x4aa   : > { %v3028_v45 = vadd.f32 %v3027_v55, %v2939_v19 }
 0x4ab   : > { %v2940_v15 = vpop.f32.mrf.mxu1 }
 0x4ac   : > { %v2941_v28 = vadd.f32 %v2940_v15, %v2852_v62  ;;  %v3086_v3 = vmax.f32 %v3028_v45, 0.0 }
 0x4ad   : > { %v8120_v16 = vpop.f32.mrf.mxu3 }
 0x4ae   : > { %v2866_v56 = vpop.f32.mrf.mxu0 }
 0x4b1   : > { %v3029_v0 = vpop.f32.mrf.mxu2 }
 0x4b2   : > { %v3030_v42 = vadd.f32 %v3029_v0, %v2941_v28  ;;  %v2776_v28 = vadd.f32 %v8010_v30, %v8062_v21 }
 0x4b3   : > { %v2943_v17 = vpop.f32.mrf.mxu1 }
 0x4b4   : > { %v3087_v49 = vmax.f32 %v3030_v42, 0.0  ;;  %v2944_v20 = vadd.f32 %v2943_v17, %v2855_v6  ;;  %v2778_v17 = vadd.f32 %v8010_v30, %v8072_v32 }
 0x4b5   : > { %v8124_v44 = vpop.f32.mrf.mxu3 }
 0x4b6   : > { %v3111_v2 = vpack.c.bf16 %v3087_v49, %v3086_v3  ;;  %v2869_v37 = vpop.f32.mrf.mxu0  ;;  %v2867_v9 = vadd.f32 %v2866_v56, %v2778_v17  ;;  %v2781_v56 = vadd.f32 %v8010_v30, %v8075_v50  ;;  %v2788_v17 = vadd.f32 %v8010_v30, %v8098_v61 }
 0x4b8   : > { %3231 = vmatmul.bf16.gmra.mxu3 %v3111_v2  ;;  %v2865_v2 = vadd.f32 %v2864_v38, %v2776_v28  ;;  %v2786_v28 = vadd.f32 %v8010_v30, %v8088_v39 }
 0x4b9   : > { %v3032_v31 = vpop.f32.mrf.mxu2 }
 0x4ba   : > { %v3033_v36 = vadd.f32 %v3032_v31, %v2944_v20 }
 0x4bb   : > { %v2945_v4 = vpop.f32.mrf.mxu1 }
 0x4bc   : > { %v2946_v26 = vadd.f32 %v2945_v4, %v2857_v1  ;;  %v3088_v63 = vmax.f32 %v3033_v36, 0.0 }
 0x4bd   : > { %v8128_v54 = vpop.f32.mrf.mxu3 }
 0x4be   : > { %v2871_v52 = vpop.f32.mrf.mxu0 }
 0x4c1   : > { %v3034_v14 = vpop.f32.mrf.mxu2 }
 0x4c2   : > { %v3035_v22 = vadd.f32 %v3034_v14, %v2946_v26 }
 0x4c3   : > { %v2948_v5 = vpop.f32.mrf.mxu1 }
 0x4c4   : > { %v3089_v35 = vmax.f32 %v3035_v22, 0.0  ;;  %v2949_v46 = vadd.f32 %v2948_v5, %v2860_v59 }
 0x4c6   : > { %v3112_v27 = vpack.c.bf16 %v3089_v35, %v3088_v63  ;;  %v2874_v35 = vpop.f32.mrf.mxu0 }
 0x4c8   : > { %3236 = vmatmul.bf16.gmra.mxu3 %v3112_v27 }
 0x4c9   : > { %v3037_v60 = vpop.f32.mrf.mxu2 }
 0x4ca   : > { %v3038_v12 = vadd.f32 %v3037_v60, %v2949_v46 }
 0x4cb   : > { %v2950_v24 = vpop.f32.mrf.mxu1  ;;  %v3197_v25 = vpop.f32.mrf.mxu3 }
 0x4cc   : > { %v3198_v10 = vadd.f32 %v8135_v43, %v3197_v25  ;;  %v2951_v13 = vadd.f32 %v2950_v24, %v2862_v33  ;;  %v3090_v15 = vmax.f32 %v3038_v12, 0.0  ;;  %v2783_v24 = vadd.f32 %v8010_v30, %v8085_v29 }
 0x4cd   : > { %v2870_v33 = vadd.f32 %v2869_v37, %v2781_v56 }
 0x4ce   : > { %v3277_v40 = vmax.f32 %v3198_v10, 0.0 }
 0x4d0   : > { %v3313_v41 = vmul.f32 %v8143_v7, %v3277_v40  ;;  %v2872_v40 = vadd.f32 %v2871_v52, %v2783_v24  ;;  %v2875_v52 = vadd.f32 %v2874_v35, %v2786_v28  ;;  %v2798_v28 = vadd.f32 %v8010_v30, %v8120_v16 }
 0x4d1   : > { %v3039_v23 = vpop.f32.mrf.mxu2 }
 0x4d2   : > { %v3040_v57 = vadd.f32 %v3039_v23, %v2951_v13  ;;  %v3346_v55 = vsel %vm3345_vm4, %v3313_v41, 0.0  ;;  %v2876_v41 = vpop.f32.mrf.mxu0 }
 0x4d3   : > { %v2953_v11 = vpop.f32.mrf.mxu1  ;;  %v3199_v8 = vpop.f32.mrf.mxu3  ;;  %3347 = vadd.xlane.f32.xlu0 %v3346_v55 }
 0x4d4   : > { %v3091_v58 = vmax.f32 %v3040_v57, 0.0  ;;  %v3200_v62 = vadd.f32 %v8135_v43, %v3199_v8  ;;  %v2954_v4 = vadd.f32 %v2953_v11, %v2865_v2 }
 0x4d6   : > { %v3113_v19 = vpack.c.bf16 %v3091_v58, %v3090_v15  ;;  %v3278_v45 = vmax.f32 %v3200_v62, 0.0 }
 0x4d8   : > { %3241 = vmatmul.bf16.gmra.mxu3 %v3113_v19  ;;  %v3314_v0 = vmul.f32 %v8143_v7, %v3278_v45 }
 0x4d9   : > { %v3042_v42 = vpop.f32.mrf.mxu2 }
 0x4da   : > { %v3349_v53 = vsel %vm3345_vm4, %v3314_v0, 0.0  ;;  %v3043_v21 = vadd.f32 %v3042_v42, %v2954_v4 }
 0x4db   : > { %v2955_v3 = vpop.f32.mrf.mxu1  ;;  %v3202_v49 = vpop.f32.mrf.mxu3  ;;  %3350 = vadd.xlane.f32.xlu0 %v3349_v53 }
 0x4dc   : > { %v3203_v31 = vadd.f32 %v8135_v43, %v3202_v49  ;;  %v2956_v1 = vadd.f32 %v2955_v3, %v2867_v9  ;;  %v3092_v5 = vmax.f32 %v3043_v21, 0.0  ;;  %v2879_v53 = vpop.f32.mrf.mxu0  ;;  %v2877_v9 = vadd.f32 %v2876_v41, %v2788_v17 }
 0x4de   : > { %v3279_v6 = vmax.f32 %v3203_v31, 0.0 }
 0x4e0   : > { %v3315_v20 = vmul.f32 %v8143_v7, %v3279_v6 }
 0x4e1   : > { %v3044_v36 = vpop.f32.mrf.mxu2 }
 0x4e2   : > { %v3045_v26 = vadd.f32 %v3044_v36, %v2956_v1  ;;  %v3352_v32 = vsel %vm3345_vm4, %v3315_v20, 0.0 }
 0x4e3   : > { %v2958_v14 = vpop.f32.mrf.mxu1  ;;  %v3204_v22 = vpop.f32.mrf.mxu3  ;;  %3353 = vadd.xlane.f32.xlu1 %v3352_v32 }
 0x4e4   : > { %v3093_v63 = vmax.f32 %v3045_v26, 0.0  ;;  %v3205_v38 = vadd.f32 %v8135_v43, %v3204_v22  ;;  %v2959_v12 = vadd.f32 %v2958_v14, %v2870_v33  ;;  %v2881_v14 = vpop.f32.mrf.mxu0 }
 0x4e6   : > { %v3114_v27 = vpack.c.bf16 %v3093_v63, %v3092_v5  ;;  %v3280_v48 = vmax.f32 %v3205_v38, 0.0 }
 0x4e8   : > { %3246 = vmatmul.bf16.gmra.mxu3 %v3114_v27  ;;  %v3316_v60 = vmul.f32 %v8143_v7, %v3280_v48  ;;  %v2791_v27 = vadd.f32 %v8010_v30, %v8100_v34 }
 0x4e9   : > { %v3047_v18 = vpop.f32.mrf.mxu2 }
 0x4ea   : > { %v3355_v25 = vsel %vm3345_vm4, %v3316_v60, 0.0  ;;  %v3048_v50 = vadd.f32 %v3047_v18, %v2959_v12  ;;  %v2793_v60 = vadd.f32 %v8010_v30, %v8109_v47 }
 0x4eb   : > { %v2960_v59 = vpop.f32.mrf.mxu1  ;;  %v3207_v10 = vpop.f32.mrf.mxu3  ;;  %3356 = vadd.xlane.f32.xlu1 %v3355_v25 }
 0x4ec   : > { %v3208_v46 = vadd.f32 %v8135_v43, %v3207_v10  ;;  %v2961_v23 = vadd.f32 %v2960_v59, %v2872_v40  ;;  %v3094_v58 = vmax.f32 %v3048_v50, 0.0  ;;  %v2880_v59 = vadd.f32 %v2879_v53, %v2791_v27 }
 0x4ed   : > { %v2882_v33 = vadd.f32 %v2881_v14, %v2793_v60  ;;  %v2801_v14 = vadd.f32 %v8010_v30, %v8124_v44 }
 0x4ee   : > { %v3281_v13 = vmax.f32 %v3208_v46, 0.0  ;;  %v2884_v46 = vpop.f32.mrf.mxu0 }
 0x4f0   : > { %v3317_v57 = vmul.f32 %v8143_v7, %v3281_v13 }
 0x4f1   : > { %v3049_v55 = vpop.f32.mrf.mxu2 }
 0x4f2   : > { %v3050_v11 = vadd.f32 %v3049_v55, %v2961_v23  ;;  %v3358_v29 = vsel %vm3345_vm4, %v3317_v57, 0.0 }
 0x4f3   : > { %v2963_v8 = vpop.f32.mrf.mxu1  ;;  %v3209_v15 = vpop.f32.mrf.mxu3  ;;  %3359 = vadd.xlane.f32.xlu2 %v3358_v29 }
 0x4f4   : > { %v3095_v62 = vmax.f32 %v3050_v11, 0.0  ;;  %v3210_v37 = vadd.f32 %v8135_v43, %v3209_v15  ;;  %v2964_v4 = vadd.f32 %v2963_v8, %v2875_v52 }
 0x4f6   : > { %v3115_v19 = vpack.c.bf16 %v3095_v62, %v3094_v58  ;;  %v3282_v45 = vmax.f32 %v3210_v37, 0.0  ;;  %v2796_v62 = vadd.f32 %v8010_v30, %v8111_v51  ;;  %v2886_v37 = vpop.f32.mrf.mxu0 }
 0x4f8   : > { %3251 = vmatmul.bf16.gmra.mxu3 %v3115_v19  ;;  %v3318_v0 = vmul.f32 %v8143_v7, %v3282_v45  ;;  %v2885_v53 = vadd.f32 %v2884_v46, %v2796_v62 }
 0x4f9   : > { %v3052_v42 = vpop.f32.mrf.mxu2 }
 0x4fa   : > { %v3361_v3 = vsel %vm3345_vm4, %v3318_v0, 0.0  ;;  %v3053_v39 = vadd.f32 %v3052_v42, %v2964_v4 }
 0x4fb   : > { %v2965_v49 = vpop.f32.mrf.mxu1  ;;  %v3212_v2 = vpop.f32.mrf.mxu3  ;;  %3362 = vadd.xlane.f32.xlu2 %v3361_v3 }
 0x4fc   : > { %v3213_v31 = vadd.f32 %v8135_v43, %v3212_v2  ;;  %v2966_v21 = vadd.f32 %v2965_v49, %v2877_v9  ;;  %v3096_v22 = vmax.f32 %v3053_v39, 0.0  ;;  %v2887_v49 = vadd.f32 %v2886_v37, %v2798_v28 }
 0x4fe   : > { %v3283_v6 = vmax.f32 %v3213_v31, 0.0 }
 0x500   : > { %v3319_v1 = vmul.f32 %v8143_v7, %v3283_v6  ;;  %v2889_v6 = vpop.f32.mrf.mxu0 }
 0x501   : > { %v3054_v20 = vpop.f32.mrf.mxu2  ;;  %v2890_v27 = vadd.f32 %v2889_v6, %v2801_v14 }
 0x502   : > { %v3055_v36 = vadd.f32 %v3054_v20, %v2966_v21  ;;  %v3364_v61 = vsel %vm3345_vm4, %v3319_v1, 0.0 }
 0x503   : > { %v2968_v26 = vpop.f32.mrf.mxu1  ;;  %v3214_v32 = vpop.f32.mrf.mxu3  ;;  %3365 = vadd.xlane.f32.xlu0 %v3364_v61 }
 0x504   : > { %v3097_v5 = vmax.f32 %v3055_v36, 0.0  ;;  %v3215_v63 = vadd.f32 %v8135_v43, %v3214_v32  ;;  %v2969_v40 = vadd.f32 %v2968_v26, %v2880_v59 }
 0x506   : > { %v3116_v38 = vpack.c.bf16 %v3097_v5, %v3096_v22  ;;  %v3284_v35 = vmax.f32 %v3215_v63, 0.0  ;;  %v2803_v63 = vadd.f32 %v8010_v30, %v8128_v54 }
 0x508   : > { %3256 = vmatmul.bf16.gmra.mxu3 %v3116_v38  ;;  %v3320_v48 = vmul.f32 %v8143_v7, %v3284_v35 }
 0x509   : > { %v3057_v56 = vpop.f32.mrf.mxu2 }
 0x50a   : > { %v3367_v18 = vsel %vm3345_vm4, %v3320_v48, 0.0  ;;  %v3058_v34 = vadd.f32 %v3057_v56, %v2969_v40  ;;  %v2891_v56 = vpop.f32.mrf.mxu0 }
 0x50b   : > { %v2970_v24 = vpop.f32.mrf.mxu1  ;;  %v3217_v25 = vpop.f32.mrf.mxu3  ;;  %3368 = vadd.xlane.f32.xlu1 %v3367_v18  ;;  %v2892_v18 = vadd.f32 %v2891_v56, %v2803_v63 }
 0x50c   : > { %v3218_v10 = vadd.f32 %v8135_v43, %v3217_v25  ;;  %v2971_v13 = vadd.f32 %v2970_v24, %v2882_v33  ;;  %v3098_v11 = vmax.f32 %v3058_v34, 0.0 }
 0x50e   : > { %v3285_v12 = vmax.f32 %v3218_v10, 0.0 }
 0x510   : > { %v3321_v41 = vmul.f32 %v8143_v7, %v3285_v12 }
 0x511   : > { %v3059_v50 = vpop.f32.mrf.mxu2 }
 0x512   : > { %v3060_v23 = vadd.f32 %v3059_v50, %v2971_v13  ;;  %v3370_v47 = vsel %vm3345_vm4, %v3321_v41, 0.0 }
 0x513   : > { %v2973_v57 = vpop.f32.mrf.mxu1  ;;  %v3219_v55 = vpop.f32.mrf.mxu3  ;;  %3371 = vadd.xlane.f32.xlu2 %v3370_v47 }
 0x514   : > { %v3099_v29 = vmax.f32 %v3060_v23, 0.0  ;;  %v3220_v8 = vadd.f32 %v8135_v43, %v3219_v55  ;;  %v2974_v2 = vadd.f32 %v2973_v57, %v2885_v53 }
 0x516   : > { %v3117_v15 = vpack.c.bf16 %v3099_v29, %v3098_v11  ;;  %v3286_v58 = vmax.f32 %v3220_v8, 0.0 }
 0x518   : > { %3261 = vmatmul.bf16.gmra.mxu3 %v3117_v15  ;;  %v3322_v19 = vmul.f32 %v8143_v7, %v3286_v58  ;;  %v8216_v15 = vld [vmem:[%s9731_s12] ss:$0 sm:$0xff] }
 0x519   : > { %v3062_v45 = vpop.f32.mrf.mxu2  ;;  %v8221_v58 = vld [vmem:[%s9732_s13] ss:$0 sm:$0xff] }
 0x51a   : > { %v3373_v0 = vsel %vm3345_vm4, %v3322_v19, 0.0  ;;  %v3063_v51 = vadd.f32 %v3062_v45, %v2974_v2 }
 0x51b   : > { %v2975_v42 = vpop.f32.mrf.mxu1  ;;  %v3222_v17 = vpop.f32.mrf.mxu3  ;;  %3374 = vadd.xlane.f32.xlu0 %v3373_v0 }
 0x51c   : > { %v3223_v3 = vadd.f32 %v8135_v43, %v3222_v17  ;;  %v2976_v31 = vadd.f32 %v2975_v42, %v2887_v49  ;;  %v3100_v20 = vmax.f32 %v3063_v51, 0.0 }
 0x51e   : > { %v3287_v52 = vmax.f32 %v3223_v3, 0.0 }
 0x520   : > { %v3323_v9 = vmul.f32 %v8143_v7, %v3287_v52 }
 0x521   : > { %v3064_v4 = vpop.f32.mrf.mxu2 }
 0x522   : > { %v3065_v39 = vadd.f32 %v3064_v4, %v2976_v31  ;;  %v3376_v16 = vsel %vm3345_vm4, %v3323_v9, 0.0 }
 0x523   : > { %v2978_v21 = vpop.f32.mrf.mxu1  ;;  %v3224_v1 = vpop.f32.mrf.mxu3  ;;  %3377 = vadd.xlane.f32.xlu1 %v3376_v16 }
 0x524   : > { %v3101_v36 = vmax.f32 %v3065_v39, 0.0  ;;  %v3225_v61 = vadd.f32 %v8135_v43, %v3224_v1  ;;  %v2979_v24 = vadd.f32 %v2978_v21, %v2890_v27 }
 0x526   : > { %v3118_v26 = vpack.c.bf16 %v3101_v36, %v3100_v20  ;;  %v3288_v32 = vmax.f32 %v3225_v61, 0.0 }
 0x528   : > { %3266 = vmatmul.bf16.gmra.mxu3 %v3118_v26  ;;  %v3324_v22 = vmul.f32 %v8143_v7, %v3288_v32 }
 0x529   : > { %v3067_v5 = vpop.f32.mrf.mxu2 }
 0x52a   : > { %v3379_v38 = vsel %vm3345_vm4, %v3324_v22, 0.0  ;;  %v3068_v44 = vadd.f32 %v3067_v5, %v2979_v24 }
 0x52b   : > { %v3227_v35 = vpop.f32.mrf.mxu3  ;;  %3380 = vadd.xlane.f32.xlu2 %v3379_v38  ;;  %v2980_v60 = vpop.f32.mrf.mxu1 }
 0x52c   : > { %v3228_v48 = vadd.f32 %v8135_v43, %v3227_v35  ;;  %v2981_v59 = vadd.f32 %v2980_v60, %v2892_v18  ;;  %v3102_v40 = vmax.f32 %v3068_v44, 0.0 }
 0x52e   : > { %v3289_v25 = vmax.f32 %v3228_v48, 0.0 }
 0x530   : > { %v3325_v10 = vmul.f32 %v8143_v7, %v3289_v25 }
 0x531   : > { %v3069_v33 = vpop.f32.mrf.mxu2 }
 0x532   : > { %v3070_v46 = vadd.f32 %v3069_v33, %v2981_v59  ;;  %v3382_v30 = vsel %vm3345_vm4, %v3325_v10, 0.0 }
 0x533   : > { %v3229_v54 = vpop.f32.mrf.mxu3  ;;  %3383 = vadd.xlane.f32.xlu0 %v3382_v30 }
 0x534   : > { %v3103_v12 = vmax.f32 %v3070_v46, 0.0  ;;  %v3230_v34 = vadd.f32 %v8135_v43, %v3229_v54 }
 0x536   : > { %v3119_v13 = vpack.c.bf16 %v3103_v12, %v3102_v40  ;;  %v3290_v41 = vmax.f32 %v3230_v34, 0.0 }
 0x538   : > { %3271 = vmatmul.bf16.gmra.mxu3 %v3119_v13  ;;  %v3326_v50 = vmul.f32 %v8143_v7, %v3290_v41 }
 0x53a   : > { %v3385_v23 = vsel %vm3345_vm4, %v3326_v50, 0.0 }
 0x53b   : > { %v3232_v47 = vpop.f32.mrf.mxu3  ;;  %3386 = vadd.xlane.f32.xlu1 %v3385_v23 }
 0x53c   : > { %v3233_v57 = vadd.f32 %v8135_v43, %v3232_v47 }
 0x53e   : > { %v3291_v55 = vmax.f32 %v3233_v57, 0.0 }
 0x540   : > { %v3327_v11 = vmul.f32 %v8143_v7, %v3291_v55 }
 0x542   : > { %v3388_v29 = vsel %vm3345_vm4, %v3327_v11, 0.0 }
 0x543   : > { %v3234_v8 = vpop.f32.mrf.mxu3  ;;  %3389 = vadd.xlane.f32.xlu2 %v3388_v29 }
 0x544   : > { %v3235_v62 = vadd.f32 %v8135_v43, %v3234_v8 }
 0x546   : > { %v3292_v37 = vmax.f32 %v3235_v62, 0.0  ;;  %v3348_v19 = vpop.xlane.xlu0 %3347 }
 0x547   : > { %v3446_v45 = vadd.f32 %v8216_v15, %v3348_v19  ;;  %v4090_v28 = vadd.f32 %v8221_v58, %v3348_v19 }
 0x548   : > { %v3328_v0 = vmul.f32 %v8143_v7, %v3292_v37 }
 0x549   : > { %v3478_v42 = vsub.f32 0.0, %v3446_v45  ;;  %v4122_v17 = vsub.f32 0.0, %v4090_v28 }
 0x54a   : > { %v3391_v53 = vsel %vm3345_vm4, %v3328_v0, 0.0 }
 0x54b   : > { %v3510_v3 = vmul.f32 1.442695, %v3478_v42  ;;  %v4154_v49 = vmul.f32 1.442695, %v4122_v17  ;;  %v3237_v2 = vpop.f32.mrf.mxu3  ;;  %3392 = vadd.xlane.f32.xlu0 %v3391_v53 }
 0x54c   : > { %v3238_v52 = vadd.f32 %v8135_v43, %v3237_v2 }
 0x54d   : > { %6086 = vpow2.f32 %v3510_v3 }
 0x54e   : > { %6088 = vpow2.f32 %v4154_v49  ;;  %v3293_v51 = vmax.f32 %v3238_v52, 0.0  ;;  %v3351_v31 = vpop.xlane.xlu0 %3350 }
 0x54f   : > { %v3447_v9 = vadd.f32 %v8216_v15, %v3351_v31  ;;  %v4091_v4 = vadd.f32 %v8221_v58, %v3351_v31 }
 0x550   : > { %v3329_v6 = vmul.f32 %v8143_v7, %v3293_v51 }
 0x551   : > { %v3479_v39 = vsub.f32 0.0, %v3447_v9  ;;  %v4123_v16 = vsub.f32 0.0, %v4091_v4 }
 0x552   : > { %v3394_v21 = vsel %vm3345_vm4, %v3329_v6, 0.0 }
 0x553   : > { %v6087_v1 = vpop.eup %6086  ;;  %v3512_v20 = vmul.f32 1.442695, %v3479_v39  ;;  %v3239_v36 = vpop.f32.mrf.mxu3  ;;  %3395 = vadd.xlane.f32.xlu1 %v3394_v21  ;;  %v4156_v32 = vmul.f32 1.442695, %v4123_v16 }
 0x554   : > { %v6089_v61 = vpop.eup %6088  ;;  %v3574_v26 = vadd.f32 1.0, %v6087_v1  ;;  %v3240_v14 = vadd.f32 %v8135_v43, %v3239_v36 }
 0x555   : > { %v4218_v22 = vadd.f32 1.0, %v6089_v61  ;;  %6090 = vpow2.f32 %v3512_v20 }
 0x556   : > { %6092 = vrcp.f32 %v3574_v26  ;;  %v3354_v5 = vpop.xlane.xlu1 %3353  ;;  %v3294_v63 = vmax.f32 %v3240_v14, 0.0  ;;  %v3615_v56 = vand.u32 2147483647, %v3574_v26  ;;  %v3617_v25 = vand.u32 2147483648, %v3574_v26 }
 0x557   : > { %6094 = vrcp.f32 %v4218_v22  ;;  %v3448_v38 = vadd.f32 %v8216_v15, %v3354_v5  ;;  %v4092_v35 = vadd.f32 %v8221_v58, %v3354_v5  ;;  %vm3611_vm5 = vweird.f32 %v3574_v26 }
 0x558   : > { %6096 = vpow2.f32 %v4156_v32  ;;  %v3330_v27 = vmul.f32 %v8143_v7, %v3294_v63  ;;  %vm4255_vm6 = vweird.f32 %v4218_v22  ;;  %v4259_v40 = vand.u32 2147483647, %v4218_v22 }
 0x559   : > { %v3480_v60 = vsub.f32 0.0, %v3448_v38  ;;  %v4124_v18 = vsub.f32 0.0, %v4092_v35  ;;  %v4261_v12 = vand.u32 2147483648, %v4218_v22  ;;  %vm8241_vm7 = vcmp.eq.f32.partialorder %v3615_v56, 8.507059e+37 }
 0x55a   : > { %v3397_v59 = vsel %vm3345_vm4, %v3330_v27, 0.0  ;;  %v3618_v57 = vor.u32 1.1754944e-38, %v3617_v25  ;;  %vm8250_vm10 = vcmp.eq.f32.partialorder %v4259_v40, 8.507059e+37 }
 0x55b   : > { %v6091_v48 = vpop.eup %6090  ;;  %v3514_v46 = vmul.f32 1.442695, %v3480_v60  ;;  %3398 = vadd.xlane.f32.xlu2 %v3397_v59  ;;  %v3242_v34 = vpop.f32.mrf.mxu3  ;;  %v4158_v47 = vmul.f32 1.442695, %v4124_v18  ;;  %v4262_v53 = vor.u32 1.1754944e-38, %v4261_v12 }
 0x55c   : > { %v6093_v24 = vpop.eup %6092  ;;  %v8237_v44 = vadd.f32 1.0, %v6091_v48  ;;  %v3243_v8 = vadd.f32 %v8135_v43, %v3242_v34 }
 0x55d   : > { %v6095_v10 = vpop.eup %6094  ;;  %v3607_v33 = vmul.f32 %v6093_v24, %v3574_v26  ;;  %vm3612_vm8 = vweird.f32 %v6093_v24 }
 0x55e   : > { %v6097_v30 = vpop.eup %6096  ;;  %v4251_v54 = vmul.f32 %v6095_v10, %v4218_v22  ;;  %6098 = vrcp.f32 %v8237_v44  ;;  %v3357_v13 = vpop.xlane.xlu1 %3356  ;;  %vm4256_vm9 = vweird.f32 %v6095_v10  ;;  %v3630_v19 = vand.u32 2147483647, %v8237_v44  ;;  %vm3613_vm11 = vmor %vm3611_vm5, %vm3612_vm8 }
 0x55f   : > { %v3608_v41 = vsub.f32 1.0, %v3607_v33  ;;  %v8245_v23 = vadd.f32 1.0, %v6097_v30  ;;  %6100 = vpow2.f32 %v3514_v46  ;;  %v3449_v11 = vadd.f32 %v8216_v15, %v3357_v13  ;;  %vm4257_vm13 = vmor %vm4255_vm6, %vm4256_vm9 }
 0x560   : > { %v4252_v55 = vsub.f32 1.0, %v4251_v54  ;;  %v4093_v0 = vadd.f32 %v8221_v58, %v3357_v13  ;;  %vm3626_vm12 = vweird.f32 %v8237_v44  ;;  %v3632_v3 = vand.u32 2147483648, %v8237_v44 }
 0x561   : > { %v3609_v29 = vmul.f32 %v6093_v24, %v3608_v41  ;;  %6102 = vrcp.f32 %v8245_v23  ;;  %v3481_v28 = vsub.f32 0.0, %v3449_v11  ;;  %v3295_v52 = vmax.f32 %v3243_v8, 0.0 }
 0x562   : > { %v4253_v62 = vmul.f32 %v6095_v10, %v4252_v55  ;;  %6104 = vpow2.f32 %v4158_v47  ;;  %vm8263_vm14 = vcmp.eq.f32.partialorder %v3630_v19, 8.507059e+37  ;;  %v4125_v39 = vsub.f32 0.0, %v4093_v0 }
 0x563   : > { %v3610_v45 = vadd.f32 %v6093_v24, %v3609_v29  ;;  %v3516_v51 = vmul.f32 1.442695, %v3481_v28  ;;  %v3633_v61 = vor.u32 1.1754944e-38, %v3632_v3  ;;  %v3244_v14 = vpop.f32.mrf.mxu3  ;;  %v4274_v63 = vand.u32 2147483647, %v8245_v23 }
 0x564   : > { %v6099_v42 = vpop.eup %6098  ;;  %v4254_v17 = vadd.f32 %v6095_v10, %v4253_v62  ;;  %v4160_v32 = vmul.f32 1.442695, %v4125_v39  ;;  %v4276_v27 = vand.u32 2147483648, %v8245_v23  ;;  %v8278_v60 = vadd.f32 %v8135_v43, %v3244_v14 }
 0x565   : > { %v3614_v49 = vsel %vm3613_vm11, %v6093_v24, %v3610_v45  ;;  %v3622_v2 = vmul.f32 %v6099_v42, %v8237_v44  ;;  %v6101_v31 = vpop.eup %6100  ;;  %6106 = vpow2.f32 %v3516_v51  ;;  %vm3627_vm15 = vweird.f32 %v6099_v42 }
 0x566   : > { %v3619_v9 = vsel %vm8241_vm7, %v3618_v57, %v3614_v49  ;;  %v4258_v4 = vsel %vm4257_vm13, %v6095_v10, %v4254_v17  ;;  %v8269_v20 = vadd.f32 1.0, %v6101_v31  ;;  %vm8282_vm1 = vmor %vm3626_vm12, %vm3627_vm15  ;;  %v3331_v25 = vmul.f32 %v8143_v7, %v3295_v52  ;;  %v3360_v59 = vpop.xlane.xlu2 %3359 }
 0x567   : > { %v6103_v16 = vpop.eup %6102  ;;  %v4263_v21 = vsel %vm8250_vm10, %v4262_v53, %v4258_v4  ;;  %v3623_v1 = vsub.f32 1.0, %v3622_v2  ;;  %vm4270_vm3 = vweird.f32 %v8245_v23  ;;  %vm8290_vm5 = vcmp.eq.f32.partialorder %v4274_v63, 8.507059e+37 }
 0x568   : > { %v4730_v36 = vsub.f32 %v3619_v9, %v4263_v21  ;;  %v4266_v26 = vmul.f32 %v6103_v16, %v8245_v23  ;;  %v6105_v22 = vpop.eup %6104  ;;  %6108 = vrcp.f32 %v8269_v20  ;;  %vm4271_vm2 = vweird.f32 %v6103_v16 }
 0x569   : > { %v3624_v5 = vmul.f32 %v6099_v42, %v3623_v1  ;;  %v8275_v56 = vadd.f32 1.0, %v6105_v22  ;;  %v4277_v30 = vor.u32 1.1754944e-38, %v4276_v27  ;;  %v3645_v54 = vand.u32 2147483647, %v8269_v20  ;;  %vm4272_vm6 = vmor %vm4270_vm3, %vm4271_vm2 }
 0x56a   : > { %6110 = vlog2.f32 %v4730_v36  ;;  %v4826_v38 = vsub.f32 1.0, %v4730_v36  ;;  %v4267_v35 = vsub.f32 1.0, %v4266_v26  ;;  %v3296_v13 = vmax.f32 %v8278_v60, 0.0 }
 0x56b   : > { %v3625_v48 = vadd.f32 %v6099_v42, %v3624_v5  ;;  %6112 = vpow2.f32 %v4160_v32  ;;  %v6107_v10 = vpop.eup %6106  ;;  %v3400_v41 = vsel %vm3345_vm4, %v3331_v25, 0.0  ;;  %v3450_v50 = vadd.f32 %v8216_v15, %v3360_v59  ;;  %v3247_v21 = vpop.f32.mrf.mxu3 }
 0x56c   : > { %6114 = vlog2.f32 %v4826_v38  ;;  %v4268_v24 = vmul.f32 %v6103_v16, %v4267_v35  ;;  %v8297_v40 = vadd.f32 1.0, %v6107_v10  ;;  %vm3641_vm7 = vweird.f32 %v8269_v20  ;;  %3401 = vadd.xlane.f32.xlu0 %v3400_v41 }
 0x56d   : > { %v3629_v33 = vsel %vm8282_vm1, %v6099_v42, %v3625_v48  ;;  %6116 = vrcp.f32 %v8275_v56  ;;  %v3647_v55 = vand.u32 2147483648, %v8269_v20  ;;  %v4289_v8 = vand.u32 2147483647, %v8275_v56 }
 0x56e   : > { %v4269_v44 = vadd.f32 %v6103_v16, %v4268_v24  ;;  %v8299_v12 = vpop.eup %6108  ;;  %v3634_v34 = vsel %vm8263_vm14, %v3633_v61, %v3629_v33  ;;  %v4291_v62 = vand.u32 2147483648, %v8275_v56  ;;  %6118 = vrcp.f32 %v8297_v40 }
 0x56f   : > { %v3637_v57 = vmul.f32 %v8299_v12, %v8269_v20  ;;  %vm3642_vm8 = vweird.f32 %v8299_v12  ;;  %vm8317_vm9 = vcmp.eq.f32.partialorder %v3645_v54, 8.507059e+37  ;;  %v4094_v0 = vadd.f32 %v8221_v58, %v3360_v59  ;;  %v3363_v20 = vpop.xlane.xlu2 %3362 }
 0x570   : > { %v6111_v23 = vpop.eup %6110  ;;  %v4273_v47 = vsel %vm4272_vm6, %v6103_v16, %v4269_v44  ;;  %v3482_v49 = vsub.f32 0.0, %v3450_v50  ;;  %v3648_v9 = vor.u32 1.1754944e-38, %v3647_v55  ;;  %vm4285_vm10 = vweird.f32 %v8275_v56  ;;  %vm8342_vm12 = vmor %vm3641_vm7, %vm3642_vm8 }
 0x571   : > { %v6113_v11 = vpop.eup %6112  ;;  %v4278_v29 = vsel %vm8290_vm5, %v4277_v30, %v4273_v47  ;;  %v3638_v45 = vsub.f32 1.0, %v3637_v57  ;;  %v4763_v17 = vmul.f32 0.6931472, %v6111_v23  ;;  %vm8327_vm11 = vcmp.eq.f32.partialorder %v4289_v8, 8.507059e+37 }
 0x572   : > { %v6115_v37 = vpop.eup %6114  ;;  %v4731_v19 = vsub.f32 %v3634_v34, %v4278_v29  ;;  %v8322_v3 = vadd.f32 1.0, %v6113_v11  ;;  %v4126_v16 = vsub.f32 0.0, %v4094_v0  ;;  %v4292_v61 = vor.u32 1.1754944e-38, %v4291_v62 }
 0x573   : > { %v6117_v42 = vpop.eup %6116  ;;  %v4859_v53 = vmul.f32 0.6931472, %v6115_v37  ;;  %v3639_v52 = vmul.f32 %v8299_v12, %v3638_v45  ;;  %v3660_v26 = vand.u32 2147483647, %v8297_v40  ;;  %v3518_v32 = vmul.f32 1.442695, %v3482_v49  ;;  %v3249_v45 = vpop.f32.mrf.mxu3 }
 0x574   : > { %6120 = vlog2.f32 %v4731_v19  ;;  %v4827_v2 = vsub.f32 1.0, %v4731_v19  ;;  %v4281_v51 = vmul.f32 %v6117_v42, %v8275_v56  ;;  %v8332_v1 = vpop.eup %6118  ;;  %vm4286_vm13 = vweird.f32 %v6117_v42 }
 0x575   : > { %v4922_v31 = vsub.f32 %v4763_v17, %v4859_v53  ;;  %v3640_v6 = vadd.f32 %v8299_v12, %v3639_v52  ;;  %v3652_v5 = vmul.f32 %v8332_v1, %v8297_v40  ;;  %vm3656_vm14 = vweird.f32 %v8297_v40  ;;  %vm4287_vm1 = vmor %vm4285_vm10, %vm4286_vm13 }
 0x576   : > { %6122 = vlog2.f32 %v4827_v2  ;;  %v4282_v39 = vsub.f32 1.0, %v4281_v51  ;;  %vm3657_vm15 = vweird.f32 %v8332_v1  ;;  %v3662_v63 = vand.u32 2147483648, %v8297_v40  ;;  %v3366_v52 = vpop.xlane.xlu0 %3365 }
 0x577   : > { %4955 = vst.msk [vmem:[%s8334_s28] sm:$0xff] %vm4954_vm0, %v4922_v31  ;;  %6124 = vrcp.f32 %v8322_v3  ;;  %v3644_v14 = vsel %vm8342_vm12, %v8299_v12, %v3640_v6  ;;  %v3653_v27 = vsub.f32 1.0, %v3652_v5  ;;  %v4162_v48 = vmul.f32 1.442695, %v4126_v16  ;;  %vm8384_vm3 = vmor %vm3656_vm14, %vm3657_vm15 }
 0x578   : > { %v4283_v22 = vmul.f32 %v6117_v42, %v4282_v39  ;;  %6126 = vpow2.f32 %v3518_v32  ;;  %v3248_v18 = vadd.f32 %v8135_v43, %v3247_v21  ;;  %v3649_v24 = vsel %vm8317_vm9, %v3648_v9, %v3644_v14 }
 0x579   : > { %v3332_v25 = vmul.f32 %v8143_v7, %v3296_v13  ;;  %v3451_v59 = vadd.f32 %v8216_v15, %v3363_v20  ;;  %v4095_v10 = vadd.f32 %v8221_v58, %v3363_v20  ;;  %v3654_v30 = vmul.f32 %v8332_v1, %v3653_v27 }
 0x57a   : > { %v6121_v38 = vpop.eup %6120  ;;  %v4284_v35 = vadd.f32 %v6117_v42, %v4283_v22  ;;  %vm8367_vm2 = vcmp.eq.f32.partialorder %v3660_v26, 8.507059e+37  ;;  %6128 = vpow2.f32 %v4162_v48  ;;  %v3297_v47 = vmax.f32 %v3248_v18, 0.0 }
 0x57b   : > { %v4765_v46 = vmul.f32 0.6931472, %v6121_v38  ;;  %v3403_v34 = vsel %vm3345_vm4, %v3332_v25, 0.0  ;;  %v3483_v13 = vsub.f32 0.0, %v3451_v59  ;;  %v3655_v50 = vadd.f32 %v8332_v1, %v3654_v30  ;;  %v3252_v54 = vpop.f32.mrf.mxu3 }
 0x57c   : > { %v6123_v33 = vpop.eup %6122  ;;  %v4288_v44 = vsel %vm4287_vm1, %v6117_v42, %v4284_v35  ;;  %3404 = vadd.xlane.f32.xlu1 %v3403_v34  ;;  %v4304_v11 = vand.u32 2147483647, %v8322_v3  ;;  %v4127_v8 = vsub.f32 0.0, %v4095_v10  ;;  %v4306_v19 = vand.u32 2147483648, %v8322_v3 }
 0x57d   : > { %v6125_v56 = vpop.eup %6124  ;;  %v4861_v12 = vmul.f32 0.6931472, %v6123_v33  ;;  %v4293_v60 = vsel %vm8327_vm11, %v4292_v61, %v4288_v44  ;;  %v3520_v29 = vmul.f32 1.442695, %v3483_v13  ;;  %v3659_v53 = vsel %vm8384_vm3, %v8332_v1, %v3655_v50 }
 0x57e   : > { %v4732_v41 = vsub.f32 %v3649_v24, %v4293_v60  ;;  %v4296_v23 = vmul.f32 %v6125_v56, %v8322_v3  ;;  %v6127_v57 = vpop.eup %6126  ;;  %vm4301_vm5 = vweird.f32 %v6125_v56  ;;  %v4164_v42 = vmul.f32 1.442695, %v4127_v8  ;;  %v3369_v60 = vpop.xlane.xlu1 %3368 }
 0x57f   : > { %v4923_v55 = vsub.f32 %v4765_v46, %v4861_v12  ;;  %v8388_v0 = vadd.f32 1.0, %v6127_v57  ;;  %v3333_v2 = vmul.f32 %v8143_v7, %v3297_v47  ;;  %v3663_v40 = vor.u32 1.1754944e-38, %v3662_v63  ;;  %v8436_v47 = vld [vmem:[%s9729_s10] ss:$0 sm:$0xff] }
 0x580   : > { %6130 = vlog2.f32 %v4732_v41  ;;  %v4828_v62 = vsub.f32 1.0, %v4732_v41  ;;  %v4297_v37 = vsub.f32 1.0, %v4296_v23  ;;  %v6129_v17 = vpop.eup %6128  ;;  %vm4300_vm6 = vweird.f32 %v8322_v3 }
 0x581   : > { %4956 = vst.msk [vmem:[%s8334_s28 + $0x8] sm:$0xff] %vm4954_vm0, %v4923_v55  ;;  %6132 = vpow2.f32 %v3520_v29  ;;  %v8397_v51 = vadd.f32 %v8135_v43, %v3249_v45  ;;  %v8399_v9 = vadd.f32 1.0, %v6129_v17  ;;  %v3406_v4 = vsel %vm3345_vm4, %v3333_v2, 0.0  ;;  %vm4302_vm7 = vmor %vm4300_vm6, %vm4301_vm5  ;;  %v8445_v29 = vld [vmem:[%s9730_s11] ss:$0 sm:$0xff] }
 0x582   : > { %6134 = vlog2.f32 %v4828_v62  ;;  %v4298_v49 = vmul.f32 %v6125_v56, %v4297_v37  ;;  %v3664_v6 = vsel %vm8367_vm2, %v3663_v40, %v3659_v53  ;;  %v4307_v7 = vor.u32 1.1754944e-38, %v4306_v19  ;;  %3407 = vadd.xlane.f32.xlu2 %v3406_v4 }
 0x583   : > { %6136 = vrcp.f32 %v8388_v0  ;;  %v3452_v3 = vadd.f32 %v8216_v15, %v3366_v52  ;;  %vm4305_vm8 = vcmp.eq.f32.partialorder %v4304_v11, 8.507059e+37  ;;  %v3298_v1 = vmax.f32 %v8397_v51, 0.0 }
 0x584   : > { %v4299_v31 = vadd.f32 %v6125_v56, %v4298_v49  ;;  %6138 = vpow2.f32 %v4164_v42  ;;  %v4096_v61 = vadd.f32 %v8221_v58, %v3366_v52  ;;  %v3675_v14 = vand.u32 2147483647, %v8388_v0 }
 0x585   : > { %6140 = vrcp.f32 %v8399_v9  ;;  %v3484_v36 = vsub.f32 0.0, %v3452_v3  ;;  %v3677_v22 = vand.u32 2147483648, %v8388_v0  ;;  %vm3671_vm9 = vweird.f32 %v8388_v0 }
 0x586   : > { %v6131_v39 = vpop.eup %6130  ;;  %v4303_v16 = vsel %vm4302_vm7, %v6125_v56, %v4299_v31  ;;  %v4319_v24 = vand.u32 2147483647, %v8399_v9  ;;  %v4321_v59 = vand.u32 2147483648, %v8399_v9  ;;  %v4128_v10 = vsub.f32 0.0, %v4096_v61 }
 0x587   : > { %v6133_v43 = vpop.eup %6132  ;;  %v4308_v21 = vsel %vm4305_vm8, %v4307_v7, %v4303_v16  ;;  %v4767_v63 = vmul.f32 0.6931472, %v6131_v39  ;;  %v3522_v35 = vmul.f32 1.442695, %v3484_v36  ;;  %vm8418_vm10 = vcmp.eq.f32.partialorder %v3675_v14, 8.507059e+37 }
 0x588   : > { %v6135_v26 = vpop.eup %6134  ;;  %v4733_v32 = vsub.f32 %v3664_v6, %v4308_v21  ;;  %v8411_v5 = vadd.f32 1.0, %v6133_v43  ;;  %v3678_v56 = vor.u32 1.1754944e-38, %v3677_v22  ;;  %vm4315_vm11 = vweird.f32 %v8399_v9 }
 0x589   : > { %v6137_v20 = vpop.eup %6136  ;;  %v4863_v38 = vmul.f32 0.6931472, %v6135_v26  ;;  %vm8428_vm13 = vcmp.eq.f32.partialorder %v4319_v24, 8.507059e+37  ;;  %v4322_v50 = vor.u32 1.1754944e-38, %v4321_v59  ;;  %v4166_v23 = vmul.f32 1.442695, %v4128_v10 }
 0x58a   : > { %v6139_v27 = vpop.eup %6138  ;;  %6142 = vlog2.f32 %v4733_v32  ;;  %v4829_v48 = vsub.f32 1.0, %v4733_v32  ;;  %v3667_v18 = vmul.f32 %v6137_v20, %v8388_v0  ;;  %vm3672_vm12 = vweird.f32 %v6137_v20 }
 0x58b   : > { %v4924_v25 = vsub.f32 %v4767_v63, %v4863_v38  ;;  %6144 = vrcp.f32 %v8411_v5  ;;  %v6141_v33 = vpop.eup %6140  ;;  %v8422_v30 = vadd.f32 1.0, %v6139_v27  ;;  %v8439_v57 = vadd.f32 %v8436_v47, %v3252_v54  ;;  %vm3673_vm15 = vmor %vm3671_vm9, %vm3672_vm12 }
 0x58c   : > { %6146 = vlog2.f32 %v4829_v48  ;;  %v3668_v46 = vsub.f32 1.0, %v3667_v18  ;;  %v4311_v12 = vmul.f32 %v6141_v33, %v8399_v9  ;;  %vm3686_vm14 = vweird.f32 %v8411_v5  ;;  %v3254_v48 = vpop.f32.mrf.mxu3 }
 0x58d   : > { %4957 = vst.msk [vmem:[%s8334_s28 + $0x10] sm:$0xff] %vm4954_vm0, %v4924_v25  ;;  %6148 = vpow2.f32 %v3522_v35  ;;  %v3334_v8 = vmul.f32 %v8445_v29, %v3298_v1  ;;  %v3453_v62 = vadd.f32 %v8216_v15, %v3369_v60  ;;  %vm4316_vm1 = vweird.f32 %v6141_v33 }
 0x58e   : > { %v3669_v34 = vmul.f32 %v6137_v20, %v3668_v46  ;;  %6150 = vrcp.f32 %v8422_v30  ;;  %v4312_v41 = vsub.f32 1.0, %v4311_v12  ;;  %v3690_v45 = vand.u32 2147483647, %v8411_v5  ;;  %vm4317_vm2 = vmor %vm4315_vm11, %vm4316_vm1 }
 0x58f   : > { %v3692_v28 = vand.u32 2147483648, %v8411_v5  ;;  %6152 = vpow2.f32 %v4166_v23  ;;  %v3409_v0 = vsel %vm3345_vm4, %v3334_v8, 0.0  ;;  %v3485_v7 = vsub.f32 0.0, %v3453_v62 }
 0x590   : > { %v6143_v55 = vpop.eup %6142  ;;  %v3670_v11 = vadd.f32 %v6137_v20, %v3669_v34  ;;  %v4313_v19 = vmul.f32 %v6141_v33, %v4312_v41  ;;  %3410 = vadd.xlane.f32.xlu0 %v3409_v0  ;;  %v4097_v3 = vadd.f32 %v8221_v58, %v3369_v60  ;;  %vm8463_vm3 = vcmp.eq.f32.partialorder %v3690_v45, 8.507059e+37 }
 0x591   : > { %v6145_v37 = vpop.eup %6144  ;;  %v4769_v17 = vmul.f32 0.6931472, %v6143_v55  ;;  %v3693_v61 = vor.u32 1.1754944e-38, %v3692_v28  ;;  %v4334_v32 = vand.u32 2147483647, %v8422_v30  ;;  %vm4330_vm8 = vweird.f32 %v8422_v30 }
 0x592   : > { %v6147_v42 = vpop.eup %6146  ;;  %v3674_v53 = vsel %vm3673_vm15, %v6137_v20, %v3670_v11  ;;  %v3682_v49 = vmul.f32 %v6145_v37, %v8411_v5  ;;  %v4314_v51 = vadd.f32 %v6141_v33, %v4313_v19  ;;  %vm3687_vm5 = vweird.f32 %v6145_v37 }
 0x593   : > { %v6149_v2 = vpop.eup %6148  ;;  %v4865_v52 = vmul.f32 0.6931472, %v6147_v42  ;;  %v3679_v40 = vsel %vm8418_vm10, %v3678_v56, %v3674_v53  ;;  %v4336_v20 = vand.u32 2147483648, %v8422_v30  ;;  %v3524_v63 = vmul.f32 1.442695, %v3485_v7  ;;  %vm3688_vm6 = vmor %vm3686_vm14, %vm3687_vm5 }
 0x594   : > { %v6151_v31 = vpop.eup %6150  ;;  %v3683_v4 = vsub.f32 1.0, %v3682_v49  ;;  %v8460_v6 = vadd.f32 1.0, %v6149_v2  ;;  %v4318_v16 = vsel %vm4317_vm2, %v6141_v33, %v4314_v51  ;;  %v4129_v38 = vsub.f32 0.0, %v4097_v3 }
 0x595   : > { %v4925_v39 = vsub.f32 %v4769_v17, %v4865_v52  ;;  %v4326_v21 = vmul.f32 %v6151_v31, %v8422_v30  ;;  %v4323_v1 = vsel %vm8428_vm13, %v4322_v50, %v4318_v16  ;;  %v6153_v14 = vpop.eup %6152  ;;  %vm4331_vm7 = vweird.f32 %v6151_v31  ;;  %v3372_v30 = vpop.xlane.xlu2 %3371 }
 0x596   : > { %v3684_v9 = vmul.f32 %v6145_v37, %v3683_v4  ;;  %6154 = vrcp.f32 %v8460_v6  ;;  %v4734_v36 = vsub.f32 %v3679_v40, %v4323_v1  ;;  %v8478_v24 = vadd.f32 1.0, %v6153_v14  ;;  %vm4332_vm9 = vmor %vm4330_vm8, %vm4331_vm7  ;;  %v3257_v16 = vpop.f32.mrf.mxu3  ;;  %v3375_v14 = vpop.xlane.xlu0 %3374 }
 0x597   : > { %4958 = vst.msk [vmem:[%s8334_s28 + $0x18] sm:$0xff] %vm4954_vm0, %v4925_v39  ;;  %v4327_v26 = vsub.f32 1.0, %v4326_v21  ;;  %v3299_v59 = vmax.f32 %v8439_v57, 0.0  ;;  %v4168_v10 = vmul.f32 1.442695, %v4129_v38  ;;  %v4337_v46 = vor.u32 1.1754944e-38, %v4336_v20 }
 0x598   : > { %v3685_v22 = vadd.f32 %v6145_v37, %v3684_v9  ;;  %6156 = vlog2.f32 %v4734_v36  ;;  %v4830_v35 = vsub.f32 1.0, %v4734_v36  ;;  %v3255_v44 = vadd.f32 %v8436_v47, %v3254_v48 }
 0x599   : > { %v4328_v27 = vmul.f32 %v6151_v31, %v4327_v26  ;;  %6158 = vpow2.f32 %v3524_v63  ;;  %vm4335_vm10 = vcmp.eq.f32.partialorder %v4334_v32, 8.507059e+37  ;;  %vm3701_vm11 = vweird.f32 %v8460_v6 }
 0x59a   : > { %v3689_v18 = vsel %vm3688_vm6, %v6145_v37, %v3685_v22  ;;  %6160 = vlog2.f32 %v4830_v35  ;;  %v3705_v60 = vand.u32 2147483647, %v8460_v6  ;;  %v3335_v50 = vmul.f32 %v8445_v29, %v3299_v59 }
 0x59b   : > { %v4329_v25 = vadd.f32 %v6151_v31, %v4328_v27  ;;  %v3694_v5 = vsel %vm8463_vm3, %v3693_v61, %v3689_v18  ;;  %6162 = vrcp.f32 %v8478_v24  ;;  %v3454_v23 = vadd.f32 %v8216_v15, %v3372_v30 }
 0x59c   : > { %v8481_v33 = vpop.eup %6154  ;;  %6164 = vpow2.f32 %v4168_v10  ;;  %v3707_v11 = vand.u32 2147483648, %v8460_v6  ;;  %v3300_v8 = vmax.f32 %v3255_v44, 0.0  ;;  %v4098_v62 = vadd.f32 %v8221_v58, %v3372_v30 }
 0x59d   : > { %v4333_v54 = vsel %vm4332_vm9, %v6151_v31, %v4329_v25  ;;  %v3697_v56 = vmul.f32 %v8481_v33, %v8460_v6  ;;  %v3412_v53 = vsel %vm3345_vm4, %v3335_v50, 0.0  ;;  %v3486_v49 = vsub.f32 0.0, %v3454_v23 }
 0x59e   : > { %v4338_v12 = vsel %vm4335_vm10, %v4337_v46, %v4333_v54  ;;  %v6157_v34 = vpop.eup %6156  ;;  %v4130_v2 = vsub.f32 0.0, %v4098_v62  ;;  %vm3702_vm12 = vweird.f32 %v8481_v33  ;;  %3413 = vadd.xlane.f32.xlu1 %v3412_v53  ;;  %v4349_v31 = vand.u32 2147483647, %v8478_v24 }
 0x59f   : > { %v4735_v13 = vsub.f32 %v3694_v5, %v4338_v12  ;;  %v3698_v41 = vsub.f32 1.0, %v3697_v56  ;;  %v6159_v57 = vpop.eup %6158  ;;  %v4771_v55 = vmul.f32 0.6931472, %v6157_v34  ;;  %v4351_v4 = vand.u32 2147483648, %v8478_v24  ;;  %vm8516_vm14 = vmor %vm3701_vm11, %vm3702_vm12 }
 0x5a0   : > { %v6161_v37 = vpop.eup %6160  ;;  %v8496_v28 = vadd.f32 1.0, %v6159_v57  ;;  %vm8505_vm13 = vcmp.eq.f32.partialorder %v3705_v60, 8.507059e+37  ;;  %v3336_v43 = vmul.f32 %v8445_v29, %v3300_v8  ;;  %v3708_v1 = vor.u32 1.1754944e-38, %v3707_v11 }
 0x5a1   : > { %6166 = vlog2.f32 %v4735_v13  ;;  %v4831_v19 = vsub.f32 1.0, %v4735_v13  ;;  %v3699_v45 = vmul.f32 %v8481_v33, %v3698_v41  ;;  %v6163_v42 = vpop.eup %6162  ;;  %v4867_v17 = vmul.f32 0.6931472, %v6161_v37  ;;  %v3259_v37 = vpop.f32.mrf.mxu3 }
 0x5a2   : > { %v6165_v52 = vpop.eup %6164  ;;  %v4341_v51 = vmul.f32 %v6163_v42, %v8478_v24  ;;  %vm4345_vm15 = vweird.f32 %v8478_v24  ;;  %v3526_v9 = vmul.f32 1.442695, %v3486_v49  ;;  %v4170_v36 = vmul.f32 1.442695, %v4130_v2 }
 0x5a3   : > { %6168 = vlog2.f32 %v4831_v19  ;;  %v3700_v40 = vadd.f32 %v8481_v33, %v3699_v45  ;;  %v4926_v0 = vsub.f32 %v4771_v55, %v4867_v17  ;;  %v8509_v39 = vadd.f32 1.0, %v6165_v52 }
 0x5a4   : > { %6170 = vrcp.f32 %v8496_v28  ;;  %v4342_v3 = vsub.f32 1.0, %v4341_v51  ;;  %vm4346_vm1 = vweird.f32 %v6163_v42  ;;  %vm8525_vm2 = vcmp.eq.f32.partialorder %v4349_v31, 8.507059e+37  ;;  %v3378_v51 = vpop.xlane.xlu1 %3377 }
 0x5a5   : > { %4959 = vst.msk [vmem:[%s8334_s28 + $0x20] sm:$0xff] %vm4954_vm0, %v4926_v0  ;;  %v3704_v26 = vsel %vm8516_vm14, %v8481_v33, %v3700_v40  ;;  %6172 = vrcp.f32 %v8509_v39  ;;  %v4352_v22 = vor.u32 1.1754944e-38, %v4351_v4  ;;  %v3258_v20 = vadd.f32 %v8436_v47, %v3257_v16  ;;  %vm4347_vm5 = vmor %vm4345_vm15, %vm4346_vm1 }
 0x5a6   : > { %v4343_v32 = vmul.f32 %v6163_v42, %v4342_v3  ;;  %6174 = vpow2.f32 %v3526_v9  ;;  %vm3716_vm3 = vweird.f32 %v8496_v28  ;;  %v3415_v35 = vsel %vm3345_vm4, %v3336_v43, 0.0 }
 0x5a7   : > { %v6167_v61 = vpop.eup %6166  ;;  %6176 = vpow2.f32 %v4170_v36  ;;  %v3709_v25 = vsel %vm8505_vm13, %v3708_v1, %v3704_v26  ;;  %3416 = vadd.xlane.f32.xlu2 %v3415_v35  ;;  %v3455_v59 = vadd.f32 %v8216_v15, %v3375_v14  ;;  %v3720_v5 = vand.u32 2147483647, %v8496_v28 }
 0x5a8   : > { %v4344_v38 = vadd.f32 %v6163_v42, %v4343_v32  ;;  %v4773_v48 = vmul.f32 0.6931472, %v6167_v61  ;;  %v4099_v46 = vadd.f32 %v8221_v58, %v3375_v14  ;;  %v3722_v54 = vand.u32 2147483648, %v8496_v28 }
 0x5a9   : > { %v6169_v63 = vpop.eup %6168  ;;  %v3487_v56 = vsub.f32 0.0, %v3455_v59  ;;  %v3301_v34 = vmax.f32 %v3258_v20, 0.0  ;;  %v4364_v23 = vand.u32 2147483647, %v8509_v39  ;;  %v4366_v45 = vand.u32 2147483648, %v8509_v39  ;;  %v3262_v59 = vpop.f32.mrf.mxu3 }
 0x5aa   : > { %v6171_v27 = vpop.eup %6170  ;;  %v4869_v18 = vmul.f32 0.6931472, %v6169_v63  ;;  %v4348_v10 = vsel %vm4347_vm5, %v6163_v42, %v4344_v38  ;;  %v4131_v13 = vsub.f32 0.0, %v4099_v46  ;;  %v3260_v40 = vadd.f32 %v8436_v47, %v3259_v37 }
 0x5ab   : > { %v3712_v33 = vmul.f32 %v6171_v27, %v8496_v28  ;;  %v4353_v30 = vsel %vm8525_vm2, %v4352_v22, %v4348_v10  ;;  %v6173_v24 = vpop.eup %6172  ;;  %vm3717_vm6 = vweird.f32 %v6171_v27  ;;  %v3528_v57 = vmul.f32 1.442695, %v3487_v56 }
 0x5ac   : > { %v4927_v44 = vsub.f32 %v4773_v48, %v4869_v18  ;;  %v4736_v12 = vsub.f32 %v3709_v25, %v4353_v30  ;;  %v6175_v41 = vpop.eup %6174  ;;  %v4356_v50 = vmul.f32 %v6173_v24, %v8509_v39  ;;  %v4172_v53 = vmul.f32 1.442695, %v4131_v13  ;;  %vm8557_vm7 = vmor %vm3716_vm3, %vm3717_vm6 }
 0x5ad   : > { %v3713_v60 = vsub.f32 1.0, %v3712_v33  ;;  %v6177_v55 = vpop.eup %6176  ;;  %v8548_v62 = vadd.f32 1.0, %v6175_v41  ;;  %v3337_v49 = vmul.f32 %v8445_v29, %v3301_v34  ;;  %vm4361_vm8 = vweird.f32 %v6173_v24 }
 0x5ae   : > { %4960 = vst.msk [vmem:[%s8334_s28 + $0x28] sm:$0xff] %vm4954_vm0, %v4927_v44  ;;  %6178 = vlog2.f32 %v4736_v12  ;;  %v4832_v11 = vsub.f32 1.0, %v4736_v12  ;;  %v4357_v19 = vsub.f32 1.0, %v4356_v50  ;;  %v8551_v42 = vadd.f32 1.0, %v6177_v55 }
 0x5af   : > { %v3714_v8 = vmul.f32 %v6171_v27, %v3713_v60  ;;  %6180 = vpow2.f32 %v3528_v57  ;;  %vm3721_vm9 = vcmp.eq.f32.partialorder %v3720_v5, 8.507059e+37  ;;  %v3723_v31 = vor.u32 1.1754944e-38, %v3722_v54 }
 0x5b0   : > { %6182 = vlog2.f32 %v4832_v11  ;;  %v4358_v52 = vmul.f32 %v6173_v24, %v4357_v19  ;;  %vm4360_vm10 = vweird.f32 %v8509_v39  ;;  %v4367_v28 = vor.u32 1.1754944e-38, %v4366_v45  ;;  %v3381_v19 = vpop.xlane.xlu2 %3380 }
 0x5b1   : > { %v3715_v17 = vadd.f32 %v6171_v27, %v3714_v8  ;;  %6184 = vrcp.f32 %v8548_v62  ;;  %v3735_v7 = vand.u32 2147483647, %v8548_v62  ;;  %vm4362_vm11 = vmor %vm4360_vm10, %vm4361_vm8  ;;  %v3418_v43 = vsel %vm3345_vm4, %v3337_v49, 0.0 }
 0x5b2   : > { %6186 = vrcp.f32 %v8551_v42  ;;  %v4359_v4 = vadd.f32 %v6173_v24, %v4358_v52  ;;  %v3456_v21 = vadd.f32 %v8216_v15, %v3378_v51  ;;  %vm4365_vm12 = vcmp.eq.f32.partialorder %v4364_v23, 8.507059e+37  ;;  %3419 = vadd.xlane.f32.xlu0 %v3418_v43  ;;  %v3387_v43 = vpop.xlane.xlu1 %3386 }
 0x5b3   : > { %v3719_v0 = vsel %vm8557_vm7, %v6171_v27, %v3715_v17  ;;  %6188 = vpow2.f32 %v4172_v53  ;;  %v3302_v36 = vmax.f32 %v3260_v40, 0.0  ;;  %v4100_v61 = vadd.f32 %v8221_v58, %v3378_v51 }
 0x5b4   : > { %v6179_v3 = vpop.eup %6178  ;;  %v3724_v16 = vsel %vm3721_vm9, %v3723_v31, %v3719_v0  ;;  %v4363_v9 = vsel %vm4362_vm11, %v6173_v24, %v4359_v4  ;;  %vm3731_vm13 = vweird.f32 %v8548_v62  ;;  %v3737_v32 = vand.u32 2147483648, %v8548_v62  ;;  %v8621_v4 = vld [vmem:[%s9732_s13] ss:$0 sm:$0xff] }
 0x5b5   : > { %v6181_v1 = vpop.eup %6180  ;;  %v4368_v39 = vsel %vm4365_vm12, %v4367_v28, %v4363_v9  ;;  %v4775_v22 = vmul.f32 0.6931472, %v6179_v3  ;;  %vm4375_vm14 = vweird.f32 %v8551_v42  ;;  %v3488_v15 = vsub.f32 0.0, %v3456_v21 }
 0x5b6   : > { %v6183_v26 = vpop.eup %6182  ;;  %v8573_v14 = vadd.f32 1.0, %v6181_v1  ;;  %v4737_v63 = vsub.f32 %v3724_v16, %v4368_v39  ;;  %vm8577_vm15 = vcmp.eq.f32.partialorder %v3735_v7, 8.507059e+37  ;;  %v4132_v27 = vsub.f32 0.0, %v4100_v61 }
 0x5b7   : > { %v6185_v6 = vpop.eup %6184  ;;  %v4871_v20 = vmul.f32 0.6931472, %v6183_v26  ;;  %v3738_v5 = vor.u32 1.1754944e-38, %v3737_v32  ;;  %v4379_v46 = vand.u32 2147483647, %v8551_v42  ;;  %v4381_v44 = vand.u32 2147483648, %v8551_v42  ;;  %v3264_v26 = vpop.f32.mrf.mxu3 }
 0x5b8   : > { %v6187_v38 = vpop.eup %6186  ;;  %v3727_v35 = vmul.f32 %v6185_v6, %v8548_v62  ;;  %6190 = vrcp.f32 %v8573_v14  ;;  %v4833_v18 = vsub.f32 1.0, %v4737_v63  ;;  %v3530_v56 = vmul.f32 1.442695, %v3488_v15 }
 0x5b9   : > { %v4928_v48 = vsub.f32 %v4775_v22, %v4871_v20  ;;  %6192 = vlog2.f32 %v4737_v63  ;;  %v4371_v25 = vmul.f32 %v6187_v38, %v8551_v42  ;;  %v6189_v10 = vpop.eup %6188  ;;  %vm3732_vm1 = vweird.f32 %v6185_v6  ;;  %v8615_v42 = vld [vmem:[%s9731_s12] ss:$0 sm:$0xff] }
 0x5ba   : > { %v3728_v33 = vsub.f32 1.0, %v3727_v35  ;;  %6194 = vlog2.f32 %v4833_v18  ;;  %v8587_v54 = vadd.f32 1.0, %v6189_v10  ;;  %v4174_v12 = vmul.f32 1.442695, %v4132_v27  ;;  %vm3733_vm5 = vmor %vm3731_vm13, %vm3732_vm1  ;;  %v3384_v18 = vpop.xlane.xlu0 %3383 }
 0x5bb   : > { %4961 = vst.msk [vmem:[%s8334_s28 + $0x30] sm:$0xff] %vm4954_vm0, %v4928_v48  ;;  %v4372_v30 = vsub.f32 1.0, %v4371_v25  ;;  %v3263_v60 = vadd.f32 %v8436_v47, %v3262_v59  ;;  %vm4376_vm2 = vweird.f32 %v6187_v38  ;;  %v3338_v13 = vmul.f32 %v8445_v29, %v3302_v36 }
 0x5bc   : > { %v3729_v24 = vmul.f32 %v6185_v6, %v3728_v33  ;;  %6196 = vrcp.f32 %v8587_v54  ;;  %vm8594_vm3 = vcmp.eq.f32.partialorder %v4379_v46, 8.507059e+37  ;;  %v4382_v57 = vor.u32 1.1754944e-38, %v4381_v44  ;;  %vm4377_vm7 = vmor %vm4375_vm14, %vm4376_vm2 }
 0x5bd   : > { %v4373_v34 = vmul.f32 %v6187_v38, %v4372_v30  ;;  %6198 = vpow2.f32 %v3530_v56  ;;  %vm3746_vm6 = vweird.f32 %v8573_v14  ;;  %v3750_v37 = vand.u32 2147483647, %v8573_v14 }
 0x5be   : > { %v8592_v41 = vpop.eup %6190  ;;  %v3730_v50 = vadd.f32 %v6185_v6, %v3729_v24  ;;  %6200 = vpow2.f32 %v4174_v12  ;;  %v3303_v53 = vmax.f32 %v3263_v60, 0.0  ;;  %v3421_v40 = vsel %vm3345_vm4, %v3338_v13, 0.0 }
 0x5bf   : > { %v6193_v55 = vpop.eup %6192  ;;  %v4374_v11 = vadd.f32 %v6187_v38, %v4373_v34  ;;  %v3742_v8 = vmul.f32 %v8592_v41, %v8573_v14  ;;  %3422 = vadd.xlane.f32.xlu1 %v3421_v40  ;;  %v3457_v31 = vadd.f32 %v8615_v42, %v3381_v19  ;;  %v4101_v28 = vadd.f32 %v8621_v4, %v3381_v19 }
 0x5c0   : > { %v4777_v45 = vmul.f32 0.6931472, %v6193_v55  ;;  %v3734_v17 = vsel %vm3733_vm5, %v6185_v6, %v3730_v50  ;;  %v6195_v49 = vpop.eup %6194  ;;  %vm8625_vm8 = vcmp.eq.f32.partialorder %v3750_v37, 8.507059e+37  ;;  %v3752_v21 = vand.u32 2147483648, %v8573_v14 }
 0x5c1   : > { %v3739_v62 = vsel %vm8577_vm15, %v3738_v5, %v3734_v17  ;;  %v4378_v2 = vsel %vm4377_vm7, %v6187_v38, %v4374_v11  ;;  %v3743_v52 = vsub.f32 1.0, %v3742_v8  ;;  %v4873_v51 = vmul.f32 0.6931472, %v6195_v49 }
 0x5c2   : > { %v4383_v0 = vsel %vm8594_vm3, %v4382_v57, %v4378_v2  ;;  %v6197_v7 = vpop.eup %6196  ;;  %vm3747_vm9 = vweird.f32 %v8592_v41  ;;  %v3489_v61 = vsub.f32 0.0, %v3457_v31  ;;  %v4133_v15 = vsub.f32 0.0, %v4101_v28 }
 0x5c3   : > { %v4738_v3 = vsub.f32 %v3739_v62, %v4383_v0  ;;  %v3744_v16 = vmul.f32 %v8592_v41, %v3743_v52  ;;  %v6199_v1 = vpop.eup %6198  ;;  %v4929_v9 = vsub.f32 %v4777_v45, %v4873_v51  ;;  %v4386_v36 = vmul.f32 %v6197_v7, %v8587_v54  ;;  %vm8642_vm10 = vmor %vm3746_vm6, %vm3747_vm9  ;;  %v3267_v52 = vpop.f32.mrf.mxu3 }
 0x5c4   : > { %v8633_v6 = vadd.f32 1.0, %v6199_v1  ;;  %v6201_v22 = vpop.eup %6200  ;;  %v3532_v63 = vmul.f32 1.442695, %v3489_v61  ;;  %v3339_v38 = vmul.f32 %v8445_v29, %v3303_v53  ;;  %v4394_v58 = vand.u32 2147483647, %v8587_v54 }
 0x5c5   : > { %6202 = vlog2.f32 %v4738_v3  ;;  %v4834_v39 = vsub.f32 1.0, %v4738_v3  ;;  %v3745_v32 = vadd.f32 %v8592_v41, %v3744_v16  ;;  %4962 = vst.msk [vmem:[%s8334_s28 + $0x38] sm:$0xff] %vm4954_vm0, %v4929_v9  ;;  %v4387_v20 = vsub.f32 1.0, %v4386_v36 }
 0x5c6   : > { %v4396_v27 = vand.u32 2147483648, %v8587_v54  ;;  %v3265_v48 = vadd.f32 %v8436_v47, %v3264_v26  ;;  %vm4391_vm11 = vweird.f32 %v6197_v7  ;;  %v3753_v14 = vor.u32 1.1754944e-38, %v3752_v21 }
 0x5c7   : > { %6204 = vlog2.f32 %v4834_v39  ;;  %v3749_v25 = vsel %vm8642_vm10, %v8592_v41, %v3745_v32  ;;  %v4388_v59 = vmul.f32 %v6197_v7, %v4387_v20  ;;  %v8653_v10 = vadd.f32 1.0, %v6201_v22 }
 0x5c8   : > { %6206 = vrcp.f32 %v8633_v6  ;;  %v4176_v33 = vmul.f32 1.442695, %v4133_v15  ;;  %vm4390_vm12 = vweird.f32 %v8587_v54  ;;  %v3424_v46 = vsel %vm3345_vm4, %v3339_v38, 0.0 }
 0x5c9   : > { %6208 = vpow2.f32 %v3532_v63  ;;  %v4389_v5 = vadd.f32 %v6197_v7, %v4388_v59  ;;  %v3458_v44 = vadd.f32 %v8615_v42, %v3384_v18  ;;  %v3754_v56 = vsel %vm8625_vm8, %v3753_v14, %v3749_v25  ;;  %vm4392_vm13 = vmor %vm4390_vm12, %vm4391_vm11  ;;  %3425 = vadd.xlane.f32.xlu2 %v3424_v46 }
 0x5ca   : > { %v4397_v24 = vor.u32 1.1754944e-38, %v4396_v27  ;;  %6210 = vrcp.f32 %v8653_v10  ;;  %v3304_v12 = vmax.f32 %v3265_v48, 0.0  ;;  %vm4395_vm14 = vcmp.eq.f32.partialorder %v4394_v58, 8.507059e+37 }
 0x5cb   : > { %v6203_v30 = vpop.eup %6202  ;;  %v4393_v60 = vsel %vm4392_vm13, %v6197_v7, %v4389_v5  ;;  %6212 = vpow2.f32 %v4176_v33  ;;  %v3490_v34 = vsub.f32 0.0, %v3458_v44  ;;  %vm3761_vm15 = vweird.f32 %v8633_v6 }
 0x5cc   : > { %v4398_v54 = vsel %vm4395_vm14, %v4397_v24, %v4393_v60  ;;  %v3765_v41 = vand.u32 2147483647, %v8633_v6  ;;  %v4102_v50 = vadd.f32 %v8621_v4, %v3384_v18  ;;  %v4779_v57 = vmul.f32 0.6931472, %v6203_v30 }
 0x5cd   : > { %v6205_v13 = vpop.eup %6204  ;;  %v4739_v11 = vsub.f32 %v3754_v56, %v4398_v54  ;;  %v3534_v8 = vmul.f32 1.442695, %v3490_v34  ;;  %v3767_v45 = vand.u32 2147483648, %v8633_v6  ;;  %v3340_v53 = vmul.f32 %v8445_v29, %v3304_v12 }
 0x5ce   : > { %v6207_v23 = vpop.eup %6206  ;;  %v4875_v55 = vmul.f32 0.6931472, %v6205_v13  ;;  %v4134_v17 = vsub.f32 0.0, %v4102_v50  ;;  %vm8669_vm1 = vcmp.eq.f32.partialorder %v3765_v41, 8.507059e+37  ;;  %v4409_v3 = vand.u32 2147483647, %v8653_v10 }
 0x5cf   : > { %v6209_v37 = vpop.eup %6208  ;;  %v3757_v19 = vmul.f32 %v6207_v23, %v8633_v6  ;;  %6214 = vlog2.f32 %v4739_v11  ;;  %v4835_v62 = vsub.f32 1.0, %v4739_v11  ;;  %v4411_v16 = vand.u32 2147483648, %v8653_v10 }
 0x5d0   : > { %v4930_v49 = vsub.f32 %v4779_v57, %v4875_v55  ;;  %v8667_v2 = vadd.f32 1.0, %v6209_v37  ;;  %v6211_v40 = vpop.eup %6210  ;;  %6216 = vpow2.f32 %v3534_v8  ;;  %v4178_v31 = vmul.f32 1.442695, %v4134_v17 }
 0x5d1   : > { %v3758_v51 = vsub.f32 1.0, %v3757_v19  ;;  %v6213_v28 = vpop.eup %6212  ;;  %6218 = vlog2.f32 %v4835_v62  ;;  %v4401_v7 = vmul.f32 %v6211_v40, %v8653_v10  ;;  %vm3762_vm2 = vweird.f32 %v6207_v23 }
 0x5d2   : > { %4963 = vst.msk [vmem:[%s8334_s28 + $0x40] sm:$0xff] %vm4954_vm0, %v4930_v49  ;;  %6220 = vrcp.f32 %v8667_v2  ;;  %v8680_v1 = vadd.f32 %v8436_v47, %v3267_v52  ;;  %v8682_v36 = vadd.f32 1.0, %v6213_v28  ;;  %v3427_v61 = vsel %vm3345_vm4, %v3340_v53, 0.0  ;;  %vm8689_vm5 = vmor %vm3761_vm15, %vm3762_vm2  ;;  %v3269_v53 = vpop.f32.mrf.mxu3 }
 0x5d3   : > { %v3759_v21 = vmul.f32 %v6207_v23, %v3758_v51  ;;  %v4402_v9 = vsub.f32 1.0, %v4401_v7  ;;  %6222 = vpow2.f32 %v4178_v31  ;;  %v3768_v39 = vor.u32 1.1754944e-38, %v3767_v45  ;;  %3428 = vadd.xlane.f32.xlu0 %v3427_v61  ;;  %v3390_v7 = vpop.xlane.xlu2 %3389 }
 0x5d4   : > { %vm4405_vm3 = vweird.f32 %v8653_v10  ;;  %v3459_v32 = vadd.f32 %v8615_v42, %v3387_v43  ;;  %vm4406_vm6 = vweird.f32 %v6211_v40  ;;  %vm8693_vm7 = vcmp.eq.f32.partialorder %v4409_v3, 8.507059e+37 }
 0x5d5   : > { %v3760_v26 = vadd.f32 %v6207_v23, %v3759_v21  ;;  %v6215_v22 = vpop.eup %6214  ;;  %v4403_v63 = vmul.f32 %v6211_v40, %v4402_v9  ;;  %6224 = vrcp.f32 %v8682_v36  ;;  %v4412_v58 = vor.u32 1.1754944e-38, %v4411_v16  ;;  %vm4407_vm8 = vmor %vm4405_vm3, %vm4406_vm6 }
 0x5d6   : > { %v6217_v38 = vpop.eup %6216  ;;  %v3780_v27 = vand.u32 2147483647, %v8667_v2  ;;  %v3491_v6 = vsub.f32 0.0, %v3459_v32  ;;  %v3782_v25 = vand.u32 2147483648, %v8667_v2  ;;  %v3305_v14 = vmax.f32 %v8680_v1, 0.0 }
 0x5d7   : > { %v3764_v35 = vsel %vm8689_vm5, %v6207_v23, %v3760_v26  ;;  %v6219_v48 = vpop.eup %6218  ;;  %v4404_v18 = vadd.f32 %v6211_v40, %v4403_v63  ;;  %v8702_v59 = vadd.f32 1.0, %v6217_v38  ;;  %v4781_v5 = vmul.f32 0.6931472, %v6215_v22 }
 0x5d8   : > { %v6221_v33 = vpop.eup %6220  ;;  %v4877_v46 = vmul.f32 0.6931472, %v6219_v48  ;;  %v3769_v44 = vsel %vm8669_vm1, %v3768_v39, %v3764_v35  ;;  %v3536_v30 = vmul.f32 1.442695, %v3491_v6  ;;  %vm3776_vm9 = vweird.f32 %v8667_v2 }
 0x5d9   : > { %v6223_v56 = vpop.eup %6222  ;;  %v4408_v24 = vsel %vm4407_vm8, %v6211_v40, %v4404_v18  ;;  %v3772_v12 = vmul.f32 %v6221_v33, %v8667_v2  ;;  %6226 = vrcp.f32 %v8702_v59  ;;  %vm8715_vm10 = vcmp.eq.f32.partialorder %v3780_v27, 8.507059e+37 }
 0x5da   : > { %v4931_v60 = vsub.f32 %v4781_v5, %v4877_v46  ;;  %v4413_v34 = vsel %vm8693_vm7, %v4412_v58, %v4408_v24  ;;  %v4424_v10 = vand.u32 2147483647, %v8682_v36  ;;  %v8720_v23 = vadd.f32 1.0, %v6223_v56 }
 0x5db   : > { %v6225_v54 = vpop.eup %6224  ;;  %v4740_v41 = vsub.f32 %v3769_v44, %v4413_v34  ;;  %v3773_v50 = vsub.f32 1.0, %v3772_v12  ;;  %v4103_v57 = vadd.f32 %v8621_v4, %v3387_v43  ;;  %v3783_v55 = vor.u32 1.1754944e-38, %v3782_v25 }
 0x5dc   : > { %4964 = vst.msk [vmem:[%s8334_s28 + $0x48] sm:$0xff] %vm4954_vm0, %v4931_v60  ;;  %v4416_v11 = vmul.f32 %v6225_v54, %v8682_v36  ;;  %v4426_v8 = vand.u32 2147483648, %v8682_v36  ;;  %6228 = vpow2.f32 %v3536_v30  ;;  %vm3777_vm11 = vweird.f32 %v6221_v33  ;;  %v3272_v60 = vpop.f32.mrf.mxu3 }
 0x5dd   : > { %6230 = vlog2.f32 %v4740_v41  ;;  %v4836_v37 = vsub.f32 1.0, %v4740_v41  ;;  %v3774_v19 = vmul.f32 %v6221_v33, %v3773_v50  ;;  %vm4420_vm12 = vweird.f32 %v8682_v36  ;;  %vm8738_vm14 = vmor %vm3776_vm9, %vm3777_vm11 }
 0x5de   : > { %v4417_v45 = vsub.f32 1.0, %v4416_v11  ;;  %v3795_v17 = vand.u32 2147483647, %v8702_v59  ;;  %6232 = vrcp.f32 %v8720_v23  ;;  %vm8732_vm13 = vcmp.eq.f32.partialorder %v4424_v10, 8.507059e+37  ;;  %v3393_v10 = vpop.xlane.xlu0 %3392 }
 0x5df   : > { %v8730_v49 = vpop.eup %6226  ;;  %6234 = vlog2.f32 %v4836_v37  ;;  %v3775_v62 = vadd.f32 %v6221_v33, %v3774_v19  ;;  %v4135_v40 = vsub.f32 0.0, %v4103_v57  ;;  %vm4421_vm15 = vweird.f32 %v6225_v54 }
 0x5e0   : > { %v4418_v0 = vmul.f32 %v6225_v54, %v4417_v45  ;;  %v4427_v31 = vor.u32 1.1754944e-38, %v4426_v8  ;;  %v3787_v28 = vmul.f32 %v8730_v49, %v8702_v59  ;;  %vm3791_vm1 = vweird.f32 %v8702_v59  ;;  %vm4422_vm3 = vmor %vm4420_vm12, %vm4421_vm15 }
 0x5e1   : > { %v3779_v3 = vsel %vm8738_vm14, %v6221_v33, %v3775_v62  ;;  %v3797_v16 = vand.u32 2147483648, %v8702_v59  ;;  %v4180_v43 = vmul.f32 1.442695, %v4135_v40  ;;  %vm8748_vm2 = vcmp.eq.f32.partialorder %v3795_v17, 8.507059e+37 }
 0x5e2   : > { %v6229_v2 = vpop.eup %6228  ;;  %v4419_v21 = vadd.f32 %v6225_v54, %v4418_v0  ;;  %v3788_v1 = vsub.f32 1.0, %v3787_v28  ;;  %v3270_v61 = vadd.f32 %v8436_v47, %v3269_v53  ;;  %v3341_v26 = vmul.f32 %v8445_v29, %v3305_v14 }
 0x5e3   : > { %v6231_v39 = vpop.eup %6230  ;;  %v3784_v32 = vsel %vm8715_vm10, %v3783_v55, %v3779_v3  ;;  %v8759_v22 = vadd.f32 1.0, %v6229_v2  ;;  %6236 = vpow2.f32 %v4180_v43  ;;  %v3460_v20 = vadd.f32 %v8615_v42, %v3390_v7 }
 0x5e4   : > { %v6233_v63 = vpop.eup %6232  ;;  %v4423_v15 = vsel %vm4422_vm3, %v6225_v54, %v4419_v21  ;;  %v3789_v38 = vmul.f32 %v8730_v49, %v3788_v1  ;;  %vm3792_vm5 = vweird.f32 %v8730_v49  ;;  %v3430_v35 = vsel %vm3345_vm4, %v3341_v26, 0.0 }
 0x5e5   : > { %v6235_v58 = vpop.eup %6234  ;;  %v4428_v27 = vsel %vm8732_vm13, %v4427_v31, %v4423_v15  ;;  %v3798_v6 = vor.u32 1.1754944e-38, %v3797_v16  ;;  %v4431_v36 = vmul.f32 %v6233_v63, %v8720_v23  ;;  %6238 = vrcp.f32 %v8759_v22  ;;  %3431 = vadd.xlane.f32.xlu1 %v3430_v35  ;;  %vm8772_vm6 = vmor %vm3791_vm1, %vm3792_vm5  ;;  %v3396_v35 = vpop.xlane.xlu1 %3395 }
 0x5e6   : > { %v4783_v48 = vmul.f32 0.6931472, %v6231_v39  ;;  %v4879_v18 = vmul.f32 0.6931472, %v6235_v58  ;;  %v4741_v25 = vsub.f32 %v3784_v32, %v4428_v27  ;;  %v3790_v14 = vadd.f32 %v8730_v49, %v3789_v38 }
 0x5e7   : > { %v4432_v5 = vsub.f32 1.0, %v4431_v36  ;;  %v4441_v46 = vand.u32 2147483648, %v8720_v23  ;;  %v3306_v44 = vmax.f32 %v3270_v61, 0.0  ;;  %v3492_v30 = vsub.f32 0.0, %v3460_v20  ;;  %v3274_v61 = vpop.f32.mrf.mxu3  ;;  %v6475_v36 = vld [vmem:[%s9729_s10] ss:$0 sm:$0xff] }
 0x5e8   : > { %v4932_v56 = vsub.f32 %v4783_v48, %v4879_v18  ;;  %6240 = vlog2.f32 %v4741_v25  ;;  %v4837_v24 = vsub.f32 1.0, %v4741_v25  ;;  %v3794_v12 = vsel %vm8772_vm6, %v8730_v49, %v3790_v14  ;;  %v6476_v18 = vld [vmem:[%s9730_s11] ss:$0 sm:$0xff] }
 0x5e9   : > { %v6237_v34 = vpop.eup %6236  ;;  %v4433_v59 = vmul.f32 %v6233_v63, %v4432_v5  ;;  %vm4435_vm7 = vweird.f32 %v8720_v23  ;;  %vm4436_vm8 = vweird.f32 %v6233_v63  ;;  %v4439_v13 = vand.u32 2147483647, %v8720_v23 }
 0x5ea   : > { %4965 = vst.msk [vmem:[%s8334_s28 + $0x50] sm:$0xff] %vm4954_vm0, %v4932_v56  ;;  %6242 = vlog2.f32 %v4837_v24  ;;  %v8784_v54 = vadd.f32 1.0, %v6237_v34  ;;  %v3538_v41 = vmul.f32 1.442695, %v3492_v30  ;;  %v4104_v50 = vadd.f32 %v8621_v4, %v3390_v7  ;;  %vm4437_vm9 = vmor %vm4435_vm7, %vm4436_vm8 }
 0x5eb   : > { %v8787_v57 = vpop.eup %6238  ;;  %v3799_v55 = vsel %vm8748_vm2, %v3798_v6, %v3794_v12  ;;  %v4434_v11 = vadd.f32 %v6233_v63, %v4433_v59  ;;  %v4442_v8 = vor.u32 1.1754944e-38, %v4441_v46  ;;  %v3273_v37 = vadd.f32 %v8436_v47, %v3272_v60 }
 0x5ec   : > { %v3802_v23 = vmul.f32 %v8787_v57, %v8759_v22  ;;  %6244 = vrcp.f32 %v8784_v54  ;;  %v3342_v19 = vmul.f32 %v8445_v29, %v3306_v44  ;;  %v3461_v45 = vadd.f32 %v8615_v42, %v3393_v10 }
 0x5ed   : > { %v4438_v17 = vsel %vm4437_vm9, %v6233_v63, %v4434_v11  ;;  %vm4440_vm10 = vcmp.eq.f32.partialorder %v4439_v13, 8.507059e+37  ;;  %6246 = vpow2.f32 %v3538_v41  ;;  %vm3806_vm11 = vweird.f32 %v8759_v22 }
 0x5ee   : > { %v6241_v53 = vpop.eup %6240  ;;  %v4443_v49 = vsel %vm4440_vm10, %v4442_v8, %v4438_v17  ;;  %v3803_v62 = vsub.f32 1.0, %v3802_v23  ;;  %v4136_v52 = vsub.f32 0.0, %v4104_v50  ;;  %v3810_v51 = vand.u32 2147483647, %v8759_v22  ;;  %v3399_v23 = vpop.xlane.xlu2 %3398 }
 0x5ef   : > { %v4785_v47 = vmul.f32 0.6931472, %v6241_v53  ;;  %v4742_v40 = vsub.f32 %v3799_v55, %v4443_v49  ;;  %v3307_v0 = vmax.f32 %v3273_v37, 0.0  ;;  %v3433_v7 = vsel %vm3345_vm4, %v3342_v19, 0.0 }
 0x5f0   : > { %v6243_v31 = vpop.eup %6242  ;;  %v3804_v28 = vmul.f32 %v8787_v57, %v3803_v62  ;;  %v4182_v29 = vmul.f32 1.442695, %v4136_v52  ;;  %v3493_v3 = vsub.f32 0.0, %v3461_v45  ;;  %3434 = vadd.xlane.f32.xlu2 %v3433_v7  ;;  %v4105_v2 = vadd.f32 %v8621_v4, %v3393_v10 }
 0x5f1   : > { %v4881_v16 = vmul.f32 0.6931472, %v6243_v31  ;;  %6248 = vlog2.f32 %v4742_v40  ;;  %v4838_v43 = vsub.f32 1.0, %v4742_v40  ;;  %vm3807_vm12 = vweird.f32 %v8787_v57 }
 0x5f2   : > { %v6245_v21 = vpop.eup %6244  ;;  %v3805_v1 = vadd.f32 %v8787_v57, %v3804_v28  ;;  %6250 = vpow2.f32 %v4182_v29  ;;  %v3540_v9 = vmul.f32 1.442695, %v3493_v3  ;;  %v3812_v32 = vand.u32 2147483648, %v8759_v22  ;;  %vm8815_vm13 = vmor %vm3806_vm11, %vm3807_vm12 }
 0x5f3   : > { %v6247_v26 = vpop.eup %6246  ;;  %v4933_v39 = vsub.f32 %v4785_v47, %v4881_v16  ;;  %6252 = vlog2.f32 %v4838_v43  ;;  %v4446_v20 = vmul.f32 %v6245_v21, %v8784_v54  ;;  %v4454_v63 = vand.u32 2147483647, %v8784_v54 }
 0x5f4   : > { %v8807_v15 = vadd.f32 1.0, %v6247_v26  ;;  %6254 = vpow2.f32 %v3540_v9  ;;  %v4137_v38 = vsub.f32 0.0, %v4105_v2  ;;  %vm8819_vm14 = vcmp.eq.f32.partialorder %v3810_v51, 8.507059e+37 }
 0x5f5   : > { %4966 = vst.msk [vmem:[%s8334_s28 + $0x58] sm:$0xff] %vm4954_vm0, %v4933_v39  ;;  %v4447_v6 = vsub.f32 1.0, %v4446_v20  ;;  %v3275_v48 = vadd.f32 %v6475_v36, %v3274_v61  ;;  %v3343_v25 = vmul.f32 %v6476_v18, %v3307_v0  ;;  %v3809_v22 = vsel %vm8815_vm13, %v8787_v57, %v3805_v1 }
 0x5f6   : > { %vm4451_vm15 = vweird.f32 %v6245_v21  ;;  %v4456_v14 = vand.u32 2147483648, %v8784_v54  ;;  %6256 = vrcp.f32 %v8807_v15  ;;  %v4184_v46 = vmul.f32 1.442695, %v4137_v38 }
 0x5f7   : > { %v6249_v33 = vpop.eup %6248  ;;  %v4448_v5 = vmul.f32 %v6245_v21, %v4447_v6  ;;  %v3436_v44 = vsel %vm3345_vm4, %v3343_v25, 0.0  ;;  %v3462_v30 = vadd.f32 %v8615_v42, %v3396_v35  ;;  %v3813_v24 = vor.u32 1.1754944e-38, %v3812_v32 }
 0x5f8   : > { %v6251_v56 = vpop.eup %6250  ;;  %vm4450_vm1 = vweird.f32 %v8784_v54  ;;  %vm8837_vm2 = vcmp.eq.f32.partialorder %v4454_v63, 8.507059e+37  ;;  %3437 = vadd.xlane.f32.xlu0 %v3436_v44  ;;  %v4106_v60 = vadd.f32 %v8621_v4, %v3396_v35  ;;  %6258 = vpow2.f32 %v4184_v46 }
 0x5f9   : > { %v6253_v34 = vpop.eup %6252  ;;  %v4449_v59 = vadd.f32 %v6245_v21, %v4448_v5  ;;  %v8842_v13 = vadd.f32 1.0, %v6251_v56  ;;  %v3308_v10 = vmax.f32 %v3275_v48, 0.0  ;;  %v4787_v50 = vmul.f32 0.6931472, %v6249_v33  ;;  %vm4452_vm3 = vmor %vm4450_vm1, %vm4451_vm15 }
 0x5fa   : > { %v6255_v41 = vpop.eup %6254  ;;  %v4883_v57 = vmul.f32 0.6931472, %v6253_v34  ;;  %v3814_v55 = vsel %vm8819_vm14, %v3813_v24, %v3809_v22  ;;  %v4457_v54 = vor.u32 1.1754944e-38, %v4456_v14  ;;  %v3825_v8 = vand.u32 2147483647, %v8807_v15 }
 0x5fb   : > { %v4453_v11 = vsel %vm4452_vm3, %v6245_v21, %v4449_v59  ;;  %6260 = vrcp.f32 %v8842_v13  ;;  %v3494_v37 = vsub.f32 0.0, %v3462_v30  ;;  %v8853_v53 = vadd.f32 1.0, %v6255_v41 }
 0x5fc   : > { %v8849_v19 = vpop.eup %6256  ;;  %v4934_v45 = vsub.f32 %v4787_v50, %v4883_v57  ;;  %v4458_v17 = vsel %vm8837_vm2, %v4457_v54, %v4453_v11  ;;  %v4138_v49 = vsub.f32 0.0, %v4106_v60  ;;  %v3344_v47 = vmul.f32 %v6476_v18, %v3308_v10  ;;  %v3402_v50 = vpop.xlane.xlu0 %3401 }
 0x5fd   : > { %v4743_v62 = vsub.f32 %v3814_v55, %v4458_v17  ;;  %v3817_v52 = vmul.f32 %v8849_v19, %v8807_v15  ;;  %vm3821_vm5 = vweird.f32 %v8807_v15  ;;  %v3827_v40 = vand.u32 2147483648, %v8807_v15 }
 0x5fe   : > { %4967 = vst.msk [vmem:[%s8334_s28 + $0x60] sm:$0xff] %vm4954_vm0, %v4934_v45  ;;  %6262 = vrcp.f32 %v8853_v53  ;;  %v3463_v51 = vadd.f32 %v8615_v42, %v3399_v23  ;;  %v6259_v0 = vpop.eup %6258  ;;  %vm8863_vm6 = vcmp.eq.f32.partialorder %v3825_v8, 8.507059e+37  ;;  %v4469_v7 = vand.u32 2147483647, %v8842_v13 }
 0x5ff   : > { %6264 = vlog2.f32 %v4743_v62  ;;  %v4839_v31 = vsub.f32 1.0, %v4743_v62  ;;  %v3818_v28 = vsub.f32 1.0, %v3817_v52  ;;  %v4471_v3 = vand.u32 2147483648, %v8842_v13 }
 0x600   : > { %v8869_v16 = vadd.f32 1.0, %v6259_v0  ;;  %v3542_v43 = vmul.f32 1.442695, %v3494_v37  ;;  %v4186_v2 = vmul.f32 1.442695, %v4138_v49  ;;  %vm3822_vm7 = vweird.f32 %v8849_v19 }
 0x601   : > { %v6261_v21 = vpop.eup %6260  ;;  %6266 = vlog2.f32 %v4839_v31  ;;  %v3819_v1 = vmul.f32 %v8849_v19, %v3818_v28  ;;  %v3439_v9 = vsel %vm3345_vm4, %v3344_v47, 0.0  ;;  %v3828_v61 = vor.u32 1.1754944e-38, %v3827_v40  ;;  %vm8884_vm4 = vmor %vm3821_vm5, %vm3822_vm7 }
 0x602   : > { %v4461_v26 = vmul.f32 %v6261_v21, %v8842_v13  ;;  %v3842_v39 = vand.u32 2147483648, %v8853_v53  ;;  %6268 = vrcp.f32 %v8869_v16  ;;  %3440 = vadd.xlane.f32.xlu1 %v3439_v9  ;;  %vm4465_vm8 = vweird.f32 %v8842_v13 }
 0x603   : > { %v3820_v32 = vadd.f32 %v8849_v19, %v3819_v1  ;;  %v3840_v20 = vand.u32 2147483647, %v8853_v53  ;;  %6270 = vpow2.f32 %v3542_v43  ;;  %vm8888_vm9 = vcmp.eq.f32.partialorder %v4469_v7, 8.507059e+37  ;;  %v3405_v7 = vpop.xlane.xlu1 %3404 }
 0x604   : > { %v8880_v63 = vpop.eup %6262  ;;  %v4462_v35 = vsub.f32 1.0, %v4461_v26  ;;  %6272 = vpow2.f32 %v4186_v2  ;;  %v3495_v27 = vsub.f32 0.0, %v3463_v51  ;;  %v4472_v48 = vor.u32 1.1754944e-38, %v4471_v3 }
 0x605   : > { %v6265_v6 = vpop.eup %6264  ;;  %v3824_v36 = vsel %vm8884_vm4, %v8849_v19, %v3820_v32  ;;  %v3832_v15 = vmul.f32 %v8880_v63, %v8853_v53  ;;  %v4107_v18 = vadd.f32 %v8621_v4, %v3399_v23  ;;  %vm4466_vm10 = vweird.f32 %v6261_v21 }
 0x606   : > { %v4463_v25 = vmul.f32 %v6261_v21, %v4462_v35  ;;  %vm3836_vm11 = vweird.f32 %v8853_v53  ;;  %v3843_v22 = vor.u32 1.1754944e-38, %v3842_v39  ;;  %vm3837_vm12 = vweird.f32 %v8880_v63  ;;  %vm4467_vm14 = vmor %vm4465_vm8, %vm4466_vm10 }
 0x607   : > { %v6267_v14 = vpop.eup %6266  ;;  %v3833_v33 = vsub.f32 1.0, %v3832_v15  ;;  %vm8900_vm13 = vcmp.eq.f32.partialorder %v3840_v20, 8.507059e+37  ;;  %v4484_v46 = vand.u32 2147483647, %v8869_v16  ;;  %v3544_v44 = vmul.f32 1.442695, %v3495_v27  ;;  %vm8926_vm15 = vmor %vm3836_vm11, %vm3837_vm12 }
 0x608   : > { %v6269_v30 = vpop.eup %6268  ;;  %v4789_v56 = vmul.f32 0.6931472, %v6265_v6  ;;  %v4885_v24 = vmul.f32 0.6931472, %v6267_v14  ;;  %v3829_v12 = vsel %vm8863_vm6, %v3828_v61, %v3824_v36  ;;  %v4464_v60 = vadd.f32 %v6261_v21, %v4463_v25 }
 0x609   : > { %v6271_v34 = vpop.eup %6270  ;;  %v3834_v59 = vmul.f32 %v8880_v63, %v3833_v33  ;;  %v4476_v10 = vmul.f32 %v6269_v30, %v8869_v16  ;;  %6274 = vpow2.f32 %v3544_v44  ;;  %v4139_v41 = vsub.f32 0.0, %v4107_v18 }
 0x60a   : > { %v6273_v57 = vpop.eup %6272  ;;  %v4935_v55 = vsub.f32 %v4789_v56, %v4885_v24  ;;  %v4468_v54 = vsel %vm4467_vm14, %v6261_v21, %v4464_v60  ;;  %v4486_v11 = vand.u32 2147483648, %v8869_v16  ;;  %v8913_v8 = vadd.f32 1.0, %v6271_v34 }
 0x60b   : > { %v4473_v37 = vsel %vm8888_vm9, %v4472_v48, %v4468_v54  ;;  %v3835_v13 = vadd.f32 %v8880_v63, %v3834_v59  ;;  %v4477_v23 = vsub.f32 1.0, %v4476_v10  ;;  %v8918_v19 = vadd.f32 1.0, %v6273_v57 }
 0x60c   : > { %4968 = vst.msk [vmem:[%s8334_s28 + $0x68] sm:$0xff] %vm4954_vm0, %v4935_v55  ;;  %v4744_v45 = vsub.f32 %v3829_v12, %v4473_v37  ;;  %vm4481_vm1 = vweird.f32 %v6269_v30  ;;  %6276 = vrcp.f32 %v8913_v8  ;;  %v3464_v49 = vadd.f32 %v8615_v42, %v3402_v50 }
 0x60d   : > { %v3839_v62 = vsel %vm8926_vm15, %v8880_v63, %v3835_v13  ;;  %v4478_v52 = vmul.f32 %v6269_v30, %v4477_v23  ;;  %6278 = vrcp.f32 %v8918_v19  ;;  %v4188_v47 = vmul.f32 1.442695, %v4139_v41 }
 0x60e   : > { %6280 = vlog2.f32 %v4744_v45  ;;  %v4840_v40 = vsub.f32 1.0, %v4744_v45  ;;  %vm4480_vm2 = vweird.f32 %v8869_v16  ;;  %v4487_v53 = vor.u32 1.1754944e-38, %v4486_v11 }
 0x60f   : > { %v6275_v51 = vpop.eup %6274  ;;  %v4479_v0 = vadd.f32 %v6269_v30, %v4478_v52  ;;  %v3855_v31 = vand.u32 2147483647, %v8913_v8  ;;  %v3857_v28 = vand.u32 2147483648, %v8913_v8  ;;  %v4108_v29 = vadd.f32 %v8621_v4, %v3402_v50  ;;  %vm4482_vm3 = vmor %vm4480_vm2, %vm4481_vm1 }
 0x610   : > { %6282 = vlog2.f32 %v4840_v40  ;;  %v3844_v3 = vsel %vm8900_vm13, %v3843_v22, %v3839_v62  ;;  %v8943_v43 = vadd.f32 1.0, %v6275_v51  ;;  %v3496_v2 = vsub.f32 0.0, %v3464_v49 }
 0x611   : > { %v4483_v16 = vsel %vm4482_vm3, %v6269_v30, %v4479_v0  ;;  %vm4485_vm5 = vcmp.eq.f32.partialorder %v4484_v46, 8.507059e+37  ;;  %6284 = vpow2.f32 %v4188_v47  ;;  %v3465_v9 = vadd.f32 %v8615_v42, %v3405_v7 }
 0x612   : > { %v6277_v21 = vpop.eup %6276  ;;  %v4488_v1 = vsel %vm4485_vm5, %v4487_v53, %v4483_v16  ;;  %6286 = vrcp.f32 %v8943_v43  ;;  %vm3851_vm6 = vweird.f32 %v8913_v8  ;;  %v4140_v32 = vsub.f32 0.0, %v4108_v29 }
 0x613   : > { %v6279_v61 = vpop.eup %6278  ;;  %v4745_v26 = vsub.f32 %v3844_v3, %v4488_v1  ;;  %v3847_v39 = vmul.f32 %v6277_v21, %v8913_v8  ;;  %vm8949_vm7 = vcmp.eq.f32.partialorder %v3855_v31, 8.507059e+37  ;;  %v3858_v38 = vor.u32 1.1754944e-38, %v3857_v28  ;;  %v3408_v31 = vpop.xlane.xlu2 %3407 }
 0x614   : > { %v6281_v20 = vpop.eup %6280  ;;  %v4491_v35 = vmul.f32 %v6279_v61, %v8918_v19  ;;  %v3546_v58 = vmul.f32 1.442695, %v3496_v2  ;;  %v4501_v36 = vand.u32 2147483648, %v8918_v19  ;;  %vm3852_vm8 = vweird.f32 %v6277_v21 }
 0x615   : > { %6288 = vlog2.f32 %v4745_v26  ;;  %v4841_v27 = vsub.f32 1.0, %v4745_v26  ;;  %v3848_v6 = vsub.f32 1.0, %v3847_v39  ;;  %v4791_v15 = vmul.f32 0.6931472, %v6281_v20  ;;  %vm3853_vm10 = vmor %vm3851_vm6, %vm3852_vm8 }
 0x616   : > { %v6283_v48 = vpop.eup %6282  ;;  %v4492_v18 = vsub.f32 1.0, %v4491_v35  ;;  %6290 = vpow2.f32 %v3546_v58  ;;  %v4190_v33 = vmul.f32 1.442695, %v4140_v32  ;;  %vm4496_vm4 = vweird.f32 %v6279_v61 }
 0x617   : > { %v6285_v25 = vpop.eup %6284  ;;  %v4887_v22 = vmul.f32 0.6931472, %v6283_v48  ;;  %6292 = vlog2.f32 %v4841_v27  ;;  %v3849_v14 = vmul.f32 %v6277_v21, %v3848_v6  ;;  %v4499_v44 = vand.u32 2147483647, %v8918_v19  ;;  %v3411_v6 = vpop.xlane.xlu0 %3410 }
 0x618   : > { %v8955_v5 = vpop.eup %6286  ;;  %v4493_v46 = vmul.f32 %v6279_v61, %v4492_v18  ;;  %v8958_v30 = vadd.f32 1.0, %v6285_v25  ;;  %vm4495_vm9 = vweird.f32 %v8918_v19  ;;  %v4502_v34 = vor.u32 1.1754944e-38, %v4501_v36 }
 0x619   : > { %v4936_v56 = vsub.f32 %v4791_v15, %v4887_v22  ;;  %v3850_v24 = vadd.f32 %v6277_v21, %v3849_v14  ;;  %v3862_v12 = vmul.f32 %v8955_v5, %v8943_v43  ;;  %v3497_v59 = vsub.f32 0.0, %v3465_v9  ;;  %vm4497_vm11 = vmor %vm4495_vm9, %vm4496_vm4 }
 0x61a   : > { %v4494_v60 = vadd.f32 %v6279_v61, %v4493_v46  ;;  %6294 = vrcp.f32 %v8958_v30  ;;  %v4109_v57 = vadd.f32 %v8621_v4, %v3405_v7  ;;  %vm4500_vm12 = vcmp.eq.f32.partialorder %v4499_v44, 8.507059e+37 }
 0x61b   : > { %v6289_v10 = vpop.eup %6288  ;;  %4969 = vst.msk [vmem:[%s8334_s28 + $0x70] sm:$0xff] %vm4954_vm0, %v4936_v56  ;;  %v3854_v41 = vsel %vm3853_vm10, %v6277_v21, %v3850_v24  ;;  %v3863_v50 = vsub.f32 1.0, %v3862_v12  ;;  %6296 = vpow2.f32 %v4190_v33  ;;  %v3870_v8 = vand.u32 2147483647, %v8943_v43 }
 0x61c   : > { %v6291_v55 = vpop.eup %6290  ;;  %v3859_v54 = vsel %vm8949_vm7, %v3858_v38, %v3854_v41  ;;  %v4498_v11 = vsel %vm4497_vm11, %v6279_v61, %v4494_v60  ;;  %v3872_v19 = vand.u32 2147483648, %v8943_v43  ;;  %v4793_v17 = vmul.f32 0.6931472, %v6289_v10 }
 0x61d   : > { %v6293_v37 = vpop.eup %6292  ;;  %v4503_v13 = vsel %vm4500_vm12, %v4502_v34, %v4498_v11  ;;  %v3864_v23 = vmul.f32 %v8955_v5, %v3863_v50  ;;  %v8976_v45 = vadd.f32 1.0, %v6291_v55  ;;  %vm3867_vm13 = vweird.f32 %v8955_v5 }
 0x61e   : > { %v4889_v49 = vmul.f32 0.6931472, %v6293_v37  ;;  %v4746_v62 = vsub.f32 %v3859_v54, %v4503_v13  ;;  %v3548_v52 = vmul.f32 1.442695, %v3497_v59  ;;  %v4141_v47 = vsub.f32 0.0, %v4109_v57 }
 0x61f   : > { %6298 = vrcp.f32 %v8976_v45  ;;  %v3865_v0 = vadd.f32 %v8955_v5, %v3864_v23  ;;  %vm3866_vm14 = vweird.f32 %v8943_v43  ;;  %vm8982_vm15 = vcmp.eq.f32.partialorder %v3870_v8, 8.507059e+37  ;;  %v9043_v23 = vpop.xlane.xlu1 %3413 }
 0x620   : > { %v6295_v40 = vpop.eup %6294  ;;  %v4937_v53 = vsub.f32 %v4793_v17, %v4889_v49  ;;  %6300 = vlog2.f32 %v4746_v62  ;;  %v4842_v51 = vsub.f32 1.0, %v4746_v62  ;;  %v3873_v7 = vor.u32 1.1754944e-38, %v3872_v19  ;;  %vm8995_vm1 = vmor %vm3866_vm14, %vm3867_vm13  ;;  %v9056_v62 = vld [vmem:[%s9732_s13] ss:$0 sm:$0xff]  ;;  %v3417_v19 = vpop.xlane.xlu2 %3416 }
 0x621   : > { %v6297_v28 = vpop.eup %6296  ;;  %v4506_v3 = vmul.f32 %v6295_v40, %v8958_v30  ;;  %v4514_v2 = vand.u32 2147483647, %v8958_v30  ;;  %v4516_v16 = vand.u32 2147483648, %v8958_v30  ;;  %v4192_v9 = vmul.f32 1.442695, %v4141_v47 }
 0x622   : > { %4970 = vst.msk [vmem:[%s8334_s28 + $0x78] sm:$0xff] %vm4954_vm0, %v4937_v53  ;;  %6302 = vlog2.f32 %v4842_v51  ;;  %v8991_v21 = vadd.f32 1.0, %v6297_v28  ;;  %v3466_v61 = vadd.f32 %v8615_v42, %v3408_v31  ;;  %v3869_v26 = vsel %vm8995_vm1, %v8955_v5, %v3865_v0 }
 0x623   : > { %v4507_v1 = vsub.f32 1.0, %v4506_v3  ;;  %6304 = vpow2.f32 %v3548_v52  ;;  %vm4511_vm2 = vweird.f32 %v6295_v40  ;;  %v3885_v39 = vand.u32 2147483647, %v8976_v45 }
 0x624   : > { %6306 = vrcp.f32 %v8991_v21  ;;  %v3498_v63 = vsub.f32 0.0, %v3466_v61  ;;  %v4110_v38 = vadd.f32 %v8621_v4, %v3408_v31  ;;  %vm4510_vm3 = vweird.f32 %v8958_v30  ;;  %v9027_v30 = vld [vmem:[%s9731_s12] ss:$0 sm:$0xff] }
 0x625   : > { %v9005_v32 = vpop.eup %6298  ;;  %v4508_v20 = vmul.f32 %v6295_v40, %v4507_v1  ;;  %6308 = vpow2.f32 %v4192_v9  ;;  %vm9009_vm5 = vcmp.eq.f32.partialorder %v4514_v2, 8.507059e+37  ;;  %v4517_v58 = vor.u32 1.1754944e-38, %v4516_v16  ;;  %vm4512_vm7 = vmor %vm4510_vm3, %vm4511_vm2 }
 0x626   : > { %v6301_v35 = vpop.eup %6300  ;;  %v3877_v27 = vmul.f32 %v9005_v32, %v8976_v45  ;;  %vm3881_vm6 = vweird.f32 %v8976_v45  ;;  %v3550_v48 = vmul.f32 1.442695, %v3498_v63  ;;  %v4142_v15 = vsub.f32 0.0, %v4110_v38 }
 0x627   : > { %v4509_v36 = vadd.f32 %v6295_v40, %v4508_v20  ;;  %v4795_v25 = vmul.f32 0.6931472, %v6301_v35  ;;  %v3874_v4 = vsel %vm8982_vm15, %v3873_v7, %v3869_v26  ;;  %v3887_v14 = vand.u32 2147483648, %v8976_v45 }
 0x628   : > { %v6303_v18 = vpop.eup %6302  ;;  %v3878_v22 = vsub.f32 1.0, %v3877_v27  ;;  %vm9020_vm8 = vcmp.eq.f32.partialorder %v3885_v39, 8.507059e+37  ;;  %6310 = vpow2.f32 %v3550_v48  ;;  %v3467_v56 = vadd.f32 %v9027_v30, %v3411_v6 }
 0x629   : > { %v6305_v33 = vpop.eup %6304  ;;  %v4891_v5 = vmul.f32 0.6931472, %v6303_v18  ;;  %v4513_v46 = vsel %vm4512_vm7, %v6295_v40, %v4509_v36  ;;  %v4194_v59 = vmul.f32 1.442695, %v4142_v15  ;;  %vm3882_vm4 = vweird.f32 %v9005_v32 }
 0x62a   : > { %v6307_v24 = vpop.eup %6306  ;;  %v4518_v12 = vsel %vm9009_vm5, %v4517_v58, %v4513_v46  ;;  %v3879_v60 = vmul.f32 %v9005_v32, %v3878_v22  ;;  %v9033_v34 = vadd.f32 1.0, %v6305_v33  ;;  %v3888_v54 = vor.u32 1.1754944e-38, %v3887_v14  ;;  %vm9047_vm9 = vmor %vm3881_vm6, %vm3882_vm4 }
 0x62b   : > { %v6309_v10 = vpop.eup %6308  ;;  %v4938_v41 = vsub.f32 %v4795_v25, %v4891_v5  ;;  %v4747_v50 = vsub.f32 %v3874_v4, %v4518_v12  ;;  %v4521_v57 = vmul.f32 %v6307_v24, %v8991_v21  ;;  %v4529_v11 = vand.u32 2147483647, %v8991_v21 }
 0x62c   : > { %v3880_v55 = vadd.f32 %v9005_v32, %v3879_v60  ;;  %6312 = vrcp.f32 %v9033_v34  ;;  %v4531_v13 = vand.u32 2147483648, %v8991_v21  ;;  %v9051_v17 = vadd.f32 1.0, %v6309_v10 }
 0x62d   : > { %4971 = vst.msk [vmem:[%s8334_s28 + $0x80] sm:$0xff] %vm4954_vm0, %v4938_v41  ;;  %6314 = vlog2.f32 %v4747_v50  ;;  %v4843_v8 = vsub.f32 1.0, %v4747_v50  ;;  %v4522_v37 = vsub.f32 1.0, %v4521_v57  ;;  %v3499_v49 = vsub.f32 0.0, %v3467_v56 }
 0x62e   : > { %6316 = vpow2.f32 %v4194_v59  ;;  %v4111_v52 = vadd.f32 %v9056_v62, %v3411_v6  ;;  %v6311_v47 = vpop.eup %6310  ;;  %v3884_v45 = vsel %vm9047_vm9, %v9005_v32, %v3880_v55  ;;  %vm4526_vm10 = vweird.f32 %v6307_v24 }
 0x62f   : > { %6318 = vlog2.f32 %v4843_v8  ;;  %v4523_v40 = vmul.f32 %v6307_v24, %v4522_v37  ;;  %vm4525_vm11 = vweird.f32 %v8991_v21  ;;  %v3902_v53 = vand.u32 2147483648, %v9033_v34 }
 0x630   : > { %6320 = vrcp.f32 %v9051_v17  ;;  %v3468_v51 = vadd.f32 %v9027_v30, %v9043_v23  ;;  %vm4530_vm12 = vcmp.eq.f32.partialorder %v4529_v11, 8.507059e+37  ;;  %v3900_v31 = vand.u32 2147483647, %v9033_v34  ;;  %vm4527_vm13 = vmor %vm4525_vm11, %vm4526_vm10 }
 0x631   : > { %v4524_v0 = vadd.f32 %v6307_v24, %v4523_v40  ;;  %v9068_v28 = vadd.f32 1.0, %v6311_v47  ;;  %v3889_v7 = vsel %vm9020_vm8, %v3888_v54, %v3884_v45  ;;  %v4532_v3 = vor.u32 1.1754944e-38, %v4531_v13 }
 0x632   : > { %v9070_v29 = vpop.eup %6312  ;;  %v3552_v2 = vmul.f32 1.442695, %v3499_v49  ;;  %v4143_v16 = vsub.f32 0.0, %v4111_v52  ;;  %vm3896_vm14 = vweird.f32 %v9033_v34  ;;  %v3903_v26 = vor.u32 1.1754944e-38, %v3902_v53 }
 0x633   : > { %v6315_v21 = vpop.eup %6314  ;;  %v4528_v43 = vsel %vm4527_vm13, %v6307_v24, %v4524_v0  ;;  %v3892_v1 = vmul.f32 %v9070_v29, %v9033_v34  ;;  %6322 = vrcp.f32 %v9068_v28  ;;  %v4544_v39 = vand.u32 2147483647, %v9051_v17 }
 0x634   : > { %v6317_v9 = vpop.eup %6316  ;;  %v4533_v61 = vsel %vm4530_vm12, %v4532_v3, %v4528_v43  ;;  %v3500_v32 = vsub.f32 0.0, %v3468_v51  ;;  %vm3897_vm15 = vweird.f32 %v9070_v29  ;;  %vm9080_vm1 = vcmp.eq.f32.partialorder %v3900_v31, 8.507059e+37 }
 0x635   : > { %v6319_v20 = vpop.eup %6318  ;;  %v4748_v63 = vsub.f32 %v3889_v7, %v4533_v61  ;;  %v3893_v38 = vsub.f32 1.0, %v3892_v1  ;;  %v9084_v42 = vadd.f32 1.0, %v6317_v9  ;;  %v4797_v27 = vmul.f32 0.6931472, %v6315_v21  ;;  %vm9101_vm3 = vmor %vm3896_vm14, %vm3897_vm15 }
 0x636   : > { %v6321_v58 = vpop.eup %6320  ;;  %v4893_v6 = vmul.f32 0.6931472, %v6319_v20  ;;  %6324 = vpow2.f32 %v3552_v2  ;;  %v4196_v36 = vmul.f32 1.442695, %v4143_v16  ;;  %vm4540_vm2 = vweird.f32 %v9051_v17 }
 0x637   : > { %6326 = vlog2.f32 %v4748_v63  ;;  %v4844_v48 = vsub.f32 1.0, %v4748_v63  ;;  %v3894_v15 = vmul.f32 %v9070_v29, %v3893_v38  ;;  %v4536_v18 = vmul.f32 %v6321_v58, %v9051_v17 }
 0x638   : > { %v4939_v25 = vsub.f32 %v4797_v27, %v4893_v6  ;;  %v4546_v4 = vand.u32 2147483648, %v9051_v17  ;;  %6328 = vrcp.f32 %v9084_v42  ;;  %v3915_v5 = vand.u32 2147483647, %v9068_v28 }
 0x639   : > { %v9091_v22 = vpop.eup %6322  ;;  %6330 = vlog2.f32 %v4844_v48  ;;  %v3895_v14 = vadd.f32 %v9070_v29, %v3894_v15  ;;  %v4537_v33 = vsub.f32 1.0, %v4536_v18  ;;  %vm4541_vm5 = vweird.f32 %v6321_v58 }
 0x63a   : > { %4972 = vst.msk [vmem:[%s8334_s28 + $0x88] sm:$0xff] %vm4954_vm0, %v4939_v25  ;;  %vm9105_vm6 = vcmp.eq.f32.partialorder %v4544_v39, 8.507059e+37  ;;  %v3907_v56 = vmul.f32 %v9091_v22, %v9068_v28  ;;  %v4112_v24 = vadd.f32 %v9056_v62, %v9043_v23  ;;  %6332 = vpow2.f32 %v4196_v36  ;;  %vm4542_vm4 = vmor %vm4540_vm2, %vm4541_vm5  ;;  %v3420_v36 = vpop.xlane.xlu0 %3419 }
 0x63b   : > { %v3899_v12 = vsel %vm9101_vm3, %v9070_v29, %v3895_v14  ;;  %v4538_v60 = vmul.f32 %v6321_v58, %v4537_v33  ;;  %v3554_v34 = vmul.f32 1.442695, %v3500_v32  ;;  %v4547_v10 = vor.u32 1.1754944e-38, %v4546_v4 }
 0x63c   : > { %v6325_v59 = vpop.eup %6324  ;;  %v3908_v41 = vsub.f32 1.0, %v3907_v56  ;;  %vm3911_vm7 = vweird.f32 %v9068_v28  ;;  %v3917_v50 = vand.u32 2147483648, %v9068_v28  ;;  %vm9118_vm8 = vcmp.eq.f32.partialorder %v3915_v5, 8.507059e+37 }
 0x63d   : > { %v6327_v57 = vpop.eup %6326  ;;  %v4539_v55 = vadd.f32 %v6321_v58, %v4538_v60  ;;  %v9122_v11 = vadd.f32 1.0, %v6325_v59  ;;  %6334 = vpow2.f32 %v3554_v34  ;;  %v3904_v37 = vsel %vm9080_vm1, %v3903_v26, %v3899_v12 }
 0x63e   : > { %v6329_v8 = vpop.eup %6328  ;;  %v3909_v13 = vmul.f32 %v9091_v22, %v3908_v41  ;;  %vm3912_vm9 = vweird.f32 %v9091_v22  ;;  %v4144_v23 = vsub.f32 0.0, %v4112_v24  ;;  %v4561_v45 = vand.u32 2147483648, %v9084_v42 }
 0x63f   : > { %v6331_v49 = vpop.eup %6330  ;;  %v4543_v52 = vsel %vm4542_vm4, %v6321_v58, %v4539_v55  ;;  %v4551_v47 = vmul.f32 %v6329_v8, %v9084_v42  ;;  %6336 = vrcp.f32 %v9122_v11  ;;  %v4799_v40 = vmul.f32 0.6931472, %v6327_v57  ;;  %vm9143_vm10 = vmor %vm3911_vm7, %vm3912_vm9 }
 0x640   : > { %v4895_v53 = vmul.f32 0.6931472, %v6331_v49  ;;  %v4548_v17 = vsel %vm9105_vm6, %v4547_v10, %v4543_v52  ;;  %v3910_v51 = vadd.f32 %v9091_v22, %v3909_v13  ;;  %v6333_v0 = vpop.eup %6332  ;;  %v4559_v7 = vand.u32 2147483647, %v9084_v42 }
 0x641   : > { %v4749_v31 = vsub.f32 %v3904_v37, %v4548_v17  ;;  %v4552_v29 = vsub.f32 1.0, %v4551_v47  ;;  %v3469_v3 = vadd.f32 %v9027_v30, %v3417_v19  ;;  %vm4556_vm11 = vweird.f32 %v6329_v8 }
 0x642   : > { %v4940_v2 = vsub.f32 %v4799_v40, %v4895_v53  ;;  %v9147_v21 = vadd.f32 1.0, %v6333_v0  ;;  %v4198_v43 = vmul.f32 1.442695, %v4144_v23  ;;  %v3914_v61 = vsel %vm9143_vm10, %v9091_v22, %v3910_v51  ;;  %v3423_v0 = vpop.xlane.xlu1 %3422 }
 0x643   : > { %v6335_v1 = vpop.eup %6334  ;;  %6338 = vlog2.f32 %v4749_v31  ;;  %v4845_v9 = vsub.f32 1.0, %v4749_v31  ;;  %v4553_v26 = vmul.f32 %v6329_v8, %v4552_v29  ;;  %v3918_v39 = vor.u32 1.1754944e-38, %v3917_v50 }
 0x644   : > { %4973 = vst.msk [vmem:[%s8334_s28 + $0x90] sm:$0xff] %vm4954_vm0, %v4940_v2  ;;  %vm4555_vm12 = vweird.f32 %v9084_v42  ;;  %v4562_v28 = vor.u32 1.1754944e-38, %v4561_v45  ;;  %6340 = vrcp.f32 %v9147_v21  ;;  %v3930_v63 = vand.u32 2147483647, %v9122_v11 }
 0x645   : > { %v9156_v32 = vpop.eup %6336  ;;  %6342 = vlog2.f32 %v4845_v9  ;;  %v4554_v20 = vadd.f32 %v6329_v8, %v4553_v26  ;;  %v4113_v38 = vadd.f32 %v9056_v62, %v3417_v19  ;;  %v3919_v35 = vsel %vm9118_vm8, %v3918_v39, %v3914_v61  ;;  %vm4557_vm13 = vmor %vm4555_vm12, %vm4556_vm11 }
 0x646   : > { %v3922_v58 = vmul.f32 %v9156_v32, %v9122_v11  ;;  %v9165_v42 = vadd.f32 1.0, %v6335_v1  ;;  %6344 = vpow2.f32 %v4198_v43  ;;  %vm4560_vm14 = vcmp.eq.f32.partialorder %v4559_v7, 8.507059e+37 }
 0x647   : > { %v4558_v27 = vsel %vm4557_vm13, %v6329_v8, %v4554_v20  ;;  %v3501_v6 = vsub.f32 0.0, %v3469_v3  ;;  %vm3926_vm15 = vweird.f32 %v9122_v11  ;;  %vm9169_vm1 = vcmp.eq.f32.partialorder %v3930_v63, 8.507059e+37 }
 0x648   : > { %v4563_v48 = vsel %vm4560_vm14, %v4562_v28, %v4558_v27  ;;  %v3923_v15 = vsub.f32 1.0, %v3922_v58  ;;  %6346 = vrcp.f32 %v9165_v42  ;;  %v3932_v22 = vand.u32 2147483648, %v9122_v11 }
 0x649   : > { %v6339_v18 = vpop.eup %6338  ;;  %v4750_v25 = vsub.f32 %v3919_v35, %v4563_v48  ;;  %v4574_v14 = vand.u32 2147483647, %v9147_v21  ;;  %v3556_v46 = vmul.f32 1.442695, %v3501_v6  ;;  %v4145_v44 = vsub.f32 0.0, %v4113_v38 }
 0x64a   : > { %v6341_v33 = vpop.eup %6340  ;;  %v3924_v5 = vmul.f32 %v9156_v32, %v3923_v15  ;;  %v3470_v56 = vadd.f32 %v9027_v30, %v3420_v36  ;;  %vm3927_vm2 = vweird.f32 %v9156_v32  ;;  %v4801_v59 = vmul.f32 0.6931472, %v6339_v18 }
 0x64b   : > { %v6343_v24 = vpop.eup %6342  ;;  %6348 = vlog2.f32 %v4750_v25  ;;  %v4846_v12 = vsub.f32 1.0, %v4750_v25  ;;  %v4566_v60 = vmul.f32 %v6341_v33, %v9147_v21  ;;  %v4576_v50 = vand.u32 2147483648, %v9147_v21  ;;  %vm9187_vm3 = vmor %vm3926_vm15, %vm3927_vm2 }
 0x64c   : > { %v6345_v34 = vpop.eup %6344  ;;  %v4897_v10 = vmul.f32 0.6931472, %v6343_v24  ;;  %v3925_v41 = vadd.f32 %v9156_v32, %v3924_v5  ;;  %v4200_v54 = vmul.f32 1.442695, %v4145_v44  ;;  %v3933_v23 = vor.u32 1.1754944e-38, %v3932_v22 }
 0x64d   : > { %6350 = vlog2.f32 %v4846_v12  ;;  %v4567_v57 = vsub.f32 1.0, %v4566_v60  ;;  %v9181_v55 = vadd.f32 1.0, %v6345_v34  ;;  %v3502_v19 = vsub.f32 0.0, %v3470_v56 }
 0x64e   : > { %v9183_v8 = vpop.eup %6346  ;;  %v4941_v37 = vsub.f32 %v4801_v59, %v4897_v10  ;;  %6352 = vpow2.f32 %v3556_v46  ;;  %v3929_v49 = vsel %vm9187_vm3, %v9156_v32, %v3925_v41  ;;  %vm4571_vm5 = vweird.f32 %v6341_v33 }
 0x64f   : > { %v4568_v52 = vmul.f32 %v6341_v33, %v4567_v57  ;;  %v3937_v47 = vmul.f32 %v9183_v8, %v9165_v42  ;;  %vm4570_vm6 = vweird.f32 %v9147_v21  ;;  %vm9199_vm7 = vcmp.eq.f32.partialorder %v4574_v14, 8.507059e+37 }
 0x650   : > { %4974 = vst.msk [vmem:[%s8334_s28 + $0x98] sm:$0xff] %vm4954_vm0, %v4941_v37  ;;  %v4577_v45 = vor.u32 1.1754944e-38, %v4576_v50  ;;  %6354 = vrcp.f32 %v9181_v55  ;;  %v3558_v51 = vmul.f32 1.442695, %v3502_v19  ;;  %v3934_v31 = vsel %vm9169_vm1, %v3933_v23, %v3929_v49  ;;  %vm4572_vm8 = vmor %vm4570_vm6, %vm4571_vm5 }
 0x651   : > { %v6349_v40 = vpop.eup %6348  ;;  %v4569_v53 = vadd.f32 %v6341_v33, %v4568_v52  ;;  %v3938_v17 = vsub.f32 1.0, %v3937_v47  ;;  %6356 = vpow2.f32 %v4200_v54  ;;  %vm3941_vm4 = vweird.f32 %v9165_v42 }
 0x652   : > { %v3945_v29 = vand.u32 2147483647, %v9165_v42  ;;  %v4114_v7 = vadd.f32 %v9056_v62, %v3420_v36  ;;  %v4803_v2 = vmul.f32 0.6931472, %v6349_v40  ;;  %6358 = vpow2.f32 %v3558_v51 }
 0x653   : > { %v6351_v3 = vpop.eup %6350  ;;  %v4573_v16 = vsel %vm4572_vm8, %v6341_v33, %v4569_v53  ;;  %v3939_v21 = vmul.f32 %v9183_v8, %v3938_v17  ;;  %v3471_v26 = vadd.f32 %v9027_v30, %v3423_v0  ;;  %v3947_v28 = vand.u32 2147483648, %v9165_v42  ;;  %v3426_v42 = vpop.xlane.xlu2 %3425 }
 0x654   : > { %v6353_v43 = vpop.eup %6352  ;;  %v4899_v1 = vmul.f32 0.6931472, %v6351_v3  ;;  %v4578_v9 = vsel %vm9199_vm7, %v4577_v45, %v4573_v16  ;;  %v4146_v61 = vsub.f32 0.0, %v4114_v7  ;;  %v4115_v20 = vadd.f32 %v9056_v62, %v3423_v0 }
 0x655   : > { %v4751_v39 = vsub.f32 %v3934_v31, %v4578_v9  ;;  %v9214_v32 = vadd.f32 1.0, %v6353_v43  ;;  %vm3942_vm9 = vweird.f32 %v9183_v8  ;;  %vm9218_vm10 = vcmp.eq.f32.partialorder %v3945_v29, 8.507059e+37 }
 0x656   : > { %v6355_v63 = vpop.eup %6354  ;;  %v4942_v38 = vsub.f32 %v4803_v2, %v4899_v1  ;;  %v4202_v58 = vmul.f32 1.442695, %v4146_v61  ;;  %v3940_v36 = vadd.f32 %v9183_v8, %v3939_v21  ;;  %v4589_v15 = vand.u32 2147483647, %v9181_v55  ;;  %vm9233_vm11 = vmor %vm3941_vm4, %vm3942_vm9 }
 0x657   : > { %v6357_v27 = vpop.eup %6356  ;;  %6360 = vlog2.f32 %v4751_v39  ;;  %v4847_v6 = vsub.f32 1.0, %v4751_v39  ;;  %v4581_v48 = vmul.f32 %v6355_v63, %v9181_v55  ;;  %v4591_v18 = vand.u32 2147483648, %v9181_v55 }
 0x658   : > { %4975 = vst.msk [vmem:[%s8334_s28 + $0xa0] sm:$0xff] %vm4954_vm0, %v4942_v38  ;;  %6362 = vrcp.f32 %v9214_v32  ;;  %v3503_v25 = vsub.f32 0.0, %v3471_v26  ;;  %v6359_v4 = vpop.eup %6358  ;;  %v3948_v22 = vor.u32 1.1754944e-38, %v3947_v28  ;;  %v4147_v33 = vsub.f32 0.0, %v4115_v20  ;;  %v3429_v28 = vpop.xlane.xlu0 %3428 }
 0x659   : > { %6364 = vlog2.f32 %v4847_v6  ;;  %v4582_v14 = vsub.f32 1.0, %v4581_v48  ;;  %v3962_v46 = vand.u32 2147483648, %v9214_v32  ;;  %v9238_v44 = vadd.f32 1.0, %v6357_v27 }
 0x65a   : > { %v9240_v56 = vadd.f32 1.0, %v6359_v4  ;;  %6366 = vpow2.f32 %v4202_v58  ;;  %v3944_v24 = vsel %vm9233_vm11, %v9183_v8, %v3940_v36  ;;  %vm4585_vm12 = vweird.f32 %v9181_v55 }
 0x65b   : > { %v4583_v12 = vmul.f32 %v6355_v63, %v4582_v14  ;;  %vm4586_vm13 = vweird.f32 %v6355_v63  ;;  %vm9246_vm14 = vcmp.eq.f32.partialorder %v4589_v15, 8.507059e+37  ;;  %v4592_v34 = vor.u32 1.1754944e-38, %v4591_v18 }
 0x65c   : > { %6368 = vrcp.f32 %v9238_v44  ;;  %v3560_v59 = vmul.f32 1.442695, %v3503_v25  ;;  %v3960_v50 = vand.u32 2147483647, %v9214_v32  ;;  %v4204_v57 = vmul.f32 1.442695, %v4147_v33  ;;  %vm4587_vm15 = vmor %vm4585_vm12, %vm4586_vm13 }
 0x65d   : > { %v6361_v10 = vpop.eup %6360  ;;  %v4584_v41 = vadd.f32 %v6355_v63, %v4583_v12  ;;  %6370 = vrcp.f32 %v9240_v56  ;;  %v3949_v55 = vsel %vm9218_vm10, %v3948_v22, %v3944_v24  ;;  %vm3956_vm1 = vweird.f32 %v9214_v32 }
 0x65e   : > { %v9253_v54 = vpop.eup %6362  ;;  %v3963_v8 = vor.u32 1.1754944e-38, %v3962_v46  ;;  %v9259_v37 = vadd.f32 %v9027_v30, %v3426_v42  ;;  %v4604_v49 = vand.u32 2147483647, %v9238_v44  ;;  %v4606_v52 = vand.u32 2147483648, %v9238_v44 }
 0x65f   : > { %v6365_v13 = vpop.eup %6364  ;;  %v4588_v23 = vsel %vm4587_vm15, %v6355_v63, %v4584_v41  ;;  %v3952_v19 = vmul.f32 %v9253_v54, %v9214_v32  ;;  %v4805_v11 = vmul.f32 0.6931472, %v6361_v10  ;;  %6372 = vpow2.f32 %v3560_v59 }
 0x660   : > { %v6367_v47 = vpop.eup %6366  ;;  %v4901_v45 = vmul.f32 0.6931472, %v6365_v13  ;;  %v4593_v40 = vsel %vm9246_vm14, %v4592_v34, %v4588_v23  ;;  %vm9267_vm2 = vcmp.eq.f32.partialorder %v3960_v50, 8.507059e+37  ;;  %6374 = vpow2.f32 %v4204_v57 }
 0x661   : > { %v4752_v53 = vsub.f32 %v3949_v55, %v4593_v40  ;;  %v3953_v17 = vsub.f32 1.0, %v3952_v19  ;;  %v9271_v0 = vadd.f32 1.0, %v6367_v47  ;;  %vm3957_vm3 = vweird.f32 %v9253_v54 }
 0x662   : > { %v6369_v31 = vpop.eup %6368  ;;  %v4943_v29 = vsub.f32 %v4805_v11, %v4901_v45  ;;  %vm4600_vm5 = vweird.f32 %v9238_v44  ;;  %v3975_v7 = vand.u32 2147483647, %v9240_v56  ;;  %vm3971_vm6 = vweird.f32 %v9240_v56  ;;  %vm9296_vm8 = vmor %vm3956_vm1, %vm3957_vm3  ;;  %v3432_v45 = vpop.xlane.xlu1 %3431 }
 0x663   : > { %v9276_v3 = vpop.eup %6370  ;;  %6376 = vlog2.f32 %v4752_v53  ;;  %v4848_v2 = vsub.f32 1.0, %v4752_v53  ;;  %v3954_v16 = vmul.f32 %v9253_v54, %v3953_v17  ;;  %v4596_v21 = vmul.f32 %v6369_v31, %v9238_v44 }
 0x664   : > { %4976 = vst.msk [vmem:[%s8334_s28 + $0xa8] sm:$0xff] %vm4954_vm0, %v4943_v29  ;;  %vm9283_vm7 = vcmp.eq.f32.partialorder %v4604_v49, 8.507059e+37  ;;  %v3967_v1 = vmul.f32 %v9276_v3, %v9240_v56  ;;  %v3977_v9 = vand.u32 2147483648, %v9240_v56  ;;  %6378 = vrcp.f32 %v9271_v0 }
 0x665   : > { %6380 = vlog2.f32 %v4848_v2  ;;  %v3955_v61 = vadd.f32 %v9253_v54, %v3954_v16  ;;  %v4597_v26 = vsub.f32 1.0, %v4596_v21  ;;  %v4607_v39 = vor.u32 1.1754944e-38, %v4606_v52  ;;  %v6373_v20 = vpop.eup %6372 }
 0x666   : > { %vm4601_vm4 = vweird.f32 %v6369_v31  ;;  %v3968_v38 = vsub.f32 1.0, %v3967_v1  ;;  %v3504_v35 = vsub.f32 0.0, %v9259_v37  ;;  %v4116_v58 = vadd.f32 %v9056_v62, %v3426_v42  ;;  %v6375_v27 = vpop.eup %6374 }
 0x667   : > { %v3959_v6 = vsel %vm9296_vm8, %v9253_v54, %v3955_v61  ;;  %v4598_v36 = vmul.f32 %v6369_v31, %v4597_v26  ;;  %vm9305_vm9 = vcmp.eq.f32.partialorder %v3975_v7, 8.507059e+37  ;;  %v4619_v32 = vand.u32 2147483647, %v9271_v0  ;;  %vm4602_vm12 = vmor %vm4600_vm5, %vm4601_vm4 }
 0x668   : > { %v9310_v15 = vadd.f32 1.0, %v6373_v20  ;;  %v3969_v18 = vmul.f32 %v9276_v3, %v3968_v38  ;;  %v3978_v25 = vor.u32 1.1754944e-38, %v3977_v9  ;;  %v4621_v4 = vand.u32 2147483648, %v9271_v0 }
 0x669   : > { %v3473_v22 = vadd.f32 %v9027_v30, %v3429_v28  ;;  %v6377_v14 = vpop.eup %6376  ;;  %v4599_v33 = vadd.f32 %v6369_v31, %v4598_v36  ;;  %vm3972_vm10 = vweird.f32 %v9276_v3  ;;  %vm4615_vm11 = vweird.f32 %v9271_v0 }
 0x66a   : > { %6382 = vrcp.f32 %v9310_v15  ;;  %v6379_v5 = vpop.eup %6378  ;;  %v3964_v46 = vsel %vm9267_vm2, %v3963_v8, %v3959_v6  ;;  %v3970_v24 = vadd.f32 %v9276_v3, %v3969_v18  ;;  %v9324_v12 = vadd.f32 1.0, %v6375_v27  ;;  %vm9337_vm14 = vmor %vm3971_vm6, %vm3972_vm10 }
 0x66b   : > { %v3562_v42 = vmul.f32 1.442695, %v3504_v35  ;;  %v6381_v60 = vpop.eup %6380  ;;  %v4603_v34 = vsel %vm4602_vm12, %v6369_v31, %v4599_v33  ;;  %v4611_v59 = vmul.f32 %v6379_v5, %v9271_v0  ;;  %vm9327_vm13 = vcmp.eq.f32.partialorder %v4619_v32, 8.507059e+37 }
 0x66c   : > { %v4148_v41 = vsub.f32 0.0, %v4116_v58  ;;  %v4807_v50 = vmul.f32 0.6931472, %v6377_v14  ;;  %v4903_v57 = vmul.f32 0.6931472, %v6381_v60  ;;  %v4608_v44 = vsel %vm9283_vm7, %v4607_v39, %v4603_v34 }
 0x66d   : > { %v4622_v55 = vor.u32 1.1754944e-38, %v4621_v4  ;;  %v4753_v8 = vsub.f32 %v3964_v46, %v4608_v44  ;;  %v3974_v37 = vsel %vm9337_vm14, %v9276_v3, %v3970_v24  ;;  %v4612_v13 = vsub.f32 1.0, %v4611_v59 }
 0x66e   : > { %6384 = vrcp.f32 %v9324_v12  ;;  %v4944_v23 = vsub.f32 %v4807_v50, %v4903_v57  ;;  %vm4616_vm15 = vweird.f32 %v6379_v5  ;;  %vm3986_vm1 = vweird.f32 %v9310_v15 }
 0x66f   : > { %v3990_v56 = vand.u32 2147483647, %v9310_v15  ;;  %v3992_v19 = vand.u32 2147483648, %v9310_v15  ;;  %6386 = vlog2.f32 %v4753_v8  ;;  %v4849_v52 = vsub.f32 1.0, %v4753_v8  ;;  %vm4617_vm2 = vmor %vm4615_vm11, %vm4616_vm15 }
 0x670   : > { %v6383_v49 = vpop.eup %6382  ;;  %v4613_v47 = vmul.f32 %v6379_v5, %v4612_v13  ;;  %v4206_v11 = vmul.f32 1.442695, %v4148_v41  ;;  %4977 = vst.msk [vmem:[%s8334_s28 + $0xb0] sm:$0xff] %vm4954_vm0, %v4944_v23  ;;  %v3979_v40 = vsel %vm9305_vm9, %v3978_v25, %v3974_v37  ;;  %v4634_v17 = vand.u32 2147483647, %v9324_v12  ;;  %v9385_v41 = vpop.xlane.xlu2 %3434 }
 0x671   : > { %v3982_v53 = vmul.f32 %v6383_v49, %v9310_v15  ;;  %v4636_v51 = vand.u32 2147483648, %v9324_v12  ;;  %6388 = vlog2.f32 %v4849_v52  ;;  %v3505_v29 = vsub.f32 0.0, %v3473_v22 }
 0x672   : > { %v4614_v31 = vadd.f32 %v6379_v5, %v4613_v47  ;;  %v4117_v7 = vadd.f32 %v9056_v62, %v3429_v28  ;;  %vm9359_vm3 = vcmp.eq.f32.partialorder %v3990_v56, 8.507059e+37  ;;  %6390 = vpow2.f32 %v3562_v42 }
 0x673   : > { %v3983_v3 = vsub.f32 1.0, %v3982_v53  ;;  %v3474_v16 = vadd.f32 %v9027_v30, %v3432_v45  ;;  %v4118_v21 = vadd.f32 %v9056_v62, %v3432_v45  ;;  %6392 = vpow2.f32 %v4206_v11 }
 0x674   : > { %v6385_v43 = vpop.eup %6384  ;;  %v4618_v1 = vsel %vm4617_vm2, %v6379_v5, %v4614_v31  ;;  %v3564_v9 = vmul.f32 1.442695, %v3505_v29  ;;  %v4149_v61 = vsub.f32 0.0, %v4117_v7  ;;  %vm3987_vm5 = vweird.f32 %v6383_v49 }
 0x675   : > { %v4623_v26 = vsel %vm9327_vm13, %v4622_v55, %v4618_v1  ;;  %v3984_v0 = vmul.f32 %v6383_v49, %v3983_v3  ;;  %v4626_v39 = vmul.f32 %v6385_v43, %v9324_v12  ;;  %v6387_v28 = vpop.eup %6386  ;;  %v3506_v38 = vsub.f32 0.0, %v3474_v16  ;;  %vm9370_vm7 = vmor %vm3986_vm1, %vm3987_vm5  ;;  %v3441_v3 = vpop.xlane.xlu1 %3440 }
 0x676   : > { %v4754_v20 = vsub.f32 %v3979_v40, %v4623_v26  ;;  %6394 = vpow2.f32 %v3564_v9  ;;  %v4208_v63 = vmul.f32 1.442695, %v4149_v61  ;;  %v4809_v35 = vmul.f32 0.6931472, %v6387_v28 }
 0x677   : > { %v3985_v58 = vadd.f32 %v6383_v49, %v3984_v0  ;;  %v4627_v27 = vsub.f32 1.0, %v4626_v39  ;;  %vm4631_vm6 = vweird.f32 %v6385_v43  ;;  %v6389_v6 = vpop.eup %6388  ;;  %v3566_v32 = vmul.f32 1.442695, %v3506_v38 }
 0x678   : > { %6396 = vlog2.f32 %v4754_v20  ;;  %v4850_v36 = vsub.f32 1.0, %v4754_v20  ;;  %v4150_v18 = vsub.f32 0.0, %v4118_v21  ;;  %v6391_v25 = vpop.eup %6390  ;;  %v4905_v4 = vmul.f32 0.6931472, %v6389_v6 }
 0x679   : > { %v3989_v22 = vsel %vm9370_vm7, %v6383_v49, %v3985_v58  ;;  %v4628_v14 = vmul.f32 %v6385_v43, %v4627_v27  ;;  %6398 = vpow2.f32 %v4208_v63  ;;  %v6393_v33 = vpop.eup %6392  ;;  %v3993_v5 = vor.u32 1.1754944e-38, %v3992_v19 }
 0x67a   : > { %6400 = vlog2.f32 %v4850_v36  ;;  %vm4630_vm8 = vweird.f32 %v9324_v12  ;;  %v9377_v15 = vadd.f32 1.0, %v6391_v25  ;;  %v4945_v46 = vsub.f32 %v4809_v35, %v4905_v4 }
 0x67b   : > { %v4629_v24 = vadd.f32 %v6385_v43, %v4628_v14  ;;  %v9379_v42 = vadd.f32 1.0, %v6393_v33  ;;  %6402 = vpow2.f32 %v3566_v32  ;;  %v3994_v34 = vsel %vm9359_vm3, %v3993_v5, %v3989_v22  ;;  %vm4632_vm4 = vmor %vm4630_vm8, %vm4631_vm6 }
 0x67c   : > { %v6395_v60 = vpop.eup %6394  ;;  %v4637_v59 = vor.u32 1.1754944e-38, %v4636_v51  ;;  %6404 = vrcp.f32 %v9377_v15  ;;  %v4210_v10 = vmul.f32 1.442695, %v4150_v18  ;;  %4978 = vst.msk [vmem:[%s8334_s28 + $0xb8] sm:$0xff] %vm4954_vm0, %v4945_v46  ;;  %vm4635_vm9 = vcmp.eq.f32.partialorder %v4634_v17, 8.507059e+37 }
 0x67d   : > { %v4633_v12 = vsel %vm4632_vm4, %v6385_v43, %v4629_v24  ;;  %6406 = vrcp.f32 %v9379_v42  ;;  %v4005_v55 = vand.u32 2147483647, %v9377_v15  ;;  %v9391_v8 = vadd.f32 1.0, %v6395_v60 }
 0x67e   : > { %v6397_v50 = vpop.eup %6396  ;;  %v4638_v57 = vsel %vm4635_vm9, %v4637_v59, %v4633_v12  ;;  %v3475_v37 = vadd.f32 %v9027_v30, %v9385_v41  ;;  %v4007_v56 = vand.u32 2147483648, %v9377_v15  ;;  %v4649_v19 = vand.u32 2147483647, %v9379_v42 }
 0x67f   : > { %v6399_v44 = vpop.eup %6398  ;;  %v4755_v54 = vsub.f32 %v3994_v34, %v4638_v57  ;;  %v4811_v23 = vmul.f32 0.6931472, %v6397_v50  ;;  %6408 = vpow2.f32 %v4210_v10  ;;  %vm4001_vm10 = vweird.f32 %v9377_v15 }
 0x680   : > { %v6401_v13 = vpop.eup %6400  ;;  %v9397_v11 = vadd.f32 1.0, %v6399_v44  ;;  %vm4645_vm11 = vweird.f32 %v9379_v42  ;;  %v4651_v30 = vand.u32 2147483648, %v9379_v42  ;;  %vm9404_vm12 = vcmp.eq.f32.partialorder %v4005_v55, 8.507059e+37 }
 0x681   : > { %v6403_v49 = vpop.eup %6402  ;;  %v4907_v52 = vmul.f32 0.6931472, %v6401_v13  ;;  %6410 = vlog2.f32 %v4755_v54  ;;  %v4851_v47 = vsub.f32 1.0, %v4755_v54  ;;  %v4022_v31 = vand.u32 2147483648, %v9391_v8 }
 0x682   : > { %v6405_v45 = vpop.eup %6404  ;;  %6412 = vrcp.f32 %v9391_v8  ;;  %v4008_v29 = vor.u32 1.1754944e-38, %v4007_v56  ;;  %vm9410_vm13 = vcmp.eq.f32.partialorder %v4649_v19, 8.507059e+37  ;;  %v3507_v2 = vsub.f32 0.0, %v3475_v37 }
 0x683   : > { %v6407_v40 = vpop.eup %6406  ;;  %v4946_v53 = vsub.f32 %v4811_v23, %v4907_v52  ;;  %6414 = vlog2.f32 %v4851_v47  ;;  %v3997_v17 = vmul.f32 %v6405_v45, %v9377_v15  ;;  %v4020_v21 = vand.u32 2147483647, %v9391_v8  ;;  %v3438_v52 = vpop.xlane.xlu0 %3437 }
 0x684   : > { %v4641_v7 = vmul.f32 %v6407_v40, %v9379_v42  ;;  %6416 = vrcp.f32 %v9397_v11  ;;  %v4666_v43 = vand.u32 2147483648, %v9397_v11  ;;  %vm4002_vm14 = vweird.f32 %v6405_v45 }
 0x685   : > { %4979 = vst.msk [vmem:[%s8334_s28 + $0xc0] sm:$0xff] %vm4954_vm0, %v4946_v53  ;;  %v3998_v16 = vsub.f32 1.0, %v3997_v17  ;;  %v6409_v1 = vpop.eup %6408  ;;  %v4652_v61 = vor.u32 1.1754944e-38, %v4651_v30  ;;  %v9419_v26 = vadd.f32 1.0, %v6403_v49  ;;  %vm4646_vm15 = vweird.f32 %v6407_v40  ;;  %vm4003_vm3 = vmor %vm4001_vm10, %vm4002_vm14 }
 0x686   : > { %v4642_v9 = vsub.f32 1.0, %v4641_v7  ;;  %vm4016_vm1 = vweird.f32 %v9391_v8  ;;  %v4023_v28 = vor.u32 1.1754944e-38, %v4022_v31  ;;  %v9422_v20 = vadd.f32 1.0, %v6409_v1  ;;  %vm4647_vm6 = vmor %vm4645_vm11, %vm4646_vm15 }
 0x687   : > { %v6411_v0 = vpop.eup %6410  ;;  %v3999_v39 = vmul.f32 %v6405_v45, %v3998_v16  ;;  %v4664_v35 = vand.u32 2147483647, %v9397_v11  ;;  %6418 = vrcp.f32 %v9419_v26  ;;  %v3568_v58 = vmul.f32 1.442695, %v3507_v2 }
 0x688   : > { %v6413_v63 = vpop.eup %6412  ;;  %v4643_v38 = vmul.f32 %v6407_v40, %v4642_v9  ;;  %vm9427_vm2 = vcmp.eq.f32.partialorder %v4020_v21, 8.507059e+37  ;;  %v9431_v32 = vor.u32 1.1754944e-38, %v4666_v43  ;;  %v9435_v18 = vadd.f32 %v9056_v62, %v9385_v41 }
 0x689   : > { %v6415_v27 = vpop.eup %6414  ;;  %v4000_v6 = vadd.f32 %v6405_v45, %v3999_v39  ;;  %v4012_v36 = vmul.f32 %v6413_v63, %v9391_v8  ;;  %v4813_v25 = vmul.f32 0.6931472, %v6411_v0  ;;  %vm4660_vm5 = vweird.f32 %v9397_v11 }
 0x68a   : > { %v4909_v4 = vmul.f32 0.6931472, %v6415_v27  ;;  %v4644_v22 = vadd.f32 %v6407_v40, %v4643_v38  ;;  %6420 = vrcp.f32 %v9422_v20  ;;  %v6417_v14 = vpop.eup %6416  ;;  %v4035_v46 = vand.u32 2147483647, %v9419_v26 }
 0x68b   : > { %v4004_v33 = vsel %vm4003_vm3, %v6405_v45, %v4000_v6  ;;  %v4013_v5 = vsub.f32 1.0, %v4012_v36  ;;  %v4037_v24 = vand.u32 2147483648, %v9419_v26  ;;  %v4656_v59 = vmul.f32 %v6417_v14, %v9397_v11 }
 0x68c   : > { %v4947_v60 = vsub.f32 %v4813_v25, %v4909_v4  ;;  %v4009_v15 = vsel %vm9404_vm12, %v4008_v29, %v4004_v33  ;;  %v4648_v34 = vsel %vm4647_vm6, %v6407_v40, %v4644_v22  ;;  %vm9450_vm7 = vcmp.eq.f32.partialorder %v4664_v35, 8.507059e+37  ;;  %v6479_v29 = vld [vmem:[%s9731_s12] ss:$0 sm:$0xff] }
 0x68d   : > { %v4653_v42 = vsel %vm9410_vm13, %v4652_v61, %v4648_v34  ;;  %v4014_v41 = vmul.f32 %v6413_v63, %v4013_v5  ;;  %vm4017_vm8 = vweird.f32 %v6413_v63  ;;  %vm4031_vm4 = vweird.f32 %v9419_v26  ;;  %v6419_v12 = vpop.eup %6418 }
 0x68e   : > { %4980 = vst.msk [vmem:[%s8334_s28 + $0xc8] sm:$0xff] %vm4954_vm0, %v4947_v60  ;;  %v4756_v50 = vsub.f32 %v4009_v15, %v4653_v42  ;;  %v4657_v57 = vsub.f32 1.0, %v4656_v59  ;;  %vm4661_vm9 = vweird.f32 %v6417_v14  ;;  %v4679_v44 = vand.u32 2147483647, %v9422_v20  ;;  %vm4018_vm12 = vmor %vm4016_vm1, %vm4017_vm8 }
 0x68f   : > { %v4015_v54 = vadd.f32 %v6413_v63, %v4014_v41  ;;  %v4027_v55 = vmul.f32 %v6419_v12, %v9419_v26  ;;  %vm9461_vm10 = vcmp.eq.f32.partialorder %v4035_v46, 8.507059e+37  ;;  %v4038_v13 = vor.u32 1.1754944e-38, %v4037_v24  ;;  %vm4662_vm15 = vmor %vm4660_vm5, %vm4661_vm9  ;;  %v6480_v26 = vld [vmem:[%s9732_s13] ss:$0 sm:$0xff] }
 0x690   : > { %vm4675_vm11 = vweird.f32 %v9422_v20  ;;  %6422 = vpow2.f32 %v3568_v58  ;;  %v6421_v23 = vpop.eup %6420  ;;  %v4852_v56 = vsub.f32 1.0, %v4756_v50  ;;  %v4658_v19 = vmul.f32 %v6417_v14, %v4657_v57 }
 0x691   : > { %6424 = vlog2.f32 %v4756_v50  ;;  %v4681_v49 = vand.u32 2147483648, %v9422_v20  ;;  %v4019_v47 = vsel %vm4018_vm12, %v6413_v63, %v4015_v54  ;;  %v4028_v45 = vsub.f32 1.0, %v4027_v55 }
 0x692   : > { %vm4032_vm13 = vweird.f32 %v6419_v12  ;;  %v4671_v30 = vmul.f32 %v6421_v23, %v9422_v20  ;;  %6426 = vlog2.f32 %v4852_v56  ;;  %v4024_v40 = vsel %vm9427_vm2, %v4023_v28, %v4019_v47 }
 0x693   : > { %v4659_v53 = vadd.f32 %v6417_v14, %v4658_v19  ;;  %vm9473_vm14 = vcmp.eq.f32.partialorder %v4679_v44, 8.507059e+37  ;;  %v4029_v8 = vmul.f32 %v6419_v12, %v4028_v45  ;;  %v4151_v31 = vsub.f32 0.0, %v9435_v18  ;;  %vm4033_vm2 = vmor %vm4031_vm4, %vm4032_vm13 }
 0x694   : > { %v4672_v51 = vsub.f32 1.0, %v4671_v30  ;;  %v3476_v7 = vadd.f32 %v6479_v29, %v3438_v52  ;;  %vm4676_vm1 = vweird.f32 %v6421_v23  ;;  %v4682_v16 = vor.u32 1.1754944e-38, %v4681_v49 }
 0x695   : > { %v4663_v2 = vsel %vm4662_vm15, %v6417_v14, %v4659_v53  ;;  %v4120_v21 = vadd.f32 %v9056_v62, %v3438_v52  ;;  %v4030_v1 = vadd.f32 %v6419_v12, %v4029_v8  ;;  %v4212_v61 = vmul.f32 1.442695, %v4151_v31  ;;  %vm4677_vm3 = vmor %vm4675_vm11, %vm4676_vm1 }
 0x696   : > { %v6423_v43 = vpop.eup %6422  ;;  %v4668_v11 = vsel %vm9450_vm7, %v9431_v32, %v4663_v2  ;;  %v4673_v9 = vmul.f32 %v6421_v23, %v4672_v51  ;;  %v3508_v63 = vsub.f32 0.0, %v3476_v7  ;;  %v3477_v38 = vadd.f32 %v6479_v29, %v3441_v3 }
 0x697   : > { %v6425_v0 = vpop.eup %6424  ;;  %v4757_v39 = vsub.f32 %v4024_v40, %v4668_v11  ;;  %v9491_v28 = vadd.f32 1.0, %v6423_v43  ;;  %v4034_v35 = vsel %vm4033_vm2, %v6419_v12, %v4030_v1  ;;  %6428 = vpow2.f32 %v4212_v61 }
 0x698   : > { %v4674_v62 = vadd.f32 %v6421_v23, %v4673_v9  ;;  %v4152_v58 = vsub.f32 0.0, %v4120_v21  ;;  %v6427_v27 = vpop.eup %6426  ;;  %v4039_v36 = vsel %vm9461_vm10, %v4038_v13, %v4034_v35  ;;  %v4121_v48 = vadd.f32 %v6480_v26, %v3441_v3 }
 0x699   : > { %6430 = vlog2.f32 %v4757_v39  ;;  %v4853_v6 = vsub.f32 1.0, %v4757_v39  ;;  %v4815_v32 = vmul.f32 0.6931472, %v6425_v0  ;;  %v4911_v18 = vmul.f32 0.6931472, %v6427_v27 }
 0x69a   : > { %v4678_v25 = vsel %vm4677_vm3, %v6421_v23, %v4674_v62  ;;  %6432 = vrcp.f32 %v9491_v28  ;;  %v3570_v22 = vmul.f32 1.442695, %v3508_v63  ;;  %v4214_v20 = vmul.f32 1.442695, %v4152_v58 }
 0x69b   : > { %6434 = vlog2.f32 %v4853_v6  ;;  %v4683_v4 = vsel %vm9473_vm14, %v4682_v16, %v4678_v25  ;;  %v4948_v14 = vsub.f32 %v4815_v32, %v4911_v18  ;;  %v3509_v5 = vsub.f32 0.0, %v3477_v38 }
 0x69c   : > { %v4758_v33 = vsub.f32 %v4039_v36, %v4683_v4  ;;  %6436 = vpow2.f32 %v3570_v22  ;;  %v4153_v46 = vsub.f32 0.0, %v4121_v48  ;;  %v4050_v51 = vand.u32 2147483647, %v9491_v28 }
 0x69d   : > { %v6429_v24 = vpop.eup %6428  ;;  %4981 = vst.msk [vmem:[%s8334_s28 + $0xd0] sm:$0xff] %vm4954_vm0, %v4948_v14  ;;  %v3572_v59 = vmul.f32 1.442695, %v3509_v5  ;;  %v4052_v31 = vand.u32 2147483648, %v9491_v28  ;;  %vm4046_vm6 = vweird.f32 %v9491_v28 }
 0x69e   : > { %6438 = vlog2.f32 %v4758_v33  ;;  %v4854_v60 = vsub.f32 1.0, %v4758_v33  ;;  %v9506_v34 = vadd.f32 1.0, %v6429_v24  ;;  %v4216_v10 = vmul.f32 1.442695, %v4153_v46 }
 0x69f   : > { %v6431_v15 = vpop.eup %6430  ;;  %6440 = vpow2.f32 %v4214_v20  ;;  %vm4051_vm4 = vcmp.eq.f32.partialorder %v4050_v51, 8.507059e+37  ;;  %v4053_v9 = vor.u32 1.1754944e-38, %v4052_v31 }
 0x6a0   : > { %v6433_v42 = vpop.eup %6432  ;;  %6442 = vlog2.f32 %v4854_v60  ;;  %v4817_v50 = vmul.f32 0.6931472, %v6431_v15  ;;  %v4696_v3 = vand.u32 2147483648, %v9506_v34  ;;  %v4694_v1 = vand.u32 2147483647, %v9506_v34 }
 0x6a1   : > { %v6435_v41 = vpop.eup %6434  ;;  %v4042_v12 = vmul.f32 %v6433_v42, %v9491_v28  ;;  %6444 = vrcp.f32 %v9506_v34  ;;  %vm4047_vm5 = vweird.f32 %v6433_v42  ;;  %vm4690_vm9 = vweird.f32 %v9506_v34 }
 0x6a2   : > { %v4913_v57 = vmul.f32 0.6931472, %v6435_v41  ;;  %6446 = vpow2.f32 %v3572_v59  ;;  %v6437_v44 = vpop.eup %6436  ;;  %vm9524_vm7 = vmor %vm4046_vm6, %vm4047_vm5  ;;  %v4697_v38 = vor.u32 1.1754944e-38, %v4696_v3  ;;  %vm4695_vm11 = vcmp.eq.f32.partialorder %v4694_v1, 8.507059e+37 }
 0x6a3   : > { %v4043_v54 = vsub.f32 1.0, %v4042_v12  ;;  %6448 = vpow2.f32 %v4216_v10  ;;  %v9510_v13 = vadd.f32 1.0, %v6437_v44 }
 0x6a4   : > { %v6439_v55 = vpop.eup %6438  ;;  %v4949_v37 = vsub.f32 %v4817_v50, %v4913_v57 }
 0x6a5   : > { %v6441_v23 = vpop.eup %6440  ;;  %v4044_v56 = vmul.f32 %v6433_v42, %v4043_v54  ;;  %6450 = vrcp.f32 %v9510_v13  ;;  %v4819_v52 = vmul.f32 0.6931472, %v6439_v55  ;;  %v4065_v39 = vand.u32 2147483647, %v9510_v13 }
 0x6a6   : > { %v6443_v19 = vpop.eup %6442  ;;  %4982 = vst.msk [vmem:[%s8334_s28 + $0xd8] sm:$0xff] %vm4954_vm0, %v4949_v37  ;;  %v9515_v45 = vadd.f32 1.0, %v6441_v23  ;;  %v4067_v62 = vand.u32 2147483648, %v9510_v13  ;;  %vm4061_vm13 = vweird.f32 %v9510_v13 }
 0x6a7   : > { %v6445_v49 = vpop.eup %6444  ;;  %v4915_v47 = vmul.f32 0.6931472, %v6443_v19  ;;  %v4045_v40 = vadd.f32 %v6433_v42, %v4044_v56  ;;  %vm9546_vm14 = vcmp.eq.f32.partialorder %v4065_v39, 8.507059e+37 }
 0x6a8   : > { %v6447_v30 = vpop.eup %6446  ;;  %v4686_v53 = vmul.f32 %v6445_v49, %v9506_v34  ;;  %6452 = vrcp.f32 %v9515_v45  ;;  %vm4691_vm8 = vweird.f32 %v6445_v49  ;;  %v4709_v6 = vand.u32 2147483647, %v9515_v45 }
 0x6a9   : > { %v6449_v17 = vpop.eup %6448  ;;  %v4950_v8 = vsub.f32 %v4819_v52, %v4915_v47  ;;  %v9529_v2 = vadd.f32 1.0, %v6447_v30  ;;  %v4049_v43 = vsel %vm9524_vm7, %v6433_v42, %v4045_v40  ;;  %vm4692_vm10 = vmor %vm4690_vm9, %vm4691_vm8  ;;  %v4711_v48 = vand.u32 2147483648, %v9515_v45 }
 0x6aa   : > { %v4687_v29 = vsub.f32 1.0, %v4686_v53  ;;  %v9531_v16 = vadd.f32 1.0, %v6449_v17  ;;  %v4054_v63 = vsel %vm4051_vm4, %v4053_v9, %v4049_v43  ;;  %v4068_v14 = vor.u32 1.1754944e-38, %v4067_v62 }
 0x6ab   : > { %4983 = vst.msk [vmem:[%s8334_s28 + $0xe0] sm:$0xff] %vm4954_vm0, %v4950_v8  ;;  %v6451_v21 = vpop.eup %6450  ;;  %6454 = vrcp.f32 %v9529_v2  ;;  %vm4705_vm15 = vweird.f32 %v9515_v45  ;;  %vm9552_vm3 = vcmp.eq.f32.partialorder %v4709_v6, 8.507059e+37  ;;  %v4712_v15 = vor.u32 1.1754944e-38, %v4711_v48 }
 0x6ac   : > { %v4688_v11 = vmul.f32 %v6445_v49, %v4687_v29  ;;  %v4057_v61 = vmul.f32 %v6451_v21, %v9510_v13  ;;  %6456 = vrcp.f32 %v9531_v16  ;;  %vm4062_vm12 = vweird.f32 %v6451_v21 }
 0x6ad   : > { %vm4063_vm2 = vmor %vm4061_vm13, %vm4062_vm12  ;;  %v4080_v42 = vand.u32 2147483647, %v9529_v2  ;;  %v4082_v12 = vand.u32 2147483648, %v9529_v2  ;;  %v4724_v57 = vand.u32 2147483647, %v9531_v16  ;;  %v4726_v55 = vand.u32 2147483648, %v9531_v16 }
 0x6ae   : > { %v4689_v0 = vadd.f32 %v6445_v49, %v4688_v11  ;;  %v6453_v28 = vpop.eup %6452  ;;  %v4058_v35 = vsub.f32 1.0, %v4057_v61  ;;  %vm4076_vm8 = vweird.f32 %v9529_v2  ;;  %vm4720_vm4 = vweird.f32 %v9531_v16 }
 0x6af   : > { %v4701_v27 = vmul.f32 %v6453_v28, %v9515_v45  ;;  %vm4706_vm1 = vweird.f32 %v6453_v28  ;;  %v4727_v40 = vor.u32 1.1754944e-38, %v4726_v55 }
 0x6b0   : > { %v4693_v58 = vsel %vm4692_vm10, %v6445_v49, %v4689_v0  ;;  %v4059_v26 = vmul.f32 %v6451_v21, %v4058_v35  ;;  %vm4707_vm5 = vmor %vm4705_vm15, %vm4706_vm1  ;;  %vm4081_vm10 = vcmp.eq.f32.partialorder %v4080_v42, 8.507059e+37  ;;  %v4083_v49 = vor.u32 1.1754944e-38, %v4082_v12 }
 0x6b1   : > { %v4698_v36 = vsel %vm4695_vm11, %v4697_v38, %v4693_v58  ;;  %v4702_v25 = vsub.f32 1.0, %v4701_v27  ;;  %v6455_v4 = vpop.eup %6454  ;;  %vm4725_vm11 = vcmp.eq.f32.partialorder %v4724_v57, 8.507059e+37 }
 0x6b2   : > { %v4759_v32 = vsub.f32 %v4054_v63, %v4698_v36  ;;  %v4060_v22 = vadd.f32 %v6451_v21, %v4059_v26  ;;  %v6457_v33 = vpop.eup %6456  ;;  %v4072_v46 = vmul.f32 %v6455_v4, %v9529_v2  ;;  %vm4077_vm6 = vweird.f32 %v6455_v4 }
 0x6b3   : > { %v4703_v5 = vmul.f32 %v6453_v28, %v4702_v25  ;;  %v4716_v34 = vmul.f32 %v6457_v33, %v9531_v16  ;;  %vm4721_vm7 = vweird.f32 %v6457_v33  ;;  %vm4078_vm9 = vmor %vm4076_vm8, %vm4077_vm6 }
 0x6b4   : > { %6458 = vlog2.f32 %v4759_v32  ;;  %v4855_v20 = vsub.f32 1.0, %v4759_v32  ;;  %v4064_v24 = vsel %vm4063_vm2, %v6451_v21, %v4060_v22  ;;  %v4073_v10 = vsub.f32 1.0, %v4072_v46  ;;  %vm4722_vm12 = vmor %vm4720_vm4, %vm4721_vm7 }
 0x6b5   : > { %v4704_v59 = vadd.f32 %v6453_v28, %v4703_v5  ;;  %v4069_v41 = vsel %vm9546_vm14, %v4068_v14, %v4064_v24  ;;  %v4717_v50 = vsub.f32 1.0, %v4716_v34 }
 0x6b6   : > { %6460 = vlog2.f32 %v4855_v20  ;;  %v4074_v54 = vmul.f32 %v6455_v4, %v4073_v10 }
 0x6b7   : > { %v4708_v44 = vsel %vm4707_vm5, %v6453_v28, %v4704_v59  ;;  %v4718_v13 = vmul.f32 %v6457_v33, %v4717_v50 }
 0x6b8   : > { %v4713_v37 = vsel %vm9552_vm3, %v4712_v15, %v4708_v44  ;;  %v4075_v19 = vadd.f32 %v6455_v4, %v4074_v54 }
 0x6b9   : > { %v4760_v56 = vsub.f32 %v4069_v41, %v4713_v37  ;;  %v4719_v52 = vadd.f32 %v6457_v33, %v4718_v13 }
 0x6ba   : > { %v6459_v23 = vpop.eup %6458  ;;  %v4079_v30 = vsel %vm4078_vm9, %v6455_v4, %v4075_v19 }
 0x6bb   : > { %6462 = vlog2.f32 %v4760_v56  ;;  %v4856_v45 = vsub.f32 1.0, %v4760_v56  ;;  %v4821_v53 = vmul.f32 0.6931472, %v6459_v23  ;;  %v4084_v8 = vsel %vm4081_vm10, %v4083_v49, %v4079_v30 }
 0x6bc   : > { %v6461_v47 = vpop.eup %6460  ;;  %v4723_v51 = vsel %vm4722_vm12, %v6457_v33, %v4719_v52 }
 0x6bd   : > { %v4917_v17 = vmul.f32 0.6931472, %v6461_v47  ;;  %6464 = vlog2.f32 %v4856_v45  ;;  %v4728_v31 = vsel %vm4725_vm11, %v4727_v40, %v4723_v51 }
 0x6be   : > { %v4761_v7 = vsub.f32 %v4084_v8, %v4728_v31 }
 0x6bf   : > { %v4951_v29 = vsub.f32 %v4821_v53, %v4917_v17 }
 0x6c0   : > { %6466 = vlog2.f32 %v4761_v7  ;;  %v4857_v3 = vsub.f32 1.0, %v4761_v7 }
 0x6c1   : > { %4984 = vst.msk [vmem:[%s8334_s28 + $0xe8] sm:$0xff] %vm4954_vm0, %v4951_v29  ;;  %v6463_v2 = vpop.eup %6462 }
 0x6c2   : > { %6468 = vlog2.f32 %v4857_v3  ;;  %v4823_v21 = vmul.f32 0.6931472, %v6463_v2 }
 0x6c3   : > { %v6465_v16 = vpop.eup %6464 }
 0x6c4   : > { %v4919_v43 = vmul.f32 0.6931472, %v6465_v16 }
 0x6c6   : > { %v6467_v11 = vpop.eup %6466  ;;  %v4952_v1 = vsub.f32 %v4823_v21, %v4919_v43 }
 0x6c7   : > { %v4825_v61 = vmul.f32 0.6931472, %v6467_v11 }
 0x6c8   : > { %v6469_v9 = vpop.eup %6468  ;;  %4985 = vst.msk [vmem:[%s8334_s28 + $0xf0] sm:$0xff] %vm4954_vm0, %v4952_v1 }
 0x6c9   : > { %v4921_v0 = vmul.f32 0.6931472, %v6469_v9  ;;  %4993 = sbr.rel (!%p6669_p4) target bundleno = 1806 (0x70e), region = 80 }
 0x6cb   : > { %v4953_v39 = vsub.f32 %v4825_v61, %v4921_v0 }
 0x6cd   : > { %4986 = vst.msk [vmem:[%s8334_s28 + $0xf8] sm:$0xff] %vm4954_vm0, %v4953_v39 }
 0x6ce   : > { %s9915_s30 = smov (!%p4996_p8, %s4995_s30), 32 }
 0x6cf   : > { %s5872_s22 = sshll.u32 %s9915_s30, 3 }
 0x6d0   : > { %p5875_p9 = scmp.eq.s32.totalorder %s5872_s22, 0 }
 0x6d1   : > { %s9590_s23 = sshrl.u32 (!%p5875_p9), %s9915_s30, 5 }
 0x6d2   : > { %5004 = sbr.rel (%p5875_p9) target bundleno = 1806 (0x70e), region = 84  ;;  %p5876_p10 = scmp.le.s32.totalorder (!%p5875_p9), %s9590_s23, 0 }
 0x6d7   : > { %5283 = sbr.rel (%p5876_p10) target bundleno = 1789 (0x6fd), region = 160  ;;  %s9906_s16 = smov (!%p5876_p10), %s9584_s19 }
 0x6d8   : > { %s9907_s21 = smov (!%p5876_p10), %s8334_s28  ;;  %s9599_s24 = smov (!%p5876_p10), 0  }
 0x6d9   : > { %s9601_s25 = smov (!%p5876_p10), 0  }
 0x6dc LB: >> { %v5129_v28 = vld [vmem:[%s6543_s21] sm:$0xff]  ;;  %v5131_v63 = vld [vmem:[%s6543_s21 + $0x8] sm:$0xff]  ;;  %v5133_v38 = vld [vmem:[%s6543_s21 + $0x10] sm:$0xff]  ;;  %s5193_s26 = sadd.s32 1, %s6547_s24  ;;  %s5123_s25 = sadd.s32 1, %s6551_s25   ;;  %s6551_s25 = sphi %s9601_s25, %s5123_s25   ;;  %s6547_s24 = sphi %s9599_s24, %s9910_s24   ;;  %s6543_s21 = sphi %s9907_s21, %s9909_s21   ;;  %s6539_s16 = sphi %s9906_s16, %s9908_s16  }
 0x6dd   : >> { %5130 = vst [vmem:[%s6539_s16] sm:$0xff] %v5129_v28  ;;  %v5135_v35 = vld [vmem:[%s6543_s21 + $0x18] sm:$0xff]  ;;  %p5194_p11 = scmp.ge.s32.totalorder %s5193_s26, %s9590_s23  ;;  %v5137_v62 = vld [vmem:[%s6543_s21 + $0x20] sm:$0xff]  ;;  %v5139_v58 = vld [vmem:[%s6543_s21 + $0x28] sm:$0xff]  ;;  %p5122_p12 = scmp.ge.s32.totalorder %s5123_s25, %s9590_s23 }
 0x6de   : >> { %5132 = vst [vmem:[%s6539_s16 + $0x8] sm:$0xff] %v5131_v63  ;;  %v5141_v27 = vld [vmem:[%s6543_s21 + $0x30] sm:$0xff]  ;;  %v5143_v6 = vld [vmem:[%s6543_s21 + $0x38] sm:$0xff]  ;;  %v5145_v36 = vld [vmem:[%s6543_s21 + $0x40] sm:$0xff] }
 0x6df   : >> { %5134 = vst [vmem:[%s6539_s16 + $0x10] sm:$0xff] %v5133_v38  ;;  %s9917_s26 = smov (%p5194_p11, %s5193_s26), 0  ;;  %v5147_v26 = vld [vmem:[%s6543_s21 + $0x48] sm:$0xff]  ;;  %v5149_v48 = vld [vmem:[%s6543_s21 + $0x50] sm:$0xff]  ;;  %v5151_v32 = vld [vmem:[%s6543_s21 + $0x58] sm:$0xff] }
 0x6e0   : >> { %5136 = vst [vmem:[%s6539_s16 + $0x18] sm:$0xff] %v5135_v35  ;;  %s5877_s20 = sshll.u32 %s9917_s26, 8  ;;  %v5153_v18 = vld [vmem:[%s6543_s21 + $0x60] sm:$0xff]  ;;  %v5155_v25 = vld [vmem:[%s6543_s21 + $0x68] sm:$0xff]  ;;  %v5157_v4 = vld [vmem:[%s6543_s21 + $0x70] sm:$0xff]  ;;  %s9910_s24 = smov %s9917_s26 }
 0x6e1   : >> { %5138 = vst [vmem:[%s6539_s16 + $0x20] sm:$0xff] %v5137_v62  ;;  %s9633_s27 = scalar_lea.vmem %s8334_s28, %s5877_s20 [#allocation2]   ;;  %s9636_s29 = scalar_lea.vmem %s9584_s19, %s5877_s20   ;;  %v5159_v22 = vld [vmem:[%s6543_s21 + $0x78] sm:$0xff]  ;;  %v5161_v14 = vld [vmem:[%s6543_s21 + $0x80] sm:$0xff]  ;;  %v5163_v33 = vld [vmem:[%s6543_s21 + $0x88] sm:$0xff] }
 0x6e2   : >> { %5140 = vst [vmem:[%s6539_s16 + $0x28] sm:$0xff] %v5139_v58  ;;  %v5165_v20 = vld [vmem:[%s6543_s21 + $0x90] sm:$0xff]  ;;  %v5167_v5 = vld [vmem:[%s6543_s21 + $0x98] sm:$0xff]  ;;  %v5169_v46 = vld [vmem:[%s6543_s21 + $0xa0] sm:$0xff] }
 0x6e3   : >> { %5142 = vst [vmem:[%s6539_s16 + $0x30] sm:$0xff] %v5141_v27  ;;  %v5171_v24 = vld [vmem:[%s6543_s21 + $0xa8] sm:$0xff]  ;;  %v5173_v60 = vld [vmem:[%s6543_s21 + $0xb0] sm:$0xff]  ;;  %v5175_v15 = vld [vmem:[%s6543_s21 + $0xb8] sm:$0xff] }
 0x6e4   : >> { %5144 = vst [vmem:[%s6539_s16 + $0x38] sm:$0xff] %v5143_v6  ;;  %v5177_v34 = vld [vmem:[%s6543_s21 + $0xc0] sm:$0xff]  ;;  %v5179_v59 = vld [vmem:[%s6543_s21 + $0xc8] sm:$0xff]  ;;  %v5181_v10 = vld [vmem:[%s6543_s21 + $0xd0] sm:$0xff] }
 0x6e5   : >> { %5146 = vst [vmem:[%s6539_s16 + $0x40] sm:$0xff] %v5145_v36  ;;  %v5183_v42 = vld [vmem:[%s6543_s21 + $0xd8] sm:$0xff]  ;;  %v5185_v41 = vld [vmem:[%s6543_s21 + $0xe0] sm:$0xff]  ;;  %v5187_v12 = vld [vmem:[%s6543_s21 + $0xe8] sm:$0xff] }
 0x6e6   : >> { %5148 = vst [vmem:[%s6539_s16 + $0x48] sm:$0xff] %v5147_v26  ;;  %v5189_v50 = vld [vmem:[%s6543_s21 + $0xf0] sm:$0xff]  ;;  %v5191_v57 = vld [vmem:[%s6543_s21 + $0xf8] sm:$0xff]  ;;  %s9909_s21 = smov %s9633_s27 }
 0x6e7   : >> { %5150 = vst [vmem:[%s6539_s16 + $0x50] sm:$0xff] %v5149_v48 }
 0x6e8   : >> { %5152 = vst [vmem:[%s6539_s16 + $0x58] sm:$0xff] %v5151_v32 }
 0x6e9   : >> { %5154 = vst [vmem:[%s6539_s16 + $0x60] sm:$0xff] %v5153_v18 }
 0x6ea   : >> { %5156 = vst [vmem:[%s6539_s16 + $0x68] sm:$0xff] %v5155_v25 }
 0x6eb   : >> { %5158 = vst [vmem:[%s6539_s16 + $0x70] sm:$0xff] %v5157_v4 }
 0x6ec   : >> { %5160 = vst [vmem:[%s6539_s16 + $0x78] sm:$0xff] %v5159_v22 }
 0x6ed   : >> { %5162 = vst [vmem:[%s6539_s16 + $0x80] sm:$0xff] %v5161_v14 }
 0x6ee   : >> { %5164 = vst [vmem:[%s6539_s16 + $0x88] sm:$0xff] %v5163_v33 }
 0x6ef   : >> { %5166 = vst [vmem:[%s6539_s16 + $0x90] sm:$0xff] %v5165_v20 }
 0x6f0   : >> { %5168 = vst [vmem:[%s6539_s16 + $0x98] sm:$0xff] %v5167_v5 }
 0x6f1   : >> { %5170 = vst [vmem:[%s6539_s16 + $0xa0] sm:$0xff] %v5169_v46 }
 0x6f2   : >> { %5172 = vst [vmem:[%s6539_s16 + $0xa8] sm:$0xff] %v5171_v24 }
 0x6f3   : >> { %5174 = vst [vmem:[%s6539_s16 + $0xb0] sm:$0xff] %v5173_v60 }
 0x6f4   : >> { %5176 = vst [vmem:[%s6539_s16 + $0xb8] sm:$0xff] %v5175_v15 }
 0x6f5   : >> { %5178 = vst [vmem:[%s6539_s16 + $0xc0] sm:$0xff] %v5177_v34 }
 0x6f6   : >> { %5180 = vst [vmem:[%s6539_s16 + $0xc8] sm:$0xff] %v5179_v59 }
 0x6f7   : >> { %5182 = vst [vmem:[%s6539_s16 + $0xd0] sm:$0xff] %v5181_v10 }
 0x6f8   : >> { %5184 = vst [vmem:[%s6539_s16 + $0xd8] sm:$0xff] %v5183_v42  ;;  %5125 = sbr.rel (!%p5122_p12) target bundleno = 1756 (0x6dc), region = 166 }
 0x6f9   : >> { %5186 = vst [vmem:[%s6539_s16 + $0xe0] sm:$0xff] %v5185_v41 }
 0x6fa   : >> { %5188 = vst [vmem:[%s6539_s16 + $0xe8] sm:$0xff] %v5187_v12 }
 0x6fb   : >> { %5190 = vst [vmem:[%s6539_s16 + $0xf0] sm:$0xff] %v5189_v50 }
 0x6fc   : >> { %5192 = vst [vmem:[%s6539_s16 + $0xf8] sm:$0xff] %v5191_v57  ;;  %s9908_s16 = smov %s9636_s29 }
 0x6fd PF: > { %s9701_s15 = sand.u32 31, %s9915_s30   ;;  %s5990_s18 = sshll.u32 %s9590_s23, 8 }
 0x6fe   : > { %s5204_s22 = scalar_lea.vmem %s8334_s28, %s5990_s18 [#allocation2]   ;;  %s5206_s20 = scalar_lea.vmem %s9584_s19, %s5990_s18  }
 0x6ff   : > { %p5882_p13 = scmp.le.s32.totalorder %s9701_s15, 0 }
 0x700   : > { %s6553_s29 = smov (!%p5882_p13), %s5206_s20   ;;  %s6557_s27 = smov (!%p5882_p13), %s5204_s22  }
 0x701   : > { %5297 = sbr.rel (%p5882_p13) target bundleno = 1806 (0x70e), region = 171  ;;  %s6561_s0 = smov (!%p5882_p13), 0  }
 0x702   : > { %s6565_s26 = smov (!%p5882_p13), 0  }
 0x706 LB: >> { %v5216_v44 = vld [vmem:[%s6559_s27] sm:$0xff]  ;;  %s5218_s30 = sadd.s32 1, %s6563_s0  ;;  %s5210_s26 = sadd.s32 1, %s6567_s26   ;;  %s6567_s26 = sphi %s6565_s26, %s5210_s26   ;;  %s6563_s0 = sphi %s6561_s0, %s6562_s0   ;;  %s6559_s27 = sphi %s6557_s27, %s5223_s27   ;;  %s6555_s29 = sphi %s6553_s29, %s5224_s29  }
 0x707   : >> { %5217 = vst [vmem:[%s6555_s29] sm:$0xff] %v5216_v44  ;;  %p5219_p0 = scmp.ge.s32.totalorder %s5218_s30, %s9701_s15  ;;  %p5209_p1 = scmp.ge.s32.totalorder %s5210_s26, %s9701_s15 }
 0x709   : >> { %s9919_s30 = smov (%p5219_p0, %s5218_s30), 0  ;;  %5212 = sbr.rel (!%p5209_p1) target bundleno = 1798 (0x706), region = 177 }
 0x70a   : >> { %s5883_s28 = sshll.u32 %s9919_s30, 3  ;;  %s6562_s0 = smov %s9919_s30  }
 0x70b   : >> { %s5223_s27 = scalar_lea.vmem %s5204_s22, %s5883_s28 [#allocation2]   ;;  %s5224_s29 = scalar_lea.vmem %s5206_s20, %s5883_s28  }
 0x70e PF: > { %s9911_s29 = sld [smem:[#allocation3_spill]]  ;;  %p21_p2 = scmp.ge.s32.totalorder %s6659_s17, 4  }
 0x70f   : > { %s9912_s30 = sld [smem:[#allocation4_spill]]  ;;  %s9913_s15 = smov %s6659_s17 }
 0x710   :  { %23 = sbr.rel (!%p21_p2) target bundleno = 4 (0x4), region = 188 }

</bundles_post_ra>
